<compile_context>
chip_gen: v7x
topology: tpu7x:2x2x1
jax: 0.10.0
libtpu: 0.0.40
codegen_flags: <defaults>
</compile_context>

<pallas_src>
import functools

import jax
import jax.numpy as jnp
from jax.experimental import pallas as pl
from jax.experimental.pallas import tpu as pltpu

C_IN, C1, C2, N_CLASSES = 4, 8, 32, 2
KH = KW = 3  # 3x3 convs, padding=1 ("same")


# ------------------------------ fused kernel -------------------------------

def _fused_mri_kernel(x_ref, w1_ref, b1_ref, w2_ref, b2_ref, wc_ref, bc_ref,
                      o_ref, pad1_ref, pad2_ref, *, B, H, W, c_in, c1, c2):
    """conv3x3+ReLU -> conv3x3+ReLU -> global-avg-pool -> linear, all in VMEM.

    Layouts (all values 2D, lane-dense):
      x_ref    : (B*H, W*c_in)   activation; row = b*H+i, col = j*c_in+c   (f32)
      w1_ref   : (9, W*c_in, W*c1)  per-tap block-diagonal conv1 weights   (bf16)
      w2_ref   : (9, W*c1,  W*c2)   per-tap block-diagonal conv2 weights   (bf16)
      b1_ref   : (1, W*c1),  b2_ref: (1, W*c2)   biases tiled over j       (f32)
      wc_ref   : (W*c2, n_classes)  classifier weight tiled over j,
                                    pre-scaled by 1/(H*W)                  (f32)
      bc_ref   : (1, n_classes)                                            (f32)
      pad1_ref : (B*(H+2), (W+2)*c_in)  zero-padded conv1 input scratch    (f32)
      pad2_ref : (B*(H+2), (W+2)*c1)    zero-padded conv2 input scratch    (f32)
    """
    Hp = H + 2

    # Zero the padded scratches (borders are the "same" conv padding).
    pad1_ref[...] = jnp.zeros_like(pad1_ref)
    pad2_ref[...] = jnp.zeros_like(pad2_ref)

    # Scatter the input into the interior of the padded scratch (per image).
    for b in range(B):
        pad1_ref[b * Hp + 1:b * Hp + 1 + H, c_in:c_in + W * c_in] = \
            x_ref[b * H:(b + 1) * H, :]

    # ---------------- conv1 (3x3 same) + ReLU : 9 accumulating matmuls -----
    for b in range(B):
        acc = jnp.zeros((H, W * c1), jnp.float32)
        for t in range(KH * KW):
            ki, kj = t // KW, t % KW
            tap = pad1_ref[b * Hp + ki:b * Hp + ki + H,
                           kj * c_in:kj * c_in + W * c_in]          # (H, W*c_in)
            acc += jnp.dot(tap.astype(w1_ref.dtype), w1_ref[t],
                           preferred_element_type=jnp.float32)
        h1 = jnp.maximum(acc + b1_ref[...], 0.0)                    # (H, W*c1) f32
        pad2_ref[b * Hp + 1:b * Hp + 1 + H, c1:c1 + W * c1] = h1

    # ------------- conv2 (3x3 same) + ReLU + GAP + classifier --------------
    for b in range(B):
        acc = jnp.zeros((H, W * c2), jnp.float32)
        for t in range(KH * KW):
            ki, kj = t // KW, t % KW
            tap = pad2_ref[b * Hp + ki:b * Hp + ki + H,
                           kj * c1:kj * c1 + W * c1]                # (H, W*c1)
            acc += jnp.dot(tap.astype(w2_ref.dtype), w2_ref[t],
                           preferred_element_type=jnp.float32)
        h2 = jnp.maximum(acc + b2_ref[...], 0.0)                    # (H, W*c2) f32
        # GAP + Linear: wc is tiled over j and pre-scaled by 1/(H*W), so the
        # projection followed by a row-sum over i completes the spatial mean.
        p = jnp.dot(h2, wc_ref[...], preferred_element_type=jnp.float32)  # (H, n_cls)
        logit = jnp.sum(p, axis=0, keepdims=True) + bc_ref[...]           # (1, n_cls)
        o_ref[b:b + 1, :] = logit.astype(o_ref.dtype)


# ------------------------------ model setup --------------------------------

def init_params(key, c_in=C_IN, c1=C1, c2=C2, n_classes=N_CLASSES, H=16, W=16):
    """Synthetic encoder/classifier weights, packed ONCE for the fused kernel.

      * per-tap conv weights (c_in, c_out) -> block-diagonal (W*c_in, W*c_out)
        bf16 matrices (kron with I_W): each 3x3 tap becomes one lane-dense matmul
        on the (B*H, W*C) activation layout.
      * biases tiled W times -> (1, W*c_out) f32 rows.
      * classifier weight tiled W times and pre-scaled by 1/(H*W) so GAP+linear
        collapse into one in-kernel matmul + row-sum.
    """
    k1, k2, k3 = jax.random.split(key, 3)
    w1 = jax.random.normal(k1, (KH * KW, c_in, c1), jnp.float32) / (KH * KW * c_in) ** 0.5
    b1 = jnp.zeros((c1,), jnp.float32)
    w2 = jax.random.normal(k2, (KH * KW, c1, c2), jnp.float32) / (KH * KW * c1) ** 0.5
    b2 = jnp.zeros((c2,), jnp.float32)
    wc = jax.random.normal(k3, (c2, n_classes), jnp.float32) / c2 ** 0.5
    bc = jnp.zeros((n_classes,), jnp.float32)

    eye_w = jnp.eye(W, dtype=jnp.float32)
    w1_big = jnp.stack([jnp.kron(eye_w, w1[t]) for t in range(KH * KW)]
                       ).astype(jnp.bfloat16)                       # (9, W*c_in, W*c1)
    w2_big = jnp.stack([jnp.kron(eye_w, w2[t]) for t in range(KH * KW)]
                       ).astype(jnp.bfloat16)                       # (9, W*c1, W*c2)
    b1_big = jnp.tile(b1, W).reshape(1, W * c1)
    b2_big = jnp.tile(b2, W).reshape(1, W * c2)
    wc_big = jnp.tile(wc, (W, 1)) / float(H * W)                    # (W*c2, n_classes)
    return dict(w1_big=w1_big, b1_big=b1_big, w2_big=w2_big, b2_big=b2_big,
                wc_big=wc_big, bc=bc.reshape(1, n_classes))


@jax.jit
def mri_wrapper_forward(params, x_nchw):
    B, c_in, H, W = x_nchw.shape
    c1 = params["w1_big"].shape[2] // W
    c2 = params["w2_big"].shape[2] // W
    n_classes = params["bc"].shape[1]

    # Layout plumbing only: NCHW -> lane-dense (B*H, W*C); tiny (8 KB) reformat.
    # Everything downstream stays inside the single fused kernel / VMEM.
    x2d = jnp.transpose(x_nchw, (0, 2, 3, 1)).reshape(B * H, W * c_in)

    args = (x2d, params["w1_big"], params["b1_big"], params["w2_big"],
            params["b2_big"], params["wc_big"], params["bc"])

    flops = (2 * B * (KH * KW) * H * (W * c_in) * (W * c1)
             + 2 * B * (KH * KW) * H * (W * c1) * (W * c2)
             + 2 * B * H * (W * c2) * n_classes)
    bytes_accessed = sum(int(a.size) * a.dtype.itemsize for a in args) + B * n_classes * 4

    kernel = functools.partial(_fused_mri_kernel, B=B, H=H, W=W,
                               c_in=c_in, c1=c1, c2=c2)
    return pl.pallas_call(
        kernel,
        out_shape=jax.ShapeDtypeStruct((B, n_classes), jnp.float32),
        in_specs=[pl.BlockSpec(memory_space=pltpu.MemorySpace.VMEM)] * len(args),
        out_specs=pl.BlockSpec(memory_space=pltpu.MemorySpace.VMEM),
        scratch_shapes=[
            pltpu.VMEM((B * (H + 2), (W + 2) * c_in), jnp.float32),   # padded conv1 input
            pltpu.VMEM((B * (H + 2), (W + 2) * c1), jnp.float32),     # padded conv2 input
        ],
        cost_estimate=pl.CostEstimate(flops=flops, transcendentals=0,
                                      bytes_accessed=bytes_accessed),
    )(*args)


if __name__ == "__main__":
    key = jax.random.PRNGKey(0)
    kx, kp = jax.random.split(key)
    x = jax.random.normal(kx, (2, 4, 16, 16), jnp.float32)   # NCHW, like PyTorch
    params = init_params(kp, H=16, W=16)
    logit = mri_wrapper_forward(params, x)
    jax.block_until_ready(logit)
    assert logit.shape == (2, 2)
    print("KERNEL_OK")
</pallas_src>

<mosaic_0001>
module attributes {stable_mosaic.version = 11 : i64} {
  func.func @_fused_mri_kernel(%arg0: memref<32x64xf32, #tpu.memory_space<vmem>>, %arg1: memref<9x64x128xbf16, #tpu.memory_space<vmem>>, %arg2: memref<1x128xf32, #tpu.memory_space<vmem>>, %arg3: memref<9x128x512xbf16, #tpu.memory_space<vmem>>, %arg4: memref<1x512xf32, #tpu.memory_space<vmem>>, %arg5: memref<512x2xf32, #tpu.memory_space<vmem>>, %arg6: memref<1x2xf32, #tpu.memory_space<vmem>>, %arg7: memref<2x2xf32, #tpu.memory_space<vmem>>, %arg8: memref<36x72xf32, #tpu.memory_space<vmem>>, %arg9: memref<36x144xf32, #tpu.memory_space<vmem>>) attributes {dimension_semantics = [], scalar_prefetch = 0 : i64, scratch_operands = 2 : i64, tpu.core_type = #tpu.core_type<tc>} {
    %cst = arith.constant 0.000000e+00 : f32
    %0 = vector.broadcast %cst : f32 to vector<36x72xf32>
    %c0 = arith.constant 0 : index
    %c0_0 = arith.constant 0 : index
    %1 = vector.load %arg8[%c0, %c0_0] : memref<36x72xf32, #tpu.memory_space<vmem>>, vector<36x72xf32>
    tpu.vector_store %arg8[%c0, %c0_0], %0 {strides = array<i32>} : memref<36x72xf32, #tpu.memory_space<vmem>>, vector<36x72xf32>,
    %cst_1 = arith.constant 0.000000e+00 : f32
    %2 = vector.broadcast %cst_1 : f32 to vector<36x144xf32>
    %c0_2 = arith.constant 0 : index
    %c0_3 = arith.constant 0 : index
    %3 = vector.load %arg9[%c0_2, %c0_3] : memref<36x144xf32, #tpu.memory_space<vmem>>, vector<36x144xf32>
    tpu.vector_store %arg9[%c0_2, %c0_3], %2 {strides = array<i32>} : memref<36x144xf32, #tpu.memory_space<vmem>>, vector<36x144xf32>,
    %c0_4 = arith.constant 0 : index
    %c0_5 = arith.constant 0 : index
    %4 = vector.load %arg0[%c0_4, %c0_5] : memref<32x64xf32, #tpu.memory_space<vmem>>, vector<16x64xf32>
    %c1 = arith.constant 1 : index
    %c4 = arith.constant 4 : index
    %5 = vector.load %arg8[%c1, %c4] : memref<36x72xf32, #tpu.memory_space<vmem>>, vector<16x64xf32>
    tpu.vector_store %arg8[%c1, %c4], %4 {strides = array<i32>} : memref<36x72xf32, #tpu.memory_space<vmem>>, vector<16x64xf32>,
    %c16 = arith.constant 16 : index
    %c0_6 = arith.constant 0 : index
    %6 = vector.load %arg0[%c16, %c0_6] : memref<32x64xf32, #tpu.memory_space<vmem>>, vector<16x64xf32>
    %c19 = arith.constant 19 : index
    %c4_7 = arith.constant 4 : index
    %7 = vector.load %arg8[%c19, %c4_7] : memref<36x72xf32, #tpu.memory_space<vmem>>, vector<16x64xf32>
    tpu.vector_store %arg8[%c19, %c4_7], %6 {strides = array<i32>} : memref<36x72xf32, #tpu.memory_space<vmem>>, vector<16x64xf32>,
    %cst_8 = arith.constant 0.000000e+00 : f32
    %8 = vector.broadcast %cst_8 : f32 to vector<16x128xf32>
    %c0_9 = arith.constant 0 : index
    %c0_10 = arith.constant 0 : index
    %9 = vector.load %arg8[%c0_9, %c0_10] : memref<36x72xf32, #tpu.memory_space<vmem>>, vector<16x64xf32>
    %10 = arith.truncf %9 : vector<16x64xf32> to vector<16x64xbf16>
    %c0_11 = arith.constant 0 : index
    %c0_12 = arith.constant 0 : index
    %c0_13 = arith.constant 0 : index
    %11 = vector.load %arg1[%c0_11, %c0_12, %c0_13] : memref<9x64x128xbf16, #tpu.memory_space<vmem>>, vector<1x64x128xbf16>
    %12 = vector.shape_cast %11 : vector<1x64x128xbf16> to vector<64x128xbf16>
    %cst_14 = arith.constant dense<0.000000e+00> : vector<16x128xf32>
    %13 = tpu.matmul %10, %12, %cst_14 {dimension_numbers = #tpu.dot_dimension_numbers<[1], [0], [0], [1], [0, 0, 1, 1], [], []>} : vector<16x64xbf16>, vector<64x128xbf16>, vector<16x128xf32> -> vector<16x128xf32>
    %14 = arith.addf %8, %13 : vector<16x128xf32>
    %c0_15 = arith.constant 0 : index
    %c4_16 = arith.constant 4 : index
    %15 = vector.load %arg8[%c0_15, %c4_16] : memref<36x72xf32, #tpu.memory_space<vmem>>, vector<16x64xf32>
    %16 = arith.truncf %15 : vector<16x64xf32> to vector<16x64xbf16>
    %c1_17 = arith.constant 1 : index
    %c0_18 = arith.constant 0 : index
    %c0_19 = arith.constant 0 : index
    %17 = vector.load %arg1[%c1_17, %c0_18, %c0_19] : memref<9x64x128xbf16, #tpu.memory_space<vmem>>, vector<1x64x128xbf16>
    %18 = vector.shape_cast %17 : vector<1x64x128xbf16> to vector<64x128xbf16>
    %cst_20 = arith.constant dense<0.000000e+00> : vector<16x128xf32>
    %19 = tpu.matmul %16, %18, %cst_20 {dimension_numbers = #tpu.dot_dimension_numbers<[1], [0], [0], [1], [0, 0, 1, 1], [], []>} : vector<16x64xbf16>, vector<64x128xbf16>, vector<16x128xf32> -> vector<16x128xf32>
    %20 = arith.addf %14, %19 : vector<16x128xf32>
    %c0_21 = arith.constant 0 : index
    %c8 = arith.constant 8 : index
    %21 = vector.load %arg8[%c0_21, %c8] : memref<36x72xf32, #tpu.memory_space<vmem>>, vector<16x64xf32>
    %22 = arith.truncf %21 : vector<16x64xf32> to vector<16x64xbf16>
    %c2 = arith.constant 2 : index
    %c0_22 = arith.constant 0 : index
    %c0_23 = arith.constant 0 : index
    %23 = vector.load %arg1[%c2, %c0_22, %c0_23] : memref<9x64x128xbf16, #tpu.memory_space<vmem>>, vector<1x64x128xbf16>
    %24 = vector.shape_cast %23 : vector<1x64x128xbf16> to vector<64x128xbf16>
    %cst_24 = arith.constant dense<0.000000e+00> : vector<16x128xf32>
    %25 = tpu.matmul %22, %24, %cst_24 {dimension_numbers = #tpu.dot_dimension_numbers<[1], [0], [0], [1], [0, 0, 1, 1], [], []>} : vector<16x64xbf16>, vector<64x128xbf16>, vector<16x128xf32> -> vector<16x128xf32>
    %26 = arith.addf %20, %25 : vector<16x128xf32>
    %c1_25 = arith.constant 1 : index
    %c0_26 = arith.constant 0 : index
    %27 = vector.load %arg8[%c1_25, %c0_26] : memref<36x72xf32, #tpu.memory_space<vmem>>, vector<16x64xf32>
    %28 = arith.truncf %27 : vector<16x64xf32> to vector<16x64xbf16>
    %c3 = arith.constant 3 : index
    %c0_27 = arith.constant 0 : index
    %c0_28 = arith.constant 0 : index
    %29 = vector.load %arg1[%c3, %c0_27, %c0_28] : memref<9x64x128xbf16, #tpu.memory_space<vmem>>, vector<1x64x128xbf16>
    %30 = vector.shape_cast %29 : vector<1x64x128xbf16> to vector<64x128xbf16>
    %cst_29 = arith.constant dense<0.000000e+00> : vector<16x128xf32>
    %31 = tpu.matmul %28, %30, %cst_29 {dimension_numbers = #tpu.dot_dimension_numbers<[1], [0], [0], [1], [0, 0, 1, 1], [], []>} : vector<16x64xbf16>, vector<64x128xbf16>, vector<16x128xf32> -> vector<16x128xf32>
    %32 = arith.addf %26, %31 : vector<16x128xf32>
    %c1_30 = arith.constant 1 : index
    %c4_31 = arith.constant 4 : index
    %33 = vector.load %arg8[%c1_30, %c4_31] : memref<36x72xf32, #tpu.memory_space<vmem>>, vector<16x64xf32>
    %34 = arith.truncf %33 : vector<16x64xf32> to vector<16x64xbf16>
    %c4_32 = arith.constant 4 : index
    %c0_33 = arith.constant 0 : index
    %c0_34 = arith.constant 0 : index
    %35 = vector.load %arg1[%c4_32, %c0_33, %c0_34] : memref<9x64x128xbf16, #tpu.memory_space<vmem>>, vector<1x64x128xbf16>
    %36 = vector.shape_cast %35 : vector<1x64x128xbf16> to vector<64x128xbf16>
    %cst_35 = arith.constant dense<0.000000e+00> : vector<16x128xf32>
    %37 = tpu.matmul %34, %36, %cst_35 {dimension_numbers = #tpu.dot_dimension_numbers<[1], [0], [0], [1], [0, 0, 1, 1], [], []>} : vector<16x64xbf16>, vector<64x128xbf16>, vector<16x128xf32> -> vector<16x128xf32>
    %38 = arith.addf %32, %37 : vector<16x128xf32>
    %c1_36 = arith.constant 1 : index
    %c8_37 = arith.constant 8 : index
    %39 = vector.load %arg8[%c1_36, %c8_37] : memref<36x72xf32, #tpu.memory_space<vmem>>, vector<16x64xf32>
    %40 = arith.truncf %39 : vector<16x64xf32> to vector<16x64xbf16>
    %c5 = arith.constant 5 : index
    %c0_38 = arith.constant 0 : index
    %c0_39 = arith.constant 0 : index
    %41 = vector.load %arg1[%c5, %c0_38, %c0_39] : memref<9x64x128xbf16, #tpu.memory_space<vmem>>, vector<1x64x128xbf16>
    %42 = vector.shape_cast %41 : vector<1x64x128xbf16> to vector<64x128xbf16>
    %cst_40 = arith.constant dense<0.000000e+00> : vector<16x128xf32>
    %43 = tpu.matmul %40, %42, %cst_40 {dimension_numbers = #tpu.dot_dimension_numbers<[1], [0], [0], [1], [0, 0, 1, 1], [], []>} : vector<16x64xbf16>, vector<64x128xbf16>, vector<16x128xf32> -> vector<16x128xf32>
    %44 = arith.addf %38, %43 : vector<16x128xf32>
    %c2_41 = arith.constant 2 : index
    %c0_42 = arith.constant 0 : index
    %45 = vector.load %arg8[%c2_41, %c0_42] : memref<36x72xf32, #tpu.memory_space<vmem>>, vector<16x64xf32>
    %46 = arith.truncf %45 : vector<16x64xf32> to vector<16x64xbf16>
    %c6 = arith.constant 6 : index
    %c0_43 = arith.constant 0 : index
    %c0_44 = arith.constant 0 : index
    %47 = vector.load %arg1[%c6, %c0_43, %c0_44] : memref<9x64x128xbf16, #tpu.memory_space<vmem>>, vector<1x64x128xbf16>
    %48 = vector.shape_cast %47 : vector<1x64x128xbf16> to vector<64x128xbf16>
    %cst_45 = arith.constant dense<0.000000e+00> : vector<16x128xf32>
    %49 = tpu.matmul %46, %48, %cst_45 {dimension_numbers = #tpu.dot_dimension_numbers<[1], [0], [0], [1], [0, 0, 1, 1], [], []>} : vector<16x64xbf16>, vector<64x128xbf16>, vector<16x128xf32> -> vector<16x128xf32>
    %50 = arith.addf %44, %49 : vector<16x128xf32>
    %c2_46 = arith.constant 2 : index
    %c4_47 = arith.constant 4 : index
    %51 = vector.load %arg8[%c2_46, %c4_47] : memref<36x72xf32, #tpu.memory_space<vmem>>, vector<16x64xf32>
    %52 = arith.truncf %51 : vector<16x64xf32> to vector<16x64xbf16>
    %c7 = arith.constant 7 : index
    %c0_48 = arith.constant 0 : index
    %c0_49 = arith.constant 0 : index
    %53 = vector.load %arg1[%c7, %c0_48, %c0_49] : memref<9x64x128xbf16, #tpu.memory_space<vmem>>, vector<1x64x128xbf16>
    %54 = vector.shape_cast %53 : vector<1x64x128xbf16> to vector<64x128xbf16>
    %cst_50 = arith.constant dense<0.000000e+00> : vector<16x128xf32>
    %55 = tpu.matmul %52, %54, %cst_50 {dimension_numbers = #tpu.dot_dimension_numbers<[1], [0], [0], [1], [0, 0, 1, 1], [], []>} : vector<16x64xbf16>, vector<64x128xbf16>, vector<16x128xf32> -> vector<16x128xf32>
    %56 = arith.addf %50, %55 : vector<16x128xf32>
    %c2_51 = arith.constant 2 : index
    %c8_52 = arith.constant 8 : index
    %57 = vector.load %arg8[%c2_51, %c8_52] : memref<36x72xf32, #tpu.memory_space<vmem>>, vector<16x64xf32>
    %58 = arith.truncf %57 : vector<16x64xf32> to vector<16x64xbf16>
    %c8_53 = arith.constant 8 : index
    %c0_54 = arith.constant 0 : index
    %c0_55 = arith.constant 0 : index
    %59 = vector.load %arg1[%c8_53, %c0_54, %c0_55] : memref<9x64x128xbf16, #tpu.memory_space<vmem>>, vector<1x64x128xbf16>
    %60 = vector.shape_cast %59 : vector<1x64x128xbf16> to vector<64x128xbf16>
    %cst_56 = arith.constant dense<0.000000e+00> : vector<16x128xf32>
    %61 = tpu.matmul %58, %60, %cst_56 {dimension_numbers = #tpu.dot_dimension_numbers<[1], [0], [0], [1], [0, 0, 1, 1], [], []>} : vector<16x64xbf16>, vector<64x128xbf16>, vector<16x128xf32> -> vector<16x128xf32>
    %62 = arith.addf %56, %61 : vector<16x128xf32>
    %c0_57 = arith.constant 0 : index
    %c0_58 = arith.constant 0 : index
    %63 = vector.load %arg2[%c0_57, %c0_58] : memref<1x128xf32, #tpu.memory_space<vmem>>, vector<1x128xf32>
    %64 = vector.broadcast %63 : vector<1x128xf32> to vector<16x128xf32>
    %65 = arith.addf %62, %64 : vector<16x128xf32>
    %cst_59 = arith.constant 0.000000e+00 : f32
    %66 = vector.broadcast %cst_59 : f32 to vector<16x128xf32>
    %67 = arith.maximumf %65, %66 : vector<16x128xf32>
    %c1_60 = arith.constant 1 : index
    %c8_61 = arith.constant 8 : index
    %68 = vector.load %arg9[%c1_60, %c8_61] : memref<36x144xf32, #tpu.memory_space<vmem>>, vector<16x128xf32>
    tpu.vector_store %arg9[%c1_60, %c8_61], %67 {strides = array<i32>} : memref<36x144xf32, #tpu.memory_space<vmem>>, vector<16x128xf32>,
    %cst_62 = arith.constant 0.000000e+00 : f32
    %69 = vector.broadcast %cst_62 : f32 to vector<16x128xf32>
    %c18 = arith.constant 18 : index
    %c0_63 = arith.constant 0 : index
    %70 = vector.load %arg8[%c18, %c0_63] : memref<36x72xf32, #tpu.memory_space<vmem>>, vector<16x64xf32>
    %71 = arith.truncf %70 : vector<16x64xf32> to vector<16x64xbf16>
    %c0_64 = arith.constant 0 : index
    %c0_65 = arith.constant 0 : index
    %c0_66 = arith.constant 0 : index
    %72 = vector.load %arg1[%c0_64, %c0_65, %c0_66] : memref<9x64x128xbf16, #tpu.memory_space<vmem>>, vector<1x64x128xbf16>
    %73 = vector.shape_cast %72 : vector<1x64x128xbf16> to vector<64x128xbf16>
    %cst_67 = arith.constant dense<0.000000e+00> : vector<16x128xf32>
    %74 = tpu.matmul %71, %73, %cst_67 {dimension_numbers = #tpu.dot_dimension_numbers<[1], [0], [0], [1], [0, 0, 1, 1], [], []>} : vector<16x64xbf16>, vector<64x128xbf16>, vector<16x128xf32> -> vector<16x128xf32>
    %75 = arith.addf %69, %74 : vector<16x128xf32>
    %c18_68 = arith.constant 18 : index
    %c4_69 = arith.constant 4 : index
    %76 = vector.load %arg8[%c18_68, %c4_69] : memref<36x72xf32, #tpu.memory_space<vmem>>, vector<16x64xf32>
    %77 = arith.truncf %76 : vector<16x64xf32> to vector<16x64xbf16>
    %c1_70 = arith.constant 1 : index
    %c0_71 = arith.constant 0 : index
    %c0_72 = arith.constant 0 : index
    %78 = vector.load %arg1[%c1_70, %c0_71, %c0_72] : memref<9x64x128xbf16, #tpu.memory_space<vmem>>, vector<1x64x128xbf16>
    %79 = vector.shape_cast %78 : vector<1x64x128xbf16> to vector<64x128xbf16>
    %cst_73 = arith.constant dense<0.000000e+00> : vector<16x128xf32>
    %80 = tpu.matmul %77, %79, %cst_73 {dimension_numbers = #tpu.dot_dimension_numbers<[1], [0], [0], [1], [0, 0, 1, 1], [], []>} : vector<16x64xbf16>, vector<64x128xbf16>, vector<16x128xf32> -> vector<16x128xf32>
    %81 = arith.addf %75, %80 : vector<16x128xf32>
    %c18_74 = arith.constant 18 : index
    %c8_75 = arith.constant 8 : index
    %82 = vector.load %arg8[%c18_74, %c8_75] : memref<36x72xf32, #tpu.memory_space<vmem>>, vector<16x64xf32>
    %83 = arith.truncf %82 : vector<16x64xf32> to vector<16x64xbf16>
    %c2_76 = arith.constant 2 : index
    %c0_77 = arith.constant 0 : index
    %c0_78 = arith.constant 0 : index
    %84 = vector.load %arg1[%c2_76, %c0_77, %c0_78] : memref<9x64x128xbf16, #tpu.memory_space<vmem>>, vector<1x64x128xbf16>
    %85 = vector.shape_cast %84 : vector<1x64x128xbf16> to vector<64x128xbf16>
    %cst_79 = arith.constant dense<0.000000e+00> : vector<16x128xf32>
    %86 = tpu.matmul %83, %85, %cst_79 {dimension_numbers = #tpu.dot_dimension_numbers<[1], [0], [0], [1], [0, 0, 1, 1], [], []>} : vector<16x64xbf16>, vector<64x128xbf16>, vector<16x128xf32> -> vector<16x128xf32>
    %87 = arith.addf %81, %86 : vector<16x128xf32>
    %c19_80 = arith.constant 19 : index
    %c0_81 = arith.constant 0 : index
    %88 = vector.load %arg8[%c19_80, %c0_81] : memref<36x72xf32, #tpu.memory_space<vmem>>, vector<16x64xf32>
    %89 = arith.truncf %88 : vector<16x64xf32> to vector<16x64xbf16>
    %c3_82 = arith.constant 3 : index
    %c0_83 = arith.constant 0 : index
    %c0_84 = arith.constant 0 : index
    %90 = vector.load %arg1[%c3_82, %c0_83, %c0_84] : memref<9x64x128xbf16, #tpu.memory_space<vmem>>, vector<1x64x128xbf16>
    %91 = vector.shape_cast %90 : vector<1x64x128xbf16> to vector<64x128xbf16>
    %cst_85 = arith.constant dense<0.000000e+00> : vector<16x128xf32>
    %92 = tpu.matmul %89, %91, %cst_85 {dimension_numbers = #tpu.dot_dimension_numbers<[1], [0], [0], [1], [0, 0, 1, 1], [], []>} : vector<16x64xbf16>, vector<64x128xbf16>, vector<16x128xf32> -> vector<16x128xf32>
    %93 = arith.addf %87, %92 : vector<16x128xf32>
    %c19_86 = arith.constant 19 : index
    %c4_87 = arith.constant 4 : index
    %94 = vector.load %arg8[%c19_86, %c4_87] : memref<36x72xf32, #tpu.memory_space<vmem>>, vector<16x64xf32>
    %95 = arith.truncf %94 : vector<16x64xf32> to vector<16x64xbf16>
    %c4_88 = arith.constant 4 : index
    %c0_89 = arith.constant 0 : index
    %c0_90 = arith.constant 0 : index
    %96 = vector.load %arg1[%c4_88, %c0_89, %c0_90] : memref<9x64x128xbf16, #tpu.memory_space<vmem>>, vector<1x64x128xbf16>
    %97 = vector.shape_cast %96 : vector<1x64x128xbf16> to vector<64x128xbf16>
    %cst_91 = arith.constant dense<0.000000e+00> : vector<16x128xf32>
    %98 = tpu.matmul %95, %97, %cst_91 {dimension_numbers = #tpu.dot_dimension_numbers<[1], [0], [0], [1], [0, 0, 1, 1], [], []>} : vector<16x64xbf16>, vector<64x128xbf16>, vector<16x128xf32> -> vector<16x128xf32>
    %99 = arith.addf %93, %98 : vector<16x128xf32>
    %c19_92 = arith.constant 19 : index
    %c8_93 = arith.constant 8 : index
    %100 = vector.load %arg8[%c19_92, %c8_93] : memref<36x72xf32, #tpu.memory_space<vmem>>, vector<16x64xf32>
    %101 = arith.truncf %100 : vector<16x64xf32> to vector<16x64xbf16>
    %c5_94 = arith.constant 5 : index
    %c0_95 = arith.constant 0 : index
    %c0_96 = arith.constant 0 : index
    %102 = vector.load %arg1[%c5_94, %c0_95, %c0_96] : memref<9x64x128xbf16, #tpu.memory_space<vmem>>, vector<1x64x128xbf16>
    %103 = vector.shape_cast %102 : vector<1x64x128xbf16> to vector<64x128xbf16>
    %cst_97 = arith.constant dense<0.000000e+00> : vector<16x128xf32>
    %104 = tpu.matmul %101, %103, %cst_97 {dimension_numbers = #tpu.dot_dimension_numbers<[1], [0], [0], [1], [0, 0, 1, 1], [], []>} : vector<16x64xbf16>, vector<64x128xbf16>, vector<16x128xf32> -> vector<16x128xf32>
    %105 = arith.addf %99, %104 : vector<16x128xf32>
    %c20 = arith.constant 20 : index
    %c0_98 = arith.constant 0 : index
    %106 = vector.load %arg8[%c20, %c0_98] : memref<36x72xf32, #tpu.memory_space<vmem>>, vector<16x64xf32>
    %107 = arith.truncf %106 : vector<16x64xf32> to vector<16x64xbf16>
    %c6_99 = arith.constant 6 : index
    %c0_100 = arith.constant 0 : index
    %c0_101 = arith.constant 0 : index
    %108 = vector.load %arg1[%c6_99, %c0_100, %c0_101] : memref<9x64x128xbf16, #tpu.memory_space<vmem>>, vector<1x64x128xbf16>
    %109 = vector.shape_cast %108 : vector<1x64x128xbf16> to vector<64x128xbf16>
    %cst_102 = arith.constant dense<0.000000e+00> : vector<16x128xf32>
    %110 = tpu.matmul %107, %109, %cst_102 {dimension_numbers = #tpu.dot_dimension_numbers<[1], [0], [0], [1], [0, 0, 1, 1], [], []>} : vector<16x64xbf16>, vector<64x128xbf16>, vector<16x128xf32> -> vector<16x128xf32>
    %111 = arith.addf %105, %110 : vector<16x128xf32>
    %c20_103 = arith.constant 20 : index
    %c4_104 = arith.constant 4 : index
    %112 = vector.load %arg8[%c20_103, %c4_104] : memref<36x72xf32, #tpu.memory_space<vmem>>, vector<16x64xf32>
    %113 = arith.truncf %112 : vector<16x64xf32> to vector<16x64xbf16>
    %c7_105 = arith.constant 7 : index
    %c0_106 = arith.constant 0 : index
    %c0_107 = arith.constant 0 : index
    %114 = vector.load %arg1[%c7_105, %c0_106, %c0_107] : memref<9x64x128xbf16, #tpu.memory_space<vmem>>, vector<1x64x128xbf16>
    %115 = vector.shape_cast %114 : vector<1x64x128xbf16> to vector<64x128xbf16>
    %cst_108 = arith.constant dense<0.000000e+00> : vector<16x128xf32>
    %116 = tpu.matmul %113, %115, %cst_108 {dimension_numbers = #tpu.dot_dimension_numbers<[1], [0], [0], [1], [0, 0, 1, 1], [], []>} : vector<16x64xbf16>, vector<64x128xbf16>, vector<16x128xf32> -> vector<16x128xf32>
    %117 = arith.addf %111, %116 : vector<16x128xf32>
    %c20_109 = arith.constant 20 : index
    %c8_110 = arith.constant 8 : index
    %118 = vector.load %arg8[%c20_109, %c8_110] : memref<36x72xf32, #tpu.memory_space<vmem>>, vector<16x64xf32>
    %119 = arith.truncf %118 : vector<16x64xf32> to vector<16x64xbf16>
    %c8_111 = arith.constant 8 : index
    %c0_112 = arith.constant 0 : index
    %c0_113 = arith.constant 0 : index
    %120 = vector.load %arg1[%c8_111, %c0_112, %c0_113] : memref<9x64x128xbf16, #tpu.memory_space<vmem>>, vector<1x64x128xbf16>
    %121 = vector.shape_cast %120 : vector<1x64x128xbf16> to vector<64x128xbf16>
    %cst_114 = arith.constant dense<0.000000e+00> : vector<16x128xf32>
    %122 = tpu.matmul %119, %121, %cst_114 {dimension_numbers = #tpu.dot_dimension_numbers<[1], [0], [0], [1], [0, 0, 1, 1], [], []>} : vector<16x64xbf16>, vector<64x128xbf16>, vector<16x128xf32> -> vector<16x128xf32>
    %123 = arith.addf %117, %122 : vector<16x128xf32>
    %c0_115 = arith.constant 0 : index
    %c0_116 = arith.constant 0 : index
    %124 = vector.load %arg2[%c0_115, %c0_116] : memref<1x128xf32, #tpu.memory_space<vmem>>, vector<1x128xf32>
    %125 = vector.broadcast %124 : vector<1x128xf32> to vector<16x128xf32>
    %126 = arith.addf %123, %125 : vector<16x128xf32>
    %cst_117 = arith.constant 0.000000e+00 : f32
    %127 = vector.broadcast %cst_117 : f32 to vector<16x128xf32>
    %128 = arith.maximumf %126, %127 : vector<16x128xf32>
    %c19_118 = arith.constant 19 : index
    %c8_119 = arith.constant 8 : index
    %129 = vector.load %arg9[%c19_118, %c8_119] : memref<36x144xf32, #tpu.memory_space<vmem>>, vector<16x128xf32>
    tpu.vector_store %arg9[%c19_118, %c8_119], %128 {strides = array<i32>} : memref<36x144xf32, #tpu.memory_space<vmem>>, vector<16x128xf32>,
    %cst_120 = arith.constant 0.000000e+00 : f32
    %130 = vector.broadcast %cst_120 : f32 to vector<16x512xf32>
    %c0_121 = arith.constant 0 : index
    %c0_122 = arith.constant 0 : index
    %131 = vector.load %arg9[%c0_121, %c0_122] : memref<36x144xf32, #tpu.memory_space<vmem>>, vector<16x128xf32>
    %132 = arith.truncf %131 : vector<16x128xf32> to vector<16x128xbf16>
    %c0_123 = arith.constant 0 : index
    %c0_124 = arith.constant 0 : index
    %c0_125 = arith.constant 0 : index
    %133 = vector.load %arg3[%c0_123, %c0_124, %c0_125] : memref<9x128x512xbf16, #tpu.memory_space<vmem>>, vector<1x128x512xbf16>
    %134 = vector.shape_cast %133 : vector<1x128x512xbf16> to vector<128x512xbf16>
    %cst_126 = arith.constant dense<0.000000e+00> : vector<16x512xf32>
    %135 = tpu.matmul %132, %134, %cst_126 {dimension_numbers = #tpu.dot_dimension_numbers<[1], [0], [0], [1], [0, 0, 1, 1], [], []>} : vector<16x128xbf16>, vector<128x512xbf16>, vector<16x512xf32> -> vector<16x512xf32>
    %136 = arith.addf %130, %135 : vector<16x512xf32>
    %c0_127 = arith.constant 0 : index
    %c8_128 = arith.constant 8 : index
    %137 = vector.load %arg9[%c0_127, %c8_128] : memref<36x144xf32, #tpu.memory_space<vmem>>, vector<16x128xf32>
    %138 = arith.truncf %137 : vector<16x128xf32> to vector<16x128xbf16>
    %c1_129 = arith.constant 1 : index
    %c0_130 = arith.constant 0 : index
    %c0_131 = arith.constant 0 : index
    %139 = vector.load %arg3[%c1_129, %c0_130, %c0_131] : memref<9x128x512xbf16, #tpu.memory_space<vmem>>, vector<1x128x512xbf16>
    %140 = vector.shape_cast %139 : vector<1x128x512xbf16> to vector<128x512xbf16>
    %cst_132 = arith.constant dense<0.000000e+00> : vector<16x512xf32>
    %141 = tpu.matmul %138, %140, %cst_132 {dimension_numbers = #tpu.dot_dimension_numbers<[1], [0], [0], [1], [0, 0, 1, 1], [], []>} : vector<16x128xbf16>, vector<128x512xbf16>, vector<16x512xf32> -> vector<16x512xf32>
    %142 = arith.addf %136, %141 : vector<16x512xf32>
    %c0_133 = arith.constant 0 : index
    %c16_134 = arith.constant 16 : index
    %143 = vector.load %arg9[%c0_133, %c16_134] : memref<36x144xf32, #tpu.memory_space<vmem>>, vector<16x128xf32>
    %144 = arith.truncf %143 : vector<16x128xf32> to vector<16x128xbf16>
    %c2_135 = arith.constant 2 : index
    %c0_136 = arith.constant 0 : index
    %c0_137 = arith.constant 0 : index
    %145 = vector.load %arg3[%c2_135, %c0_136, %c0_137] : memref<9x128x512xbf16, #tpu.memory_space<vmem>>, vector<1x128x512xbf16>
    %146 = vector.shape_cast %145 : vector<1x128x512xbf16> to vector<128x512xbf16>
    %cst_138 = arith.constant dense<0.000000e+00> : vector<16x512xf32>
    %147 = tpu.matmul %144, %146, %cst_138 {dimension_numbers = #tpu.dot_dimension_numbers<[1], [0], [0], [1], [0, 0, 1, 1], [], []>} : vector<16x128xbf16>, vector<128x512xbf16>, vector<16x512xf32> -> vector<16x512xf32>
    %148 = arith.addf %142, %147 : vector<16x512xf32>
    %c1_139 = arith.constant 1 : index
    %c0_140 = arith.constant 0 : index
    %149 = vector.load %arg9[%c1_139, %c0_140] : memref<36x144xf32, #tpu.memory_space<vmem>>, vector<16x128xf32>
    %150 = arith.truncf %149 : vector<16x128xf32> to vector<16x128xbf16>
    %c3_141 = arith.constant 3 : index
    %c0_142 = arith.constant 0 : index
    %c0_143 = arith.constant 0 : index
    %151 = vector.load %arg3[%c3_141, %c0_142, %c0_143] : memref<9x128x512xbf16, #tpu.memory_space<vmem>>, vector<1x128x512xbf16>
    %152 = vector.shape_cast %151 : vector<1x128x512xbf16> to vector<128x512xbf16>
    %cst_144 = arith.constant dense<0.000000e+00> : vector<16x512xf32>
    %153 = tpu.matmul %150, %152, %cst_144 {dimension_numbers = #tpu.dot_dimension_numbers<[1], [0], [0], [1], [0, 0, 1, 1], [], []>} : vector<16x128xbf16>, vector<128x512xbf16>, vector<16x512xf32> -> vector<16x512xf32>
    %154 = arith.addf %148, %153 : vector<16x512xf32>
    %c1_145 = arith.constant 1 : index
    %c8_146 = arith.constant 8 : index
    %155 = vector.load %arg9[%c1_145, %c8_146] : memref<36x144xf32, #tpu.memory_space<vmem>>, vector<16x128xf32>
    %156 = arith.truncf %155 : vector<16x128xf32> to vector<16x128xbf16>
    %c4_147 = arith.constant 4 : index
    %c0_148 = arith.constant 0 : index
    %c0_149 = arith.constant 0 : index
    %157 = vector.load %arg3[%c4_147, %c0_148, %c0_149] : memref<9x128x512xbf16, #tpu.memory_space<vmem>>, vector<1x128x512xbf16>
    %158 = vector.shape_cast %157 : vector<1x128x512xbf16> to vector<128x512xbf16>
    %cst_150 = arith.constant dense<0.000000e+00> : vector<16x512xf32>
    %159 = tpu.matmul %156, %158, %cst_150 {dimension_numbers = #tpu.dot_dimension_numbers<[1], [0], [0], [1], [0, 0, 1, 1], [], []>} : vector<16x128xbf16>, vector<128x512xbf16>, vector<16x512xf32> -> vector<16x512xf32>
    %160 = arith.addf %154, %159 : vector<16x512xf32>
    %c1_151 = arith.constant 1 : index
    %c16_152 = arith.constant 16 : index
    %161 = vector.load %arg9[%c1_151, %c16_152] : memref<36x144xf32, #tpu.memory_space<vmem>>, vector<16x128xf32>
    %162 = arith.truncf %161 : vector<16x128xf32> to vector<16x128xbf16>
    %c5_153 = arith.constant 5 : index
    %c0_154 = arith.constant 0 : index
    %c0_155 = arith.constant 0 : index
    %163 = vector.load %arg3[%c5_153, %c0_154, %c0_155] : memref<9x128x512xbf16, #tpu.memory_space<vmem>>, vector<1x128x512xbf16>
    %164 = vector.shape_cast %163 : vector<1x128x512xbf16> to vector<128x512xbf16>
    %cst_156 = arith.constant dense<0.000000e+00> : vector<16x512xf32>
    %165 = tpu.matmul %162, %164, %cst_156 {dimension_numbers = #tpu.dot_dimension_numbers<[1], [0], [0], [1], [0, 0, 1, 1], [], []>} : vector<16x128xbf16>, vector<128x512xbf16>, vector<16x512xf32> -> vector<16x512xf32>
    %166 = arith.addf %160, %165 : vector<16x512xf32>
    %c2_157 = arith.constant 2 : index
    %c0_158 = arith.constant 0 : index
    %167 = vector.load %arg9[%c2_157, %c0_158] : memref<36x144xf32, #tpu.memory_space<vmem>>, vector<16x128xf32>
    %168 = arith.truncf %167 : vector<16x128xf32> to vector<16x128xbf16>
    %c6_159 = arith.constant 6 : index
    %c0_160 = arith.constant 0 : index
    %c0_161 = arith.constant 0 : index
    %169 = vector.load %arg3[%c6_159, %c0_160, %c0_161] : memref<9x128x512xbf16, #tpu.memory_space<vmem>>, vector<1x128x512xbf16>
    %170 = vector.shape_cast %169 : vector<1x128x512xbf16> to vector<128x512xbf16>
    %cst_162 = arith.constant dense<0.000000e+00> : vector<16x512xf32>
    %171 = tpu.matmul %168, %170, %cst_162 {dimension_numbers = #tpu.dot_dimension_numbers<[1], [0], [0], [1], [0, 0, 1, 1], [], []>} : vector<16x128xbf16>, vector<128x512xbf16>, vector<16x512xf32> -> vector<16x512xf32>
    %172 = arith.addf %166, %171 : vector<16x512xf32>
    %c2_163 = arith.constant 2 : index
    %c8_164 = arith.constant 8 : index
    %173 = vector.load %arg9[%c2_163, %c8_164] : memref<36x144xf32, #tpu.memory_space<vmem>>, vector<16x128xf32>
    %174 = arith.truncf %173 : vector<16x128xf32> to vector<16x128xbf16>
    %c7_165 = arith.constant 7 : index
    %c0_166 = arith.constant 0 : index
    %c0_167 = arith.constant 0 : index
    %175 = vector.load %arg3[%c7_165, %c0_166, %c0_167] : memref<9x128x512xbf16, #tpu.memory_space<vmem>>, vector<1x128x512xbf16>
    %176 = vector.shape_cast %175 : vector<1x128x512xbf16> to vector<128x512xbf16>
    %cst_168 = arith.constant dense<0.000000e+00> : vector<16x512xf32>
    %177 = tpu.matmul %174, %176, %cst_168 {dimension_numbers = #tpu.dot_dimension_numbers<[1], [0], [0], [1], [0, 0, 1, 1], [], []>} : vector<16x128xbf16>, vector<128x512xbf16>, vector<16x512xf32> -> vector<16x512xf32>
    %178 = arith.addf %172, %177 : vector<16x512xf32>
    %c2_169 = arith.constant 2 : index
    %c16_170 = arith.constant 16 : index
    %179 = vector.load %arg9[%c2_169, %c16_170] : memref<36x144xf32, #tpu.memory_space<vmem>>, vector<16x128xf32>
    %180 = arith.truncf %179 : vector<16x128xf32> to vector<16x128xbf16>
    %c8_171 = arith.constant 8 : index
    %c0_172 = arith.constant 0 : index
    %c0_173 = arith.constant 0 : index
    %181 = vector.load %arg3[%c8_171, %c0_172, %c0_173] : memref<9x128x512xbf16, #tpu.memory_space<vmem>>, vector<1x128x512xbf16>
    %182 = vector.shape_cast %181 : vector<1x128x512xbf16> to vector<128x512xbf16>
    %cst_174 = arith.constant dense<0.000000e+00> : vector<16x512xf32>
    %183 = tpu.matmul %180, %182, %cst_174 {dimension_numbers = #tpu.dot_dimension_numbers<[1], [0], [0], [1], [0, 0, 1, 1], [], []>} : vector<16x128xbf16>, vector<128x512xbf16>, vector<16x512xf32> -> vector<16x512xf32>
    %184 = arith.addf %178, %183 : vector<16x512xf32>
    %c0_175 = arith.constant 0 : index
    %c0_176 = arith.constant 0 : index
    %185 = vector.load %arg4[%c0_175, %c0_176] : memref<1x512xf32, #tpu.memory_space<vmem>>, vector<1x512xf32>
    %186 = vector.broadcast %185 : vector<1x512xf32> to vector<16x512xf32>
    %187 = arith.addf %184, %186 : vector<16x512xf32>
    %cst_177 = arith.constant 0.000000e+00 : f32
    %188 = vector.broadcast %cst_177 : f32 to vector<16x512xf32>
    %189 = arith.maximumf %187, %188 : vector<16x512xf32>
    %c0_178 = arith.constant 0 : index
    %c0_179 = arith.constant 0 : index
    %190 = vector.load %arg5[%c0_178, %c0_179] : memref<512x2xf32, #tpu.memory_space<vmem>>, vector<512x2xf32>
    %cst_180 = arith.constant dense<0.000000e+00> : vector<16x2xf32>
    %191 = tpu.matmul %189, %190, %cst_180 {dimension_numbers = #tpu.dot_dimension_numbers<[1], [0], [0], [1], [0, 0, 1, 1], [], []>} : vector<16x512xf32>, vector<512x2xf32>, vector<16x2xf32> -> vector<16x2xf32>
    %cst_181 = arith.constant dense<0.000000e+00> : vector<2xf32>
    %192 = vector.multi_reduction <add>, %191, %cst_181 [0] : vector<16x2xf32> to vector<2xf32>
    %193 = vector.shape_cast %192 : vector<2xf32> to vector<1x2xf32>
    %c0_182 = arith.constant 0 : index
    %c0_183 = arith.constant 0 : index
    %194 = vector.load %arg6[%c0_182, %c0_183] : memref<1x2xf32, #tpu.memory_space<vmem>>, vector<1x2xf32>
    %195 = arith.addf %193, %194 : vector<1x2xf32>
    %c0_184 = arith.constant 0 : index
    %c0_185 = arith.constant 0 : index
    %196 = vector.load %arg7[%c0_184, %c0_185] : memref<2x2xf32, #tpu.memory_space<vmem>>, vector<1x2xf32>
    tpu.vector_store %arg7[%c0_184, %c0_185], %195 {strides = array<i32>} : memref<2x2xf32, #tpu.memory_space<vmem>>, vector<1x2xf32>,
    %cst_186 = arith.constant 0.000000e+00 : f32
    %197 = vector.broadcast %cst_186 : f32 to vector<16x512xf32>
    %c18_187 = arith.constant 18 : index
    %c0_188 = arith.constant 0 : index
    %198 = vector.load %arg9[%c18_187, %c0_188] : memref<36x144xf32, #tpu.memory_space<vmem>>, vector<16x128xf32>
    %199 = arith.truncf %198 : vector<16x128xf32> to vector<16x128xbf16>
    %c0_189 = arith.constant 0 : index
    %c0_190 = arith.constant 0 : index
    %c0_191 = arith.constant 0 : index
    %200 = vector.load %arg3[%c0_189, %c0_190, %c0_191] : memref<9x128x512xbf16, #tpu.memory_space<vmem>>, vector<1x128x512xbf16>
    %201 = vector.shape_cast %200 : vector<1x128x512xbf16> to vector<128x512xbf16>
    %cst_192 = arith.constant dense<0.000000e+00> : vector<16x512xf32>
    %202 = tpu.matmul %199, %201, %cst_192 {dimension_numbers = #tpu.dot_dimension_numbers<[1], [0], [0], [1], [0, 0, 1, 1], [], []>} : vector<16x128xbf16>, vector<128x512xbf16>, vector<16x512xf32> -> vector<16x512xf32>
    %203 = arith.addf %197, %202 : vector<16x512xf32>
    %c18_193 = arith.constant 18 : index
    %c8_194 = arith.constant 8 : index
    %204 = vector.load %arg9[%c18_193, %c8_194] : memref<36x144xf32, #tpu.memory_space<vmem>>, vector<16x128xf32>
    %205 = arith.truncf %204 : vector<16x128xf32> to vector<16x128xbf16>
    %c1_195 = arith.constant 1 : index
    %c0_196 = arith.constant 0 : index
    %c0_197 = arith.constant 0 : index
    %206 = vector.load %arg3[%c1_195, %c0_196, %c0_197] : memref<9x128x512xbf16, #tpu.memory_space<vmem>>, vector<1x128x512xbf16>
    %207 = vector.shape_cast %206 : vector<1x128x512xbf16> to vector<128x512xbf16>
    %cst_198 = arith.constant dense<0.000000e+00> : vector<16x512xf32>
    %208 = tpu.matmul %205, %207, %cst_198 {dimension_numbers = #tpu.dot_dimension_numbers<[1], [0], [0], [1], [0, 0, 1, 1], [], []>} : vector<16x128xbf16>, vector<128x512xbf16>, vector<16x512xf32> -> vector<16x512xf32>
    %209 = arith.addf %203, %208 : vector<16x512xf32>
    %c18_199 = arith.constant 18 : index
    %c16_200 = arith.constant 16 : index
    %210 = vector.load %arg9[%c18_199, %c16_200] : memref<36x144xf32, #tpu.memory_space<vmem>>, vector<16x128xf32>
    %211 = arith.truncf %210 : vector<16x128xf32> to vector<16x128xbf16>
    %c2_201 = arith.constant 2 : index
    %c0_202 = arith.constant 0 : index
    %c0_203 = arith.constant 0 : index
    %212 = vector.load %arg3[%c2_201, %c0_202, %c0_203] : memref<9x128x512xbf16, #tpu.memory_space<vmem>>, vector<1x128x512xbf16>
    %213 = vector.shape_cast %212 : vector<1x128x512xbf16> to vector<128x512xbf16>
    %cst_204 = arith.constant dense<0.000000e+00> : vector<16x512xf32>
    %214 = tpu.matmul %211, %213, %cst_204 {dimension_numbers = #tpu.dot_dimension_numbers<[1], [0], [0], [1], [0, 0, 1, 1], [], []>} : vector<16x128xbf16>, vector<128x512xbf16>, vector<16x512xf32> -> vector<16x512xf32>
    %215 = arith.addf %209, %214 : vector<16x512xf32>
    %c19_205 = arith.constant 19 : index
    %c0_206 = arith.constant 0 : index
    %216 = vector.load %arg9[%c19_205, %c0_206] : memref<36x144xf32, #tpu.memory_space<vmem>>, vector<16x128xf32>
    %217 = arith.truncf %216 : vector<16x128xf32> to vector<16x128xbf16>
    %c3_207 = arith.constant 3 : index
    %c0_208 = arith.constant 0 : index
    %c0_209 = arith.constant 0 : index
    %218 = vector.load %arg3[%c3_207, %c0_208, %c0_209] : memref<9x128x512xbf16, #tpu.memory_space<vmem>>, vector<1x128x512xbf16>
    %219 = vector.shape_cast %218 : vector<1x128x512xbf16> to vector<128x512xbf16>
    %cst_210 = arith.constant dense<0.000000e+00> : vector<16x512xf32>
    %220 = tpu.matmul %217, %219, %cst_210 {dimension_numbers = #tpu.dot_dimension_numbers<[1], [0], [0], [1], [0, 0, 1, 1], [], []>} : vector<16x128xbf16>, vector<128x512xbf16>, vector<16x512xf32> -> vector<16x512xf32>
    %221 = arith.addf %215, %220 : vector<16x512xf32>
    %c19_211 = arith.constant 19 : index
    %c8_212 = arith.constant 8 : index
    %222 = vector.load %arg9[%c19_211, %c8_212] : memref<36x144xf32, #tpu.memory_space<vmem>>, vector<16x128xf32>
    %223 = arith.truncf %222 : vector<16x128xf32> to vector<16x128xbf16>
    %c4_213 = arith.constant 4 : index
    %c0_214 = arith.constant 0 : index
    %c0_215 = arith.constant 0 : index
    %224 = vector.load %arg3[%c4_213, %c0_214, %c0_215] : memref<9x128x512xbf16, #tpu.memory_space<vmem>>, vector<1x128x512xbf16>
    %225 = vector.shape_cast %224 : vector<1x128x512xbf16> to vector<128x512xbf16>
    %cst_216 = arith.constant dense<0.000000e+00> : vector<16x512xf32>
    %226 = tpu.matmul %223, %225, %cst_216 {dimension_numbers = #tpu.dot_dimension_numbers<[1], [0], [0], [1], [0, 0, 1, 1], [], []>} : vector<16x128xbf16>, vector<128x512xbf16>, vector<16x512xf32> -> vector<16x512xf32>
    %227 = arith.addf %221, %226 : vector<16x512xf32>
    %c19_217 = arith.constant 19 : index
    %c16_218 = arith.constant 16 : index
    %228 = vector.load %arg9[%c19_217, %c16_218] : memref<36x144xf32, #tpu.memory_space<vmem>>, vector<16x128xf32>
    %229 = arith.truncf %228 : vector<16x128xf32> to vector<16x128xbf16>
    %c5_219 = arith.constant 5 : index
    %c0_220 = arith.constant 0 : index
    %c0_221 = arith.constant 0 : index
    %230 = vector.load %arg3[%c5_219, %c0_220, %c0_221] : memref<9x128x512xbf16, #tpu.memory_space<vmem>>, vector<1x128x512xbf16>
    %231 = vector.shape_cast %230 : vector<1x128x512xbf16> to vector<128x512xbf16>
    %cst_222 = arith.constant dense<0.000000e+00> : vector<16x512xf32>
    %232 = tpu.matmul %229, %231, %cst_222 {dimension_numbers = #tpu.dot_dimension_numbers<[1], [0], [0], [1], [0, 0, 1, 1], [], []>} : vector<16x128xbf16>, vector<128x512xbf16>, vector<16x512xf32> -> vector<16x512xf32>
    %233 = arith.addf %227, %232 : vector<16x512xf32>
    %c20_223 = arith.constant 20 : index
    %c0_224 = arith.constant 0 : index
    %234 = vector.load %arg9[%c20_223, %c0_224] : memref<36x144xf32, #tpu.memory_space<vmem>>, vector<16x128xf32>
    %235 = arith.truncf %234 : vector<16x128xf32> to vector<16x128xbf16>
    %c6_225 = arith.constant 6 : index
    %c0_226 = arith.constant 0 : index
    %c0_227 = arith.constant 0 : index
    %236 = vector.load %arg3[%c6_225, %c0_226, %c0_227] : memref<9x128x512xbf16, #tpu.memory_space<vmem>>, vector<1x128x512xbf16>
    %237 = vector.shape_cast %236 : vector<1x128x512xbf16> to vector<128x512xbf16>
    %cst_228 = arith.constant dense<0.000000e+00> : vector<16x512xf32>
    %238 = tpu.matmul %235, %237, %cst_228 {dimension_numbers = #tpu.dot_dimension_numbers<[1], [0], [0], [1], [0, 0, 1, 1], [], []>} : vector<16x128xbf16>, vector<128x512xbf16>, vector<16x512xf32> -> vector<16x512xf32>
    %239 = arith.addf %233, %238 : vector<16x512xf32>
    %c20_229 = arith.constant 20 : index
    %c8_230 = arith.constant 8 : index
    %240 = vector.load %arg9[%c20_229, %c8_230] : memref<36x144xf32, #tpu.memory_space<vmem>>, vector<16x128xf32>
    %241 = arith.truncf %240 : vector<16x128xf32> to vector<16x128xbf16>
    %c7_231 = arith.constant 7 : index
    %c0_232 = arith.constant 0 : index
    %c0_233 = arith.constant 0 : index
    %242 = vector.load %arg3[%c7_231, %c0_232, %c0_233] : memref<9x128x512xbf16, #tpu.memory_space<vmem>>, vector<1x128x512xbf16>
    %243 = vector.shape_cast %242 : vector<1x128x512xbf16> to vector<128x512xbf16>
    %cst_234 = arith.constant dense<0.000000e+00> : vector<16x512xf32>
    %244 = tpu.matmul %241, %243, %cst_234 {dimension_numbers = #tpu.dot_dimension_numbers<[1], [0], [0], [1], [0, 0, 1, 1], [], []>} : vector<16x128xbf16>, vector<128x512xbf16>, vector<16x512xf32> -> vector<16x512xf32>
    %245 = arith.addf %239, %244 : vector<16x512xf32>
    %c20_235 = arith.constant 20 : index
    %c16_236 = arith.constant 16 : index
    %246 = vector.load %arg9[%c20_235, %c16_236] : memref<36x144xf32, #tpu.memory_space<vmem>>, vector<16x128xf32>
    %247 = arith.truncf %246 : vector<16x128xf32> to vector<16x128xbf16>
    %c8_237 = arith.constant 8 : index
    %c0_238 = arith.constant 0 : index
    %c0_239 = arith.constant 0 : index
    %248 = vector.load %arg3[%c8_237, %c0_238, %c0_239] : memref<9x128x512xbf16, #tpu.memory_space<vmem>>, vector<1x128x512xbf16>
    %249 = vector.shape_cast %248 : vector<1x128x512xbf16> to vector<128x512xbf16>
    %cst_240 = arith.constant dense<0.000000e+00> : vector<16x512xf32>
    %250 = tpu.matmul %247, %249, %cst_240 {dimension_numbers = #tpu.dot_dimension_numbers<[1], [0], [0], [1], [0, 0, 1, 1], [], []>} : vector<16x128xbf16>, vector<128x512xbf16>, vector<16x512xf32> -> vector<16x512xf32>
    %251 = arith.addf %245, %250 : vector<16x512xf32>
    %c0_241 = arith.constant 0 : index
    %c0_242 = arith.constant 0 : index
    %252 = vector.load %arg4[%c0_241, %c0_242] : memref<1x512xf32, #tpu.memory_space<vmem>>, vector<1x512xf32>
    %253 = vector.broadcast %252 : vector<1x512xf32> to vector<16x512xf32>
    %254 = arith.addf %251, %253 : vector<16x512xf32>
    %cst_243 = arith.constant 0.000000e+00 : f32
    %255 = vector.broadcast %cst_243 : f32 to vector<16x512xf32>
    %256 = arith.maximumf %254, %255 : vector<16x512xf32>
    %c0_244 = arith.constant 0 : index
    %c0_245 = arith.constant 0 : index
    %257 = vector.load %arg5[%c0_244, %c0_245] : memref<512x2xf32, #tpu.memory_space<vmem>>, vector<512x2xf32>
    %cst_246 = arith.constant dense<0.000000e+00> : vector<16x2xf32>
    %258 = tpu.matmul %256, %257, %cst_246 {dimension_numbers = #tpu.dot_dimension_numbers<[1], [0], [0], [1], [0, 0, 1, 1], [], []>} : vector<16x512xf32>, vector<512x2xf32>, vector<16x2xf32> -> vector<16x2xf32>
    %cst_247 = arith.constant dense<0.000000e+00> : vector<2xf32>
    %259 = vector.multi_reduction <add>, %258, %cst_247 [0] : vector<16x2xf32> to vector<2xf32>
    %260 = vector.shape_cast %259 : vector<2xf32> to vector<1x2xf32>
    %c0_248 = arith.constant 0 : index
    %c0_249 = arith.constant 0 : index
    %261 = vector.load %arg6[%c0_248, %c0_249] : memref<1x2xf32, #tpu.memory_space<vmem>>, vector<1x2xf32>
    %262 = arith.addf %260, %261 : vector<1x2xf32>
    %c1_250 = arith.constant 1 : index
    %c0_251 = arith.constant 0 : index
    %263 = vector.load %arg7[%c1_250, %c0_251] : memref<2x2xf32, #tpu.memory_space<vmem>>, vector<1x2xf32>
    tpu.vector_store %arg7[%c1_250, %c0_251], %262 {strides = array<i32>} : memref<2x2xf32, #tpu.memory_space<vmem>>, vector<1x2xf32>,
    return
  }
}

</mosaic_0001>

<bundles_post_ra>
// kernel: mri_wrapper_forward.1
= control target key start
LH: loop header
LB: loop body
LE: loop exit
PB: predicated region body
PF: predicated region fallthrough
CT: control target
= control target key end

     0   :  { %12 = vsyncpa [#allocation5], 0  ;;  %s11004_s0 = inlined_call_operand.vmem [shape: f32[32,64], index: 0, kind: input, shape index: {}]   ;;  %s11005_s1 = inlined_call_operand.hbm [shape: bf16[9,64,128], index: 1, kind: input, shape index: {}]   ;;  %s11006_s2 = inlined_call_operand.hbm [shape: f32[1,128], index: 2, kind: input, shape index: {}]   ;;  %s11007_s3 = inlined_call_operand.hbm [shape: bf16[9,128,512], index: 3, kind: input, shape index: {}]   ;;  %s11008_s4 = inlined_call_operand.hbm [shape: f32[1,512], index: 4, kind: input, shape index: {}]   ;;  %s11009_s5 = inlined_call_operand.vmem [shape: f32[512,2], index: 5, kind: input, shape index: {}]   ;;  %s11010_s6 = inlined_call_operand.hbm [shape: f32[1,2], index: 6, kind: input, shape index: {}]   ;;  %s11011_s7 = inlined_call_operand.hbm [shape: f32[2,2], index: 7, kind: output, shape index: {}]  }
   0x1   :  { %13 = vsyncpa [#allocation8], 0 }
   0x2   :  { %14 = vsyncpa [#allocation11], 0 }
   0x3   :  { %15 = vsyncpa [#allocation6], 0  ;;  %s10089_s24 = smov [#allocation7]   ;;  %s10090_s26 = smov [#allocation10]  }
   0x4   :  { %s36_s25 = sshll.u32 %s10089_s24, 4  ;;  %s58_s27 = sshll.u32 %s10090_s26, 4  ;;  %s37_s25 = int_to_ptr.vmem [resolvable:$true] %s36_s25  ;;  %s59_s27 = int_to_ptr.vmem [resolvable:$true] %s58_s27 }
   0x5   :  { %s9949_s30 = scalar_lea.hbm %s11006_s2, 16 }
   0x6   :  { %p9950_p0 = scmp.ne.s32.totalorder %s11006_s2, %s9949_s30  ;;  %p9953_p1 = scmp.lt.u32.totalorder %s9949_s30, %s11006_s2 }
   0x8   :  { %p9955_p2 = pnand %p9953_p1, %p9950_p0 }
   0xa   :  { %9958 = shalt.err (!%p9955_p2)
}
   0xb   :  { %s9959_s12 = scalar_lea.vmem %s37_s25, 16  ;;  %s9963_s13 = scalar_lea.vmem %s37_s25, 32 }
   0xc   :  { %p9960_p3 = scmp.ne.s32.totalorder %s37_s25, %s9959_s12  ;;  %p9964_p4 = scmp.lt.s32.totalorder %s37_s25, %s37_s25 }
   0xd   :  { %p9965_p5 = scmp.lt.s32.totalorder %s9963_s13, %s9959_s12 }
   0xf   :  { %p9966_p6 = por %p9965_p5, %p9964_p4 }
  0x11   :  { %p9967_p7 = pnand %p9966_p6, %p9960_p3 }
  0x13   :  { %9970 = shalt.err (!%p9967_p7)
}
  0x14   :  { %39 = dma.hbm_to_vmem [thread:$0]  %s11006_s2, 16, %s37_s25, [#allocation8]  }
  0x15   :  { %s9971_s18 = scalar_lea.hbm %s11008_s4, 64 }
  0x16   :  { %p9972_p8 = scmp.ne.s32.totalorder %s11008_s4, %s9971_s18  ;;  %p9975_p9 = scmp.lt.u32.totalorder %s9971_s18, %s11008_s4 }
  0x18   :  { %p9977_p10 = pnand %p9975_p9, %p9972_p8 }
  0x1a   :  { %9980 = shalt.err (!%p9977_p10)
}
  0x1b   :  { %s9981_s23 = scalar_lea.vmem %s59_s27, 64  ;;  %p9986_p12 = scmp.lt.s32.totalorder %s59_s27, %s59_s27 }
  0x1c   :  { %p9982_p11 = scmp.ne.s32.totalorder %s59_s27, %s9981_s23  ;;  %p9987_p13 = scmp.lt.s32.totalorder %s9981_s23, %s9981_s23 }
  0x1e   :  { %p9988_p0 = por %p9987_p13, %p9986_p12 }
  0x20   :  { %p9989_p1 = pnand %p9988_p0, %p9982_p11 }
  0x22   :  { %9992 = shalt.err (!%p9989_p1)
}
  0x23   :  { %61 = dma.hbm_to_vmem [thread:$0]  %s11008_s4, 64, %s59_s27, [#allocation11]  }
  0x24   :  { %s10091_s25 = smov [#allocation4]   ;;  %s9993_s30 = scalar_lea.hbm %s11005_s1, 4608 }
  0x25   :  { %s23_s26 = sshll.u32 %s10091_s25, 4  ;;  %p9994_p2 = scmp.ne.s32.totalorder %s11005_s1, %s9993_s30  ;;  %s24_s26 = int_to_ptr.vmem [resolvable:$true] %s23_s26 }
  0x26   :  { %p9997_p3 = scmp.lt.u32.totalorder %s9993_s30, %s11005_s1 }
  0x28   :  { %p9999_p4 = pnand %p9997_p3, %p9994_p2 }
  0x2a   :  { %10002 = shalt.err (!%p9999_p4)
}
  0x2b   :  { %s10003_s12 = scalar_lea.vmem %s24_s26, 4608  ;;  %p10008_p6 = scmp.lt.s32.totalorder %s24_s26, %s24_s26 }
  0x2c   :  { %p10004_p5 = scmp.ne.s32.totalorder %s24_s26, %s10003_s12  ;;  %p10009_p7 = scmp.lt.s32.totalorder %s10003_s12, %s10003_s12 }
  0x2e   :  { %p10010_p8 = por %p10009_p7, %p10008_p6 }
  0x30   :  { %p10011_p9 = pnand %p10010_p8, %p10004_p5 }
  0x32   :  { %10014 = shalt.err (!%p10011_p9)
}
  0x33   :  { %s10092_s4 = smov 64   ;;  %s10093_s27 = smov 4  }
  0x34   :  { %29 = dma.hbm_to_vmem [thread:$0]  %s11005_s1, 4608, %s24_s26, [#allocation5], %s10092_s4, %s10092_s4, %s10093_s27  }
  0x35   :  { %s10094_s15 = smov [#allocation9]   ;;  %s10015_s19 = scalar_lea.hbm %s11007_s3, 36864 }
  0x36   :  { %s45_s16 = sshll.u32 %s10094_s15, 4  ;;  %p10016_p10 = scmp.ne.s32.totalorder %s11007_s3, %s10015_s19  ;;  %s46_s16 = int_to_ptr.vmem [resolvable:$true] %s45_s16 }
  0x37   :  { %p10019_p11 = scmp.lt.u32.totalorder %s10015_s19, %s11007_s3 }
  0x39   :  { %p10021_p12 = pnand %p10019_p11, %p10016_p10 }
  0x3b   :  { %10024 = shalt.err (!%p10021_p12)
}
  0x3c   :  { %s10025_s2 = scalar_lea.vmem %s46_s16, 36864  ;;  %p10030_p0 = scmp.lt.s32.totalorder %s46_s16, %s46_s16 }
  0x3d   :  { %p10026_p13 = scmp.ne.s32.totalorder %s46_s16, %s10025_s2  ;;  %p10031_p1 = scmp.lt.s32.totalorder %s10025_s2, %s10025_s2 }
  0x3f   :  { %p10032_p2 = por %p10031_p1, %p10030_p0 }
  0x41   :  { %p10033_p3 = pnand %p10032_p2, %p10026_p13 }
  0x43   :  { %10036 = shalt.err (!%p10033_p3)
}
  0x44   :  { %s10095_s1 = smov 256   ;;  %s10096_s24 = smov 16  }
  0x45   :  { %51 = dma.hbm_to_vmem [thread:$0]  %s11007_s3, 36864, %s46_s16, [#allocation8], %s10095_s1, %s10095_s1, %s10096_s24  }
  0x46   :  { %s10097_s28 = smov [#allocation12]   ;;  %s10037_s9 = scalar_lea.hbm %s11010_s6, 16 }
  0x47   :  { %s70_s29 = sshll.u32 %s10097_s28, 4  ;;  %p10038_p4 = scmp.ne.s32.totalorder %s11010_s6, %s10037_s9  ;;  %s71_s29 = int_to_ptr.vmem [resolvable:$true] %s70_s29 }
  0x48   :  { %p10041_p5 = scmp.lt.u32.totalorder %s10037_s9, %s11010_s6 }
  0x4a   :  { %p10043_p6 = pnand %p10041_p5, %p10038_p4 }
  0x4c   :  { %10046 = shalt.err (!%p10043_p6)
}
  0x4d   :  { %s10047_s13 = scalar_lea.vmem %s71_s29, 16  ;;  %s10051_s3 = scalar_lea.vmem %s71_s29, 32 }
  0x4e   :  { %p10048_p7 = scmp.ne.s32.totalorder %s71_s29, %s10047_s13  ;;  %p10052_p8 = scmp.lt.s32.totalorder %s71_s29, %s71_s29 }
  0x4f   :  { %p10053_p9 = scmp.lt.s32.totalorder %s10051_s3, %s10047_s13 }
  0x51   :  { %p10054_p10 = por %p10053_p9, %p10052_p8 }
  0x53   :  { %p10055_p11 = pnand %p10054_p10, %p10048_p7 }
  0x55   :  { %10058 = shalt.err (!%p10055_p11)
}
  0x56   :  { %73 = dma.hbm_to_vmem [thread:$0]  %s11010_s6, 16, %s71_s29, [#allocation11]  }
  0x57   :  { %10081 = dma.done.wait [#allocation5], 4608  }
  0x58   :  { %10082 = vsyncadd [#allocation5], 4294962688 }
  0x59   :  { %10083 = dma.done.wait [#allocation8], 36880  }
  0x5a   :  { %10084 = vsyncadd [#allocation8], 4294930416 }
  0x5b   :  { %10085 = dma.done.wait [#allocation11], 80  }
  0x5c   :  { %10086 = vsyncadd [#allocation11], 4294967216  ;;  %vm90_vm0 = vcmask 588800   ;;  %v10098_v0 = vmov 0.0   ;;  %vm10099_vm1 = vmmov 0   ;;  %v109_v1 = vld [vmem:[%s11004_s0] sm:$0xff] }
  0x5d   :  { %8533 = vmatprep.subr.bf16.mxu1 %v10098_v0  ;;  %97 = vst [vmem:[#allocation3] sm:$0xff] %v10098_v0  ;;  %100 = vst [vmem:[#allocation3 + $0x10] sm:$0xff] %v10098_v0  ;;  %8541 = vmatprep.mubr.msk.bf16.mxu1 %vm10099_vm1, %v10098_v0  ;;  %v9010_v2 = vld [vmem:[#allocation4] sm:$0xff]   ;;  %v110_v3 = vld [vmem:[%s11004_s0 + $0x8] sm:$0xff]  ;;  %vm119_vm2 = vcmask 556064   ;;  %vm181_vm3 = vcmask 523264  }
  0x5e   :  { %102 = vst [vmem:[#allocation3 + $0x20] sm:$0xff] %v10098_v0  ;;  %104 = vst [vmem:[#allocation3 + $0x30] sm:$0xff] %v10098_v0  ;;  %8521 = vmatprep.subr.bf16.mxu0 %v10098_v0  ;;  %8529 = vmatprep.mubr.msk.bf16.mxu0 %vm10099_vm1, %v10098_v0  ;;  %v9011_v4 = vld [vmem:[#allocation4 + $0x8] sm:$0xff]   ;;  %v9012_v5 = vld [vmem:[#allocation4 + $0x10] sm:$0xff]   ;;  %s10100_s19 = smov 124   ;;  %s10101_s20 = smov 120  }
  0x5f   :  { %106 = vst [vmem:[#allocation3 + $0x40] sm:$0xf] %v10098_v0  ;;  %91 = vst.msk [vmem:[#allocation2] sm:$0xff] %vm90_vm0, %v10098_v0  ;;  %113 = vrot.lane.b32.xlu0 %v109_v1, %s10093_s27  ;;  %8534 = vmatpush3.bf16.msra.mxu1 %v9010_v2  ;;  %v9013_v6 = vld [vmem:[#allocation4 + $0x18] sm:$0xff]   ;;  %v9018_v7 = vld [vmem:[#allocation4 + $0x20] sm:$0xff]   ;;  %vm95_vm4 = vcmask 584704  }
  0x60   :  { %92 = vst.msk [vmem:[#allocation2 + $0x8] sm:$0xff] %vm90_vm0, %v10098_v0  ;;  %93 = vst.msk [vmem:[#allocation2 + $0x10] sm:$0xff] %vm90_vm0, %v10098_v0  ;;  %8535 = vmatprep.subr.bf16.mxu1 %v10098_v0  ;;  %8522 = vmatpush3.bf16.msra.mxu0 %v9018_v7  ;;  %v9019_v8 = vld [vmem:[#allocation4 + $0x28] sm:$0xff]   ;;  %v9020_v9 = vld [vmem:[#allocation4 + $0x30] sm:$0xff]   ;;  %vm98_vm5 = vcmask 130048   ;;  %vm878_vm6 = vcmask 1040384  }
  0x61   :  { %94 = vst.msk [vmem:[#allocation2 + $0x18] sm:$0xff] %vm90_vm0, %v10098_v0  ;;  %8523 = vmatprep.subr.bf16.mxu0 %v10098_v0  ;;  %v9022_v10 = vld [vmem:[#allocation4 + $0x38] sm:$0xff]   ;;  %v9014_v19 = vld [vmem:[#allocation4 + $0x60] sm:$0xff]   ;;  %v9015_v22 = vld [vmem:[#allocation4 + $0x68] sm:$0xff]   ;;  %vm891_vm7 = vcmask 1047617   ;;  %vm893_vm8 = vcmask 64513  }
  0x62   :  { %v9016_v24 = vld [vmem:[#allocation4 + $0x70] sm:$0xff]   ;;  %v9017_v25 = vld [vmem:[#allocation4 + $0x78] sm:$0xff]   ;;  %v9021_v27 = vld [vmem:[#allocation4 + $0xa0] sm:$0xff]   ;;  %vm895_vm9 = vcmask 1047616   ;;  %vm897_vm10 = vcmask 64512   ;;  %vm1738_vm11 = vcmask 982016  }
  0x63   :  { %115 = vrot.lane.b32.xlu0 %v110_v3, %s10093_s27  ;;  %8536 = vmatpush3.bf16.msra.mxu1 %v9011_v4  ;;  %v122_v26 = vld [vmem:[%s11004_s0 + $0x10] sm:$0xff]  ;;  %v123_v28 = vld [vmem:[%s11004_s0 + $0x18] sm:$0xff]  ;;  %v9023_v29 = vld [vmem:[#allocation4 + $0xa8] sm:$0xff]   ;;  %s10102_s0 = smov 8   ;;  %vm899_vm12 = vcmask 1040448   ;;  %vm901_vm13 = vcmask 57344  }
  0x64   :  { %8537 = vmatprep.subr.bf16.mxu1 %v10098_v0  ;;  %8524 = vmatpush3.bf16.msra.mxu0 %v9019_v8  ;;  %v9025_v30 = vld [vmem:[#allocation4 + $0xb0] sm:$0xff]   ;;  %v9027_v31 = vld [vmem:[#allocation4 + $0xb8] sm:$0xff]   ;;  %v9024_v33 = vld [vmem:[#allocation4 + $0x40] sm:$0xff]   ;;  %vm2565_vm14 = vsmask.f32 7424  ;;  %vm3492_vm15 = vcmask 1046528  }
  0x65   :  { %8525 = vmatprep.subr.bf16.mxu0 %v10098_v0  ;;  %v10270_v32 = vld [vmem:[#allocation3] sm:$0xff]  ;;  %v9026_v36 = vld [vmem:[#allocation4 + $0x48] sm:$0xff]   ;;  %v9029_v39 = vld [vmem:[#allocation4 + $0xe0] sm:$0xff]   ;;  %vm2270_vm0 = vcmask 916480  }
  0x66   :  { %96 = vst.msk [vmem:[#allocation2 + $0x20] sm:$0xf] %vm95_vm4, %v10270_v32  ;;  %v9028_v38 = vld [vmem:[#allocation4 + $0x50] sm:$0xff]   ;;  %v9030_v42 = vld [vmem:[#allocation4 + $0x58] sm:$0xff]   ;;  %v9031_v43 = vld [vmem:[#allocation4 + $0xe8] sm:$0xff]   ;;  %vm1653_vm4 = vcmask 64515  }
  0x67   :  { %8538 = vmatpush3.bf16.msra.mxu1 %v9012_v5  ;;  %v9032_v46 = vld [vmem:[#allocation4 + $0x80] sm:$0xff]   ;;  %v9033_v47 = vld [vmem:[#allocation4 + $0xf0] sm:$0xff]   ;;  %v9034_v49 = vld [vmem:[#allocation4 + $0x88] sm:$0xff]   ;;  %99 = vst.msk [vmem:[#allocation3 + $0x8] sm:$0xff] %vm98_vm5, %v10270_v32 }
  0x68   :  { %8539 = vmatprep.subr.bf16.mxu1 %v10098_v0  ;;  %8526 = vmatpush3.bf16.msra.mxu0 %v9020_v9  ;;  %v9035_v50 = vld [vmem:[#allocation4 + $0xf8] sm:$0xff]   ;;  %v9036_v51 = vld [vmem:[#allocation4 + $0x90] sm:$0xff]   ;;  %v9038_v56 = vld [vmem:[#allocation4 + $0xc0] sm:$0xff]   ;;  %101 = vst.msk [vmem:[#allocation3 + $0x18] sm:$0xff] %vm98_vm5, %v10270_v32 }
  0x69   :  { %8527 = vmatprep.subr.bf16.mxu0 %v10098_v0  ;;  %v9037_v55 = vld [vmem:[#allocation4 + $0x98] sm:$0xff]   ;;  %v9039_v57 = vld [vmem:[#allocation4 + $0xc8] sm:$0xff]   ;;  %v9040_v58 = vld [vmem:[#allocation4 + $0xd0] sm:$0xff]   ;;  %103 = vst.msk [vmem:[#allocation3 + $0x28] sm:$0xff] %vm98_vm5, %v10270_v32 }
  0x6a   :  { %v9041_v59 = vld [vmem:[#allocation4 + $0xd8] sm:$0xff]   ;;  %v9042_v60 = vld [vmem:[#allocation4 + $0x100] sm:$0xff]   ;;  %v9043_v61 = vld [vmem:[#allocation4 + $0x108] sm:$0xff]   ;;  %105 = vst.msk [vmem:[#allocation3 + $0x38] sm:$0xff] %vm98_vm5, %v10270_v32  ;;  %vm1657_vm5 = vcmask 1042496  }
  0x6b   :  { %8540 = vmatpush3.bf16.msra.mxu1 %v9013_v6  ;;  %v9044_v62 = vld [vmem:[#allocation4 + $0x110] sm:$0xff]   ;;  %v9045_v63 = vld [vmem:[#allocation4 + $0x118] sm:$0xff]   ;;  %v9046_v8 = vld [vmem:[#allocation4 + $0x20] sm:$0xff]  }
  0x6c   :  { %8557 = vmatprep.subr.bf16.mxu1 %v10098_v0  ;;  %8528 = vmatpush3.bf16.msra.mxu0 %v9022_v10  ;;  %v9047_v9 = vld [vmem:[#allocation4] sm:$0xff]   ;;  %v9048_v10 = vld [vmem:[#allocation4 + $0x28] sm:$0xff]  }
  0x6d   :  { %8545 = vmatprep.subr.bf16.mxu0 %v10098_v0 }
  0xd1   :  { %v114_v11 = vpop.permute.xlu0 %113 }
  0xd2   :  { %120 = vst.msk [vmem:[#allocation2 + $0x1] sm:$0xff] %vm119_vm2, %v114_v11  ;;  %v9049_v11 = vld [vmem:[#allocation4 + $0x8] sm:$0xff]  }
  0xd5   :  { %v116_v12 = vpop.permute.xlu0 %115 }
  0xd6   :  { %121 = vst.msk [vmem:[#allocation2 + $0x9] sm:$0xff] %vm119_vm2, %v116_v12  ;;  %v9050_v12 = vld [vmem:[#allocation4 + $0x30] sm:$0xff]  }
  0xd9   :  { %v375_v13 = vld [vmem:[#allocation2 + $0x1] sm:$0xff] }
  0xda   :  { %v134_v15 = vld [vmem:[#allocation2] sm:$0xff] }
  0xdd   :  { %v376_v14 = vld [vmem:[#allocation2 + $0x9] sm:$0xff] }
  0xde   :  { %v135_v16 = vld [vmem:[#allocation2 + $0x8] sm:$0xff]  ;;  %v377_v17 = vpack.c.bf16 %v376_v14, %v375_v13  ;;  %v9052_v14 = vld [vmem:[#allocation4 + $0x38] sm:$0xff]  }
  0xdf   :  { %v136_v18 = vpack.c.bf16 %v135_v16, %v134_v15  ;;  %v620_v20 = vld [vmem:[#allocation2 + $0x2] sm:$0xff]  ;;  %v621_v21 = vld [vmem:[#allocation2 + $0xa] sm:$0xff]  ;;  %v9055_v16 = vld [vmem:[#allocation4 + $0x60] sm:$0xff]  }
  0xe0   :  { %467 = vrot.lane.b32.xlu0 %v377_v17, %s10100_s19  ;;  %v10243_v23 = vpack.c.bf16 %v621_v21, %v620_v20  ;;  %v9051_v13 = vld [vmem:[#allocation4 + $0x10] sm:$0xff]   ;;  %v9053_v15 = vld [vmem:[#allocation4 + $0x18] sm:$0xff]   ;;  %v9056_v20 = vld [vmem:[#allocation4 + $0x48] sm:$0xff]  }
  0xe1   :  { %155 = vrot.lane.b32.xlu1 %v136_v18, %s10100_s19  ;;  %8542 = vmatmul.mubr.msk.bf16.vlgmr.msra.gmra.mrb[0].mxu1 %vm181_vm3, %v136_v18  ;;  %v9059_v21 = vld [vmem:[#allocation4 + $0x70] sm:$0xff]  }
  0xe2   :  { %8558 = vmatpush3.bf16.msra.mxu1 %v9014_v19  ;;  %8565 = vmatprep.mubr.msk.bf16.mxu1 %vm10099_vm1, %v10098_v0 }
  0xe3   :  { %8559 = vmatprep.subr.bf16.mxu1 %v10098_v0 }
  0xe4   :  { %712 = vrot.lane.b32.xlu0 %v10243_v23, %s10100_s19 }
  0xe5   :  { %303 = vrot.lane.b32.xlu1 %v136_v18, %s10101_s20  ;;  %v9057_v18 = vld [vmem:[#allocation4 + $0x68] sm:$0xff]  }
  0xe6   :  { %8560 = vmatpush3.bf16.msra.mxu1 %v9015_v22  ;;  %v9058_v22 = vld [vmem:[#allocation4 + $0x50] sm:$0xff]  }
  0xe7   :  { %8561 = vmatprep.subr.bf16.mxu1 %v10098_v0 }
  0xe8   :  { %126 = vrot.lane.b32.xlu0 %v122_v26, %s10093_s27 }
  0xe9   :  { %548 = vrot.lane.b32.xlu1 %v377_v17, %s10101_s20 }
  0xea   :  { %8562 = vmatpush3.bf16.msra.mxu1 %v9016_v24  ;;  %v9060_v24 = vld [vmem:[#allocation4 + $0x58] sm:$0xff]  }
  0xeb   :  { %8563 = vmatprep.subr.bf16.mxu1 %v10098_v0 }
  0xed   :  { %793 = vrot.lane.b32.xlu1 %v10243_v23, %s10101_s20 }
  0xee   :  { %8564 = vmatpush3.bf16.msra.mxu1 %v9017_v25 }
  0xef   :  { %8581 = vmatprep.subr.bf16.mxu1 %v10098_v0 }
  0xf1   :  { %128 = vrot.lane.b32.xlu1 %v123_v28, %s10093_s27  ;;  %8566 = vmatmul.mubr.msk.bf16.vlgmr.msra.gmra.mrb[4].mxu1 %vm181_vm3, %v377_v17  ;;  %v9054_v17 = vld [vmem:[#allocation4 + $0x40] sm:$0xff]   ;;  %s10103_s27 = smov 112  }
  0xf2   :  { %8582 = vmatpush3.bf16.msra.mxu1 %v9021_v27  ;;  %8589 = vmatprep.mubr.msk.bf16.mxu1 %vm10099_vm1, %v10098_v0 }
  0xf3   :  { %8583 = vmatprep.subr.bf16.mxu1 %v10098_v0 }
  0xf6   :  { %8584 = vmatpush3.bf16.msra.mxu1 %v9023_v29  ;;  %v9062_v29 = vld [vmem:[#allocation4 + $0x80] sm:$0xff]  }
  0xf7   :  { %8585 = vmatprep.subr.bf16.mxu1 %v10098_v0 }
  0xfa   :  { %8586 = vmatpush3.bf16.msra.mxu1 %v9025_v30  ;;  %v9063_v30 = vld [vmem:[#allocation4 + $0xa0] sm:$0xff]  }
  0xfb   :  { %8587 = vmatprep.subr.bf16.mxu1 %v10270_v32 }
  0xfe   :  { %8588 = vmatpush3.bf16.msra.mxu1 %v9027_v31  ;;  %v9064_v31 = vld [vmem:[#allocation4 + $0x88] sm:$0xff]  }
  0xff   :  { %8605 = vmatprep.subr.bf16.mxu1 %v10270_v32 }
 0x152   :  { %v468_v34 = vpop.permute.xlu0 %467 }
 0x153   :  { %v156_v35 = vpop.permute.xlu1 %155 }
 0x154   :  { %8530 = vmatmul.mubr.msk.bf16.vlgmr.msra.gmra.mrb[0].mxu0 %vm181_vm3, %v156_v35  ;;  %v9067_v35 = vld [vmem:[#allocation4 + $0xb0] sm:$0xff]  }
 0x155   :  { %8546 = vmatpush3.bf16.msra.mxu0 %v9024_v33  ;;  %8553 = vmatprep.mubr.msk.bf16.mxu0 %vm10099_vm1, %v10270_v32  ;;  %v9065_v33 = vld [vmem:[#allocation4 + $0xa8] sm:$0xff]  }
 0x156   :  { %8547 = vmatprep.subr.bf16.mxu0 %v10270_v32  ;;  %v713_v40 = vpop.permute.xlu0 %712 }
 0x157   :  { %v304_v37 = vpop.permute.xlu1 %303 }
 0x159   :  { %8548 = vmatpush3.bf16.msra.mxu0 %v9026_v36 }
 0x15a   :  { %8549 = vmatprep.subr.bf16.mxu0 %v10270_v32  ;;  %v127_v44 = vpop.permute.xlu0 %126 }
 0x15b   :  { %v549_v41 = vpop.permute.xlu1 %548  ;;  %132 = vst.msk [vmem:[#allocation2 + $0x13] sm:$0xff] %vm119_vm2, %v127_v44 }
 0x15c   :  { %8590 = vmatmul.mubr.msk.bf16.vlgmr.msra.gmra.mrb[8].mxu1 %vm181_vm3, %v549_v41 }
 0x15d   :  { %8550 = vmatpush3.bf16.msra.mxu0 %v9028_v38  ;;  %8606 = vmatpush3.bf16.msra.mxu1 %v9029_v39 }
 0x15e   :  { %8551 = vmatprep.subr.bf16.mxu0 %v10270_v32  ;;  %8607 = vmatprep.subr.bf16.mxu1 %v10270_v32 }
 0x15f   :  { %v10284_v45 = vpop.permute.xlu1 %793  ;;  %8613 = vmatprep.mubr.msk.bf16.mxu1 %vm10099_vm1, %v10270_v32 }
 0x161   :  { %8552 = vmatpush3.bf16.msra.mxu0 %v9030_v42  ;;  %8608 = vmatpush3.bf16.msra.mxu1 %v9031_v43 }
 0x162   :  { %8569 = vmatprep.subr.bf16.mxu0 %v10270_v32  ;;  %8609 = vmatprep.subr.bf16.mxu1 %v10270_v32  ;;  %v903_v52 = vld [vmem:[#allocation2 + $0x12] sm:$0xff] }
 0x163   :  { %v129_v48 = vpop.permute.xlu1 %128  ;;  %v1141_v25 = vld [vmem:[#allocation2 + $0x13] sm:$0xff] }
 0x164   :  { %8554 = vmatmul.mubr.msk.bf16.vlgmr.msra.gmra.mrb[4].mxu0 %vm181_vm3, %v304_v37  ;;  %133 = vst.msk [vmem:[#allocation2 + $0x1b] sm:$0xff] %vm119_vm2, %v129_v48  ;;  %vm1638_vm2 = vcmask 1042432  }
 0x165   :  { %8570 = vmatpush3.bf16.msra.mxu0 %v9032_v46  ;;  %8610 = vmatpush3.bf16.msra.mxu1 %v9033_v47 }
 0x166   :  { %8571 = vmatprep.subr.bf16.mxu0 %v10270_v32  ;;  %8611 = vmatprep.subr.bf16.mxu1 %v10270_v32 }
 0x167   :  { %8577 = vmatprep.mubr.msk.bf16.mxu0 %vm10099_vm1, %v10270_v32 }
 0x169   :  { %8572 = vmatpush3.bf16.msra.mxu0 %v9034_v49  ;;  %8612 = vmatpush3.bf16.msra.mxu1 %v9035_v50 }
 0x16a   :  { %8573 = vmatprep.subr.bf16.mxu0 %v10270_v32  ;;  %8629 = vmatprep.subr.bf16.mxu1 %v10270_v32 }
 0x16b   :  { %v904_v53 = vld [vmem:[#allocation2 + $0x1a] sm:$0xff] }
 0x16c   :  { %8614 = vmatmul.mubr.msk.bf16.vlgmr.msra.gmra.mrb[12].mxu1 %vm181_vm3, %v713_v40  ;;  %v10299_v54 = vpack.c.bf16 %v904_v53, %v903_v52  ;;  %v1142_v26 = vld [vmem:[#allocation2 + $0x1b] sm:$0xff] }
 0x16d   :  { %8574 = vmatpush3.bf16.msra.mxu0 %v9036_v51  ;;  %8637 = vmatprep.mubr.msk.bf16.mxu1 %vm10099_vm1, %v10270_v32  ;;  %v10357_v27 = vpack.c.bf16 %v1142_v26, %v1141_v25  ;;  %v1383_v26 = vld [vmem:[#allocation2 + $0x14] sm:$0xff] }
 0x16e   :  { %8575 = vmatprep.subr.bf16.mxu0 %v10270_v32  ;;  %923 = vrot.lane.b32.xlu0 %v10299_v54, %s10100_s19 }
 0x16f   :  { %1069 = vrot.lane.b32.xlu1 %v10299_v54, %s10101_s20  ;;  %8630 = vmatpush3.bf16.msra.mxu1 %v9046_v8 }
 0x170   :  { %8631 = vmatprep.subr.bf16.mxu1 %v10270_v32 }
 0x171   :  { %8576 = vmatpush3.bf16.msra.mxu0 %v9037_v55 }
 0x172   :  { %8593 = vmatprep.subr.bf16.mxu0 %v10270_v32 }
 0x173   :  { %8632 = vmatpush3.bf16.msra.mxu1 %v9048_v10  ;;  %v9069_v10 = vld [vmem:[#allocation4 + $0xb8] sm:$0xff]  }
 0x174   :  { %8578 = vmatmul.mubr.msk.bf16.vlgmr.msra.gmra.mrb[8].mxu0 %vm181_vm3, %v468_v34  ;;  %8633 = vmatprep.subr.bf16.mxu1 %v10270_v32  ;;  %v9066_v34 = vld [vmem:[#allocation4 + $0x90] sm:$0xff]  }
 0x175   :  { %8594 = vmatpush3.bf16.msra.mxu0 %v9038_v56  ;;  %8601 = vmatprep.mubr.msk.bf16.mxu0 %vm10099_vm1, %v10270_v32 }
 0x176   :  { %8595 = vmatprep.subr.bf16.mxu0 %v10270_v32 }
 0x177   :  { %8634 = vmatpush3.bf16.msra.mxu1 %v9050_v12 }
 0x178   :  { %8635 = vmatprep.subr.bf16.mxu1 %v10270_v32 }
 0x179   :  { %8596 = vmatpush3.bf16.msra.mxu0 %v9039_v57 }
 0x17a   :  { %8597 = vmatprep.subr.bf16.mxu0 %v10270_v32 }
 0x17b   :  { %8636 = vmatpush3.bf16.msra.mxu1 %v9052_v14 }
 0x17c   :  { %8653 = vmatprep.subr.bf16.mxu1 %v10270_v32 }
 0x17d   :  { %8598 = vmatpush3.bf16.msra.mxu0 %v9040_v58 }
 0x17e   :  { %8599 = vmatprep.subr.bf16.mxu0 %v10270_v32 }
 0x181   :  { %8600 = vmatpush3.bf16.msra.mxu0 %v9041_v59 }
 0x182   :  { %8617 = vmatprep.subr.bf16.mxu0 %v10270_v32 }
 0x184   :  { %8602 = vmatmul.mubr.msk.bf16.vlgmr.msra.gmra.mrb[12].mxu0 %vm181_vm3, %v10243_v23  ;;  %v9061_v23 = vld [vmem:[#allocation4 + $0x78] sm:$0xff]  }
 0x185   :  { %8618 = vmatpush3.bf16.msra.mxu0 %v9042_v60  ;;  %8625 = vmatprep.mubr.msk.bf16.mxu0 %vm10099_vm1, %v10270_v32 }
 0x186   :  { %8619 = vmatprep.subr.bf16.mxu0 %v10270_v32 }
 0x189   :  { %8620 = vmatpush3.bf16.msra.mxu0 %v9043_v61 }
 0x18a   :  { %8621 = vmatprep.subr.bf16.mxu0 %v10270_v32 }
 0x18d   :  { %8622 = vmatpush3.bf16.msra.mxu0 %v9044_v62 }
 0x18e   :  { %8623 = vmatprep.subr.bf16.mxu0 %v10270_v32 }
 0x191   :  { %8624 = vmatpush3.bf16.msra.mxu0 %v9045_v63 }
 0x192   :  { %8641 = vmatprep.subr.bf16.mxu0 %v10270_v32 }
 0x194   :  { %8626 = vmatmul.mubr.msk.bf16.vlgmr.msra.gmra.mrb[16].mxu0 %vm181_vm3, %v10284_v45 }
 0x195   :  { %8649 = vmatprep.mubr.msk.bf16.mxu0 %vm10099_vm1, %v10270_v32  ;;  %8642 = vmatpush3.bf16.msra.mxu0 %v9047_v9  ;;  %v9068_v9 = vld [vmem:[#allocation4 + $0x98] sm:$0xff]  }
 0x196   :  { %8643 = vmatprep.subr.bf16.mxu0 %v10270_v32 }
 0x199   :  { %8644 = vmatpush3.bf16.msra.mxu0 %v9049_v11  ;;  %v10382_v11 = vld [vmem:[#allocation3] sm:$0xff] }
 0x19a   :  { %8645 = vmatprep.subr.bf16.mxu0 %v10270_v32 }
 0x19d   :  { %8646 = vmatpush3.bf16.msra.mxu0 %v9051_v13  ;;  %v7656_v13 = vld [vmem:[#allocation7] ss:$0 sm:$0xff] }
 0x19e   :  { %8647 = vmatprep.subr.bf16.mxu0 %v10270_v32 }
 0x1a1   :  { %8648 = vmatpush3.bf16.msra.mxu0 %v9053_v15 }
 0x1a2   :  { %8665 = vmatprep.subr.bf16.mxu0 %v10270_v32 }
 0x1a4   :  { %8650 = vmatmul.mubr.msk.bf16.vlgmr.msra.gmra.mrb[20].mxu0 %vm181_vm3, %v10299_v54 }
 0x1a5   :  { %8666 = vmatpush3.bf16.msra.mxu0 %v9055_v16  ;;  %8673 = vmatprep.mubr.msk.bf16.mxu0 %vm10099_vm1, %v10270_v32 }
 0x1a6   :  { %8667 = vmatprep.subr.bf16.mxu0 %v10270_v32 }
 0x1a9   :  { %8668 = vmatpush3.bf16.msra.mxu0 %v9057_v18 }
 0x1aa   :  { %8669 = vmatprep.subr.bf16.mxu0 %v10270_v32 }
 0x1ad   :  { %8670 = vmatpush3.bf16.msra.mxu0 %v9059_v21 }
 0x1ae   :  { %8671 = vmatprep.subr.bf16.mxu0 %v10270_v32 }
 0x1b1   :  { %8672 = vmatpush3.bf16.msra.mxu0 %v9061_v23 }
 0x1b2   :  { %8689 = vmatprep.subr.bf16.mxu0 %v10270_v32 }
 0x1b4   :  { %v10328_v0 = vpop.f32.mrb[0].mxu1  ;;  %8674 = vmatmul.mubr.msk.bf16.vlgmr.msra.gmra.mrb[24].mxu0 %vm181_vm3, %v10357_v27 }
 0x1b5   :  { %v8543_v1 = vpop.f32.mrb[1].mxu1  ;;  %8697 = vmatprep.mubr.msk.bf16.mxu0 %vm10099_vm1, %v10270_v32  ;;  %8690 = vmatpush3.bf16.msra.mxu0 %v9063_v30 }
 0x1b6   :  { %v10330_v2 = vpop.f32.mrb[2].mxu1  ;;  %8691 = vmatprep.subr.bf16.mxu0 %v10270_v32 }
 0x1b7   :  { %v8544_v3 = vpop.f32.mrb[3].mxu1 }
 0x1b9   :  { %8692 = vmatpush3.bf16.msra.mxu0 %v9065_v33 }
 0x1ba   :  { %8693 = vmatprep.subr.bf16.mxu0 %v10270_v32 }
 0x1bd   :  { %8694 = vmatpush3.bf16.msra.mxu0 %v9067_v35 }
 0x1be   :  { %8695 = vmatprep.subr.bf16.mxu0 %v10270_v32 }
 0x1c1   :  { %8696 = vmatpush3.bf16.msra.mxu0 %v9069_v10 }
 0x1c2   :  { %8713 = vmatprep.subr.bf16.mxu0 %v10382_v11 }
 0x1c4   :  { %v10332_v4 = vpop.f32.mrb[4].mxu1 }
 0x1c5   :  { %v8567_v5 = vpop.f32.mrb[5].mxu1 }
 0x1c6   :  { %v10334_v6 = vpop.f32.mrb[6].mxu1 }
 0x1c7   :  { %v8568_v7 = vpop.f32.mrb[7].mxu1 }
 0x1e0   :  { %v924_v19 = vpop.permute.xlu0 %923 }
 0x1e1   :  { %8638 = vmatmul.mubr.msk.bf16.vlgmr.msra.gmra.mrb[16].mxu1 %vm181_vm3, %v924_v19  ;;  %v1070_v28 = vpop.permute.xlu1 %1069 }
 0x1e2   :  { %8654 = vmatpush3.bf16.msra.mxu1 %v9054_v17  ;;  %8661 = vmatprep.mubr.msk.bf16.mxu1 %vm10099_vm1, %v10270_v32 }
 0x1e3   :  { %8655 = vmatprep.subr.bf16.mxu1 %v10270_v32 }
 0x1e6   :  { %8656 = vmatpush3.bf16.msra.mxu1 %v9056_v20 }
 0x1e7   :  { %8657 = vmatprep.subr.bf16.mxu1 %v10270_v32 }
 0x1ea   :  { %8658 = vmatpush3.bf16.msra.mxu1 %v9058_v22 }
 0x1eb   :  { %8659 = vmatprep.subr.bf16.mxu1 %v10270_v32 }
 0x1ee   :  { %8660 = vmatpush3.bf16.msra.mxu1 %v9060_v24 }
 0x1ef   :  { %8677 = vmatprep.subr.bf16.mxu1 %v10270_v32 }
 0x1f1   :  { %8662 = vmatmul.mubr.msk.bf16.vlgmr.msra.gmra.mrb[20].mxu1 %vm181_vm3, %v1070_v28  ;;  %v1384_v28 = vld [vmem:[#allocation2 + $0x1c] sm:$0xff] }
 0x1f2   :  { %8685 = vmatprep.mubr.msk.bf16.mxu1 %vm10099_vm1, %v10270_v32  ;;  %8678 = vmatpush3.bf16.msra.mxu1 %v9062_v29  ;;  %v10393_v29 = vpack.c.bf16 %v1384_v28, %v1383_v26  ;;  %v9091_v26 = vld [vmem:[#allocation9 + $0x128] ss:$16 sps:$4 sm:$0xff]   ;;  %v9114_v28 = vld [vmem:[#allocation9 + $0x1a4] ss:$16 sps:$4 sm:$0xff]  }
 0x1f3   :  { %8679 = vmatprep.subr.bf16.mxu1 %v10270_v32 }
 0x1f6   :  { %8680 = vmatpush3.bf16.msra.mxu1 %v9064_v31 }
 0x1f7   :  { %8681 = vmatprep.subr.bf16.mxu1 %v10270_v32 }
 0x1fa   :  { %8682 = vmatpush3.bf16.msra.mxu1 %v9066_v34 }
 0x1fb   :  { %8683 = vmatprep.subr.bf16.mxu1 %v10270_v32 }
 0x1fe   :  { %8684 = vmatpush3.bf16.msra.mxu1 %v9068_v9  ;;  %v9090_v9 = vld [vmem:[#allocation9 + $0x124] ss:$16 sps:$4 sm:$0xff]  }
 0x1ff   :  { %8701 = vmatprep.subr.bf16.mxu1 %v10382_v11 }
 0x227   :  { %v219_v36 = vpop.f32.mrb[0].mxu0 }
 0x228   :  { %v288_v37 = vadd.f32 %v10328_v0, %v219_v36  ;;  %v8531_v38 = vpop.f32.mrb[1].mxu0 }
 0x229   :  { %v222_v39 = vpop.f32.mrb[2].mxu0 }
 0x22a   :  { %v291_v40 = vadd.f32 %v10330_v2, %v222_v39  ;;  %v8532_v41 = vpop.f32.mrb[3].mxu0 }
 0x22f   :  { %v611_v42 = vpop.f32.mrb[8].mxu1 }
 0x230   :  { %v8591_v43 = vpop.f32.mrb[9].mxu1 }
 0x231   :  { %v614_v44 = vpop.f32.mrb[10].mxu1 }
 0x232   :  { %v8592_v45 = vpop.f32.mrb[11].mxu1 }
 0x237   :  { %v366_v46 = vpop.f32.mrb[4].mxu0 }
 0x238   :  { %v373_v47 = vadd.f32 %v366_v46, %v288_v37  ;;  %v8555_v48 = vpop.f32.mrb[5].mxu0 }
 0x239   :  { %v369_v49 = vpop.f32.mrb[6].mxu0 }
 0x23a   :  { %v374_v50 = vadd.f32 %v369_v49, %v291_v40  ;;  %v8556_v51 = vpop.f32.mrb[7].mxu0  ;;  %v455_v32 = vadd.f32 %v10332_v4, %v373_v47 }
 0x23c   :  { %v456_v52 = vadd.f32 %v10334_v6, %v374_v50 }
 0x23f   :  { %v775_v53 = vpop.f32.mrb[12].mxu1 }
 0x240   :  { %v8615_v54 = vpop.f32.mrb[13].mxu1 }
 0x241   :  { %v778_v55 = vpop.f32.mrb[14].mxu1 }
 0x242   :  { %v8616_v56 = vpop.f32.mrb[15].mxu1 }
 0x243   :  { %v9072_v56 = vld [vmem:[#allocation4 + $0xc8] sm:$0xff]  }
 0x247   :  { %v530_v57 = vpop.f32.mrb[8].mxu0 }
 0x248   :  { %v537_v58 = vadd.f32 %v530_v57, %v455_v32  ;;  %v8579_v59 = vpop.f32.mrb[9].mxu0 }
 0x249   :  { %v533_v60 = vpop.f32.mrb[10].mxu0  ;;  %v9074_v59 = vld [vmem:[#allocation4 + $0xd0] sm:$0xff]  }
 0x24a   :  { %v538_v61 = vadd.f32 %v533_v60, %v456_v52  ;;  %v8580_v62 = vpop.f32.mrb[11].mxu0  ;;  %v618_v63 = vadd.f32 %v611_v42, %v537_v58  ;;  %v9070_v52 = vld [vmem:[#allocation4 + $0xc0] sm:$0xff]   ;;  %v9073_v58 = vld [vmem:[#allocation4 + $0xe8] sm:$0xff]  }
 0x24c   :  { %v619_v0 = vadd.f32 %v614_v44, %v538_v61 }
 0x257   :  { %v693_v1 = vpop.f32.mrb[12].mxu0 }
 0x258   :  { %v700_v2 = vadd.f32 %v693_v1, %v618_v63  ;;  %v8603_v3 = vpop.f32.mrb[13].mxu0 }
 0x259   :  { %v696_v5 = vpop.f32.mrb[14].mxu0  ;;  %v9076_v3 = vld [vmem:[#allocation4 + $0xd8] sm:$0xff]  }
 0x25a   :  { %v701_v7 = vadd.f32 %v696_v5, %v619_v0  ;;  %v8604_v4 = vpop.f32.mrb[15].mxu0  ;;  %v782_v8 = vadd.f32 %v775_v53, %v700_v2  ;;  %v9075_v2 = vld [vmem:[#allocation4 + $0xf0] sm:$0xff]   ;;  %v9077_v5 = vld [vmem:[#allocation4 + $0xf8] sm:$0xff]  }
 0x25b   :  { %v9084_v4 = vld [vmem:[#allocation9 + $0x104] ss:$16 sps:$4 sm:$0xff]  }
 0x25c   :  { %v783_v6 = vadd.f32 %v778_v55, %v701_v7  ;;  %v9071_v55 = vld [vmem:[#allocation4 + $0xe0] sm:$0xff]  }
 0x25d   :  { %v9078_v7 = vld [vmem:[#allocation4 + $0x100] sm:$0xff]  }
 0x267   :  { %v856_v12 = vpop.f32.mrb[16].mxu0 }
 0x268   :  { %v863_v14 = vadd.f32 %v856_v12, %v782_v8  ;;  %v8627_v15 = vpop.f32.mrb[17].mxu0  ;;  %v9082_v8 = vld [vmem:[#allocation9 + $0x100] ss:$16 sps:$4 sm:$0xff]  }
 0x269   :  { %v859_v16 = vpop.f32.mrb[18].mxu0  ;;  %v9088_v12 = vld [vmem:[#allocation9 + $0x120] ss:$16 sps:$4 sm:$0xff]   ;;  %v9096_v15 = vld [vmem:[#allocation9 + $0x144] ss:$16 sps:$4 sm:$0xff]  }
 0x26a   :  { %v872_v17 = vadd.f32 %v7656_v13, %v863_v14  ;;  %v864_v18 = vadd.f32 %v859_v16, %v783_v6  ;;  %v8628_v19 = vpop.f32.mrb[19].mxu0  ;;  %v9079_v6 = vld [vmem:[#allocation4 + $0x108] sm:$0xff]   ;;  %v9080_v14 = vld [vmem:[#allocation4 + $0x110] sm:$0xff]  }
 0x26b   :  { %v9094_v16 = vld [vmem:[#allocation9 + $0x140] ss:$16 sps:$4 sm:$0xff]   ;;  %v9087_v19 = vld [vmem:[#allocation9 + $0x10c] ss:$16 sps:$4 sm:$0xff]  }
 0x26c   :  { %v874_v20 = vmax.f32 %v872_v17, 0.0  ;;  %v873_v21 = vadd.f32 %v7656_v13, %v864_v18  ;;  %v10104_v13 = vmov 0   ;;  %v9081_v17 = vld [vmem:[#allocation4 + $0x118] sm:$0xff]  }
 0x26d   :  { %v9102_v18 = vld [vmem:[#allocation9 + $0x164] ss:$16 sps:$4 sm:$0xff]  }
 0x26e   :  { %v879_v22 = vrot.slane %v874_v20, 7  ;;  %v875_v23 = vmax.f32 %v873_v21, 0.0  ;;  %v9100_v20 = vld [vmem:[#allocation9 + $0x160] ss:$16 sps:$4 sm:$0xff]   ;;  %v9085_v21 = vld [vmem:[#allocation9 + $0x108] ss:$16 sps:$4 sm:$0xff]  }
 0x270   :  { %v10386_v24 = vrot.slane %v875_v23, 7  ;;  %882 = vrot.lane.b32.xlu0 %v879_v22, %s10102_s0  ;;  %v9093_v23 = vld [vmem:[#allocation9 + $0x12c] ss:$16 sps:$4 sm:$0xff]  }
 0x272   :  { %v881_v25 = vsel %vm878_vm6, %v879_v22, %v10386_v24  ;;  %v9108_v22 = vld [vmem:[#allocation9 + $0x184] ss:$16 sps:$4 sm:$0xff]   ;;  %vm1659_vm6 = vcmask 59392  }
 0x273   :  { %884 = vrot.lane.b32.xlu1 %v881_v25, %s10102_s0  ;;  %v9106_v25 = vld [vmem:[#allocation9 + $0x180] ss:$16 sps:$4 sm:$0xff]  }
 0x274   :  { %1231 = vrot.lane.b32.xlu0 %v10357_v27, %s10100_s19 }
 0x277   :  { %1311 = vrot.lane.b32.xlu1 %v10357_v27, %s10101_s20  ;;  %v1054_v30 = vpop.f32.mrb[20].mxu0 }
 0x278   :  { %1473 = vrot.lane.b32.xlu0 %v10393_v29, %s10100_s19  ;;  %v8651_v31 = vpop.f32.mrb[21].mxu0 }
 0x279   :  { %v1057_v33 = vpop.f32.mrb[22].mxu0  ;;  %v9120_v31 = vld [vmem:[#allocation9 + $0x1c4] ss:$16 sps:$4 sm:$0xff]  }
 0x27a   :  { %v8652_v34 = vpop.f32.mrb[23].mxu0 }
 0x27b   :  { %1553 = vrot.lane.b32.xlu1 %v10393_v29, %s10101_s20  ;;  %v9118_v34 = vld [vmem:[#allocation9 + $0x1c0] ss:$16 sps:$4 sm:$0xff]  }
 0x287   :  { %v1213_v41 = vpop.f32.mrb[24].mxu0 }
 0x288   :  { %v8675_v42 = vpop.f32.mrb[25].mxu0 }
 0x289   :  { %v1216_v43 = vpop.f32.mrb[26].mxu0  ;;  %v9115_v42 = vld [vmem:[#allocation9 + $0x1a8] ss:$16 sps:$4 sm:$0xff]  }
 0x28a   :  { %v8676_v27 = vpop.f32.mrb[27].mxu0 }
 0x28b   :  { %v9121_v27 = vld [vmem:[#allocation9 + $0x1c8] ss:$16 sps:$4 sm:$0xff]  }
 0x2b4   :  { %v986_v35 = vpop.f32.mrb[16].mxu1 }
 0x2b5   :  { %v8639_v36 = vpop.f32.mrb[17].mxu1  ;;  %v1055_v37 = vadd.f32 %v1054_v30, %v986_v35  ;;  %v9097_v30 = vld [vmem:[#allocation9 + $0x148] ss:$16 sps:$4 sm:$0xff]  }
 0x2b6   :  { %v989_v38 = vpop.f32.mrb[18].mxu1  ;;  %v9103_v35 = vld [vmem:[#allocation9 + $0x168] ss:$16 sps:$4 sm:$0xff]   ;;  %v9126_v36 = vld [vmem:[#allocation9 + $0x1e4] ss:$16 sps:$4 sm:$0xff]  }
 0x2b7   :  { %v8640_v39 = vpop.f32.mrb[19].mxu1  ;;  %v1058_v40 = vadd.f32 %v1057_v33, %v989_v38  ;;  %v9105_v33 = vld [vmem:[#allocation9 + $0x16c] ss:$16 sps:$4 sm:$0xff]   ;;  %v9124_v38 = vld [vmem:[#allocation9 + $0x1e0] ss:$16 sps:$4 sm:$0xff]  }
 0x2b8   :  { %v9109_v39 = vld [vmem:[#allocation9 + $0x188] ss:$16 sps:$4 sm:$0xff]  }
 0x2c4   :  { %v1132_v44 = vpop.f32.mrb[20].mxu1 }
 0x2c5   :  { %v1139_v45 = vadd.f32 %v1132_v44, %v1055_v37  ;;  %v8663_v46 = vpop.f32.mrb[21].mxu1  ;;  %v9111_v37 = vld [vmem:[#allocation9 + $0x18c] ss:$16 sps:$4 sm:$0xff]  }
 0x2c6   :  { %v1135_v47 = vpop.f32.mrb[22].mxu1  ;;  %v9129_v44 = vld [vmem:[#allocation9 + $0x1ec] ss:$16 sps:$4 sm:$0xff]  }
 0x2c7   :  { %v10401_v48 = vadd.f32 %v1213_v41, %v1139_v45  ;;  %v1140_v49 = vadd.f32 %v1135_v47, %v1058_v40  ;;  %v8664_v50 = vpop.f32.mrb[23].mxu1  ;;  %v9132_v40 = vld [vmem:[#allocation9 + $0x4] ss:$16 sps:$4 sm:$0xff]   ;;  %v9117_v41 = vld [vmem:[#allocation9 + $0x1ac] ss:$16 sps:$4 sm:$0xff]  }
 0x2c8   :  { %v9127_v45 = vld [vmem:[#allocation9 + $0x1e8] ss:$16 sps:$4 sm:$0xff]   ;;  %v9135_v46 = vld [vmem:[#allocation9 + $0xc] ss:$16 sps:$4 sm:$0xff]  }
 0x2c9   :  { %v10403_v51 = vadd.f32 %v1216_v43, %v1140_v49  ;;  %v9123_v43 = vld [vmem:[#allocation9 + $0x1cc] ss:$16 sps:$4 sm:$0xff]   ;;  %v9130_v49 = vld [vmem:[#allocation9] ss:$16 sps:$4 sm:$0xff]   ;;  %v9133_v50 = vld [vmem:[#allocation9 + $0x8] ss:$16 sps:$4 sm:$0xff]  }
 0x2e2   :  { %v883_v32 = vpop.permute.xlu0 %882 }
 0x2e3   :  { %892 = vst.msk [vmem:[#allocation3] sm:$0xfe] %vm891_vm7, %v883_v32  ;;  %vm5532_vm7 = vsmask.f32 6400 }
 0x2e4   :  { %894 = vst.msk [vmem:[#allocation3 + $0x8] sm:$0xfe] %vm893_vm8, %v883_v32  ;;  %vm6469_vm8 = vcmask 1045504  }
 0x2e5   :  { %v885_v53 = vpop.permute.xlu1 %884 }
 0x2e6   :  { %896 = vst.msk [vmem:[#allocation3 + $0x10] sm:$0xff] %vm895_vm9, %v885_v53  ;;  %v1232_v54 = vpop.permute.xlu0 %1231 }
 0x2e7   :  { %898 = vst.msk [vmem:[#allocation3 + $0x18] sm:$0xff] %vm897_vm10, %v885_v53  ;;  %8686 = vmatmul.mubr.msk.bf16.vlgmr.msra.gmra.mrb[24].mxu1 %vm181_vm3, %v1232_v54  ;;  %v9141_v53 = vld [vmem:[#allocation9 + $0x2c] ss:$16 sps:$4 sm:$0xff]  }
 0x2e8   :  { %8702 = vmatpush3.bf16.msra.mxu1 %v9070_v52  ;;  %8709 = vmatprep.mubr.msk.bf16.mxu1 %vm10099_vm1, %v10382_v11  ;;  %v9138_v52 = vld [vmem:[#allocation9 + $0x24] ss:$16 sps:$4 sm:$0xff]  }
 0x2e9   :  { %v1312_v57 = vpop.permute.xlu1 %1311  ;;  %8703 = vmatprep.subr.bf16.mxu1 %v10382_v11 }
 0x2ea   :  { %8698 = vmatmul.mubr.msk.bf16.vlgmr.msra.gmra.mrb[28].mxu0 %vm181_vm3, %v1312_v57  ;;  %v1661_v62 = vld [vmem:[#allocation3] sm:$0xff]  ;;  %v1474_v10 = vpop.permute.xlu0 %1473 }
 0x2eb   :  { %8714 = vmatpush3.bf16.msra.mxu0 %v9071_v55  ;;  %8721 = vmatprep.mubr.msk.bf16.mxu0 %vm10099_vm1, %v10382_v11  ;;  %v1696_v60 = vld [vmem:[#allocation3 + $0x8] sm:$0xff]  ;;  %v9136_v55 = vld [vmem:[#allocation9 + $0x20] ss:$16 sps:$4 sm:$0xff]  }
 0x2ec   :  { %8704 = vmatpush3.bf16.msra.mxu1 %v9072_v56  ;;  %8715 = vmatprep.subr.bf16.mxu0 %v10382_v11  ;;  %v9139_v56 = vld [vmem:[#allocation9 + $0x28] ss:$16 sps:$4 sm:$0xff]  }
 0x2ed   :  { %8705 = vmatprep.subr.bf16.mxu1 %v10382_v11  ;;  %v10418_v63 = vld [vmem:[#allocation3 + $0x10] sm:$0xff]  ;;  %v2834_v57 = vld [vmem:[#allocation3 + $0x8] sm:$0xfe] }
 0x2ee   :  { %v10416_v61 = vld [vmem:[#allocation3 + $0x18] sm:$0xff]  ;;  %v10422_v1 = vpack.c.bf16 %v10418_v63, %v1661_v62  ;;  %v2833_v62 = vld [vmem:[#allocation3] sm:$0xfe] }
 0x2ef   :  { %v1698_v0 = vpack.c.bf16 %v10416_v61, %v1696_v60  ;;  %8716 = vmatpush3.bf16.msra.mxu0 %v9073_v58  ;;  %v9147_v60 = vld [vmem:[#allocation9 + $0x4c] ss:$16 sps:$4 sm:$0xff]  }
 0x2f0   :  { %8706 = vmatpush3.bf16.msra.mxu1 %v9074_v59  ;;  %1734 = vrot.lane.b32.xlu0 %v10422_v1, %s10101_s20  ;;  %v9144_v59 = vld [vmem:[#allocation9 + $0x44] ss:$16 sps:$4 sm:$0xff]  }
 0x2f1   :  { %1736 = vrot.lane.b32.xlu1 %v1698_v0, %s10101_s20  ;;  %8717 = vmatprep.subr.bf16.mxu0 %v10382_v11 }
 0x2f2   :  { %8707 = vmatprep.subr.bf16.mxu1 %v10382_v11 }
 0x2f3   :  { %8718 = vmatpush3.bf16.msra.mxu0 %v9075_v2  ;;  %v2839_v2 = vpack.c.bf16 %v10418_v63, %v2833_v62  ;;  %v9181_v62 = vld [vmem:[#allocation9 + $0x208] ss:$16 sps:$4 sm:$0xff]  }
 0x2f4   :  { %8708 = vmatpush3.bf16.msra.mxu1 %v9076_v3  ;;  %886 = vrot.lane.b32.xlu0 %v10386_v24, %s10102_s0  ;;  %v1554_v24 = vpop.permute.xlu1 %1553  ;;  %v9142_v3 = vld [vmem:[#allocation9 + $0x40] ss:$16 sps:$4 sm:$0xff]  }
 0x2f5   :  { %2266 = vrot.lane.b32.xlu1 %v10422_v1, %s10103_s27  ;;  %8719 = vmatprep.subr.bf16.mxu0 %v10382_v11 }
 0x2f6   :  { %8725 = vmatprep.subr.bf16.mxu1 %v10382_v11 }
 0x2f7   :  { %8710 = vmatmul.mubr.msk.bf16.vlgmr.msra.gmra.mrb[28].mxu1 %vm181_vm3, %v10393_v29  ;;  %8720 = vmatpush3.bf16.msra.mxu0 %v9077_v5  ;;  %v9112_v29 = vld [vmem:[#allocation9 + $0x1a0] ss:$16 sps:$4 sm:$0xff]   ;;  %v9145_v5 = vld [vmem:[#allocation9 + $0x48] ss:$16 sps:$4 sm:$0xff]  }
 0x2f8   :  { %8726 = vmatpush3.bf16.msra.mxu1 %v9078_v7  ;;  %8733 = vmatprep.mubr.msk.bf16.mxu1 %vm10099_vm1, %v10382_v11  ;;  %v9150_v7 = vld [vmem:[#allocation9 + $0x64] ss:$16 sps:$4 sm:$0xff]   ;;  %vm107_vm1 = vcmask 125952  }
 0x2f9   :  { %2268 = vrot.lane.b32.xlu0 %v1698_v0, %s10103_s27  ;;  %8727 = vmatprep.subr.bf16.mxu1 %v10382_v11  ;;  %v2840_v0 = vpack.c.bf16 %v10416_v61, %v2834_v57  ;;  %v9175_v57 = vld [vmem:[#allocation9 + $0xe8] ss:$16 sps:$4 sm:$0xff]  }
 0x2fa   :  { %8722 = vmatmul.mubr.msk.bf16.vlgmr.msra.gmra.mrb[32].mxu0 %vm181_vm3, %v1474_v10  ;;  %1901 = vmatprep.subr.bf16.mxu0 %v9084_v4  ;;  %v9153_v4 = vld [vmem:[#allocation9 + $0x6c] ss:$16 sps:$4 sm:$0xff]   ;;  %v9151_v10 = vld [vmem:[#allocation9 + $0x68] ss:$16 sps:$4 sm:$0xff]  }
 0x2fb   :  { %1902 = vmatpush1.bf16.msra.mxu0 %v9082_v8  ;;  %1933 = vmatprep.mubr.bf16.mxu0 %v10104_v13  ;;  %v2891_v8 = vshll.u32 %v2840_v0, 16 }
 0x2fc   :  { %8728 = vmatpush3.bf16.msra.mxu1 %v9079_v6  ;;  %1903 = vmatprep.subr.bf16.mxu0 %v9090_v9  ;;  %v2879_v6 = vshll.u32 %v2839_v2, 16  ;;  %v9148_v9 = vld [vmem:[#allocation9 + $0x60] ss:$16 sps:$4 sm:$0xff]  }
 0x2fd   :  { %8729 = vmatprep.subr.bf16.mxu1 %v10382_v11 }
 0x2ff   :  { %1904 = vmatpush1.bf16.msra.mxu0 %v9088_v12  ;;  %v9156_v12 = vld [vmem:[#allocation9 + $0x84] ss:$16 sps:$4 sm:$0xff]  }
 0x300   :  { %8730 = vmatpush3.bf16.msra.mxu1 %v9080_v14  ;;  %1905 = vmatprep.subr.bf16.mxu0 %v9096_v15  ;;  %v9159_v14 = vld [vmem:[#allocation9 + $0x8c] ss:$16 sps:$4 sm:$0xff]  }
 0x301   :  { %8731 = vmatprep.subr.bf16.mxu1 %v10382_v11  ;;  %v9099_v11 = vld [vmem:[#allocation9 + $0x14c] ss:$16 sps:$4 sm:$0xff]  }
 0x303   :  { %1906 = vmatpush1.bf16.msra.mxu0 %v9094_v16 }
 0x304   :  { %8732 = vmatpush3.bf16.msra.mxu1 %v9081_v17  ;;  %1907 = vmatprep.subr.bf16.mxu0 %v9102_v18  ;;  %v2893_v18 = vrot.slane %v2891_v8, 1  ;;  %v9190_v8 = vld [vmem:[#allocation9 + $0x240] ss:$16 sps:$4 sm:$0xff]  }
 0x305   :  { %1944 = vmatprep.subr.bf16.mxu1 %v9087_v19 }
 0x307   :  { %8734 = vmatmul.mubr.msk.bf16.vlgmr.msra.gmra.mrb[32].mxu1 %vm181_vm3, %v1554_v24  ;;  %1908 = vmatpush1.bf16.msra.mxu0 %v9100_v20  ;;  %v2881_v20 = vrot.slane %v2879_v6, 1  ;;  %v9157_v24 = vld [vmem:[#allocation9 + $0x88] ss:$16 sps:$4 sm:$0xff]   ;;  %vm1651_vm3 = vcmask 1047619  }
 0x308   :  { %1945 = vmatpush1.bf16.msra.mxu1 %v9085_v21  ;;  %1909 = vmatprep.subr.bf16.mxu0 %v9108_v22  ;;  %v9154_v21 = vld [vmem:[#allocation9 + $0x80] ss:$16 sps:$4 sm:$0xff]   ;;  %v2889_v22 = vshrl.u32 %v2840_v0, 16  ;;  %v9186_v0 = vld [vmem:[#allocation9 + $0x224] ss:$16 sps:$4 sm:$0xff]  }
 0x309   :  { %1946 = vmatprep.subr.bf16.mxu1 %v9093_v23  ;;  %1976 = vmatprep.mubr.bf16.mxu1 %v10104_v13  ;;  %v2877_v23 = vshrl.u32 %v2839_v2, 16  ;;  %v9189_v2 = vld [vmem:[#allocation9 + $0x22c] ss:$16 sps:$4 sm:$0xff]   ;;  %v9193_v6 = vld [vmem:[#allocation9 + $0x248] ss:$16 sps:$4 sm:$0xff]  }
 0x30b   :  { %1910 = vmatpush1.bf16.msra.mxu0 %v9106_v25 }
 0x30c   :  { %1947 = vmatpush1.bf16.msra.mxu1 %v9091_v26  ;;  %1911 = vmatprep.subr.bf16.mxu0 %v9114_v28 }
 0x30d   :  { %1948 = vmatprep.subr.bf16.mxu1 %v9099_v11 }
 0x30f   :  { %1912 = vmatpush1.bf16.msra.mxu0 %v9112_v29  ;;  %v2894_v29 = vor.u32 %v2893_v18, %v2889_v22  ;;  %v9210_v18 = vld [vmem:[#allocation9 + $0x2a4] ss:$16 sps:$4 sm:$0xff]  }
 0x310   :  { %1949 = vmatpush1.bf16.msra.mxu1 %v9097_v30  ;;  %1913 = vmatprep.subr.bf16.mxu0 %v9120_v31  ;;  %v2882_v31 = vor.u32 %v2881_v20, %v2877_v23  ;;  %v9208_v20 = vld [vmem:[#allocation9 + $0x2a0] ss:$16 sps:$4 sm:$0xff]   ;;  %v9216_v22 = vld [vmem:[#allocation9 + $0x2c4] ss:$16 sps:$4 sm:$0xff]   ;;  %v9219_v23 = vld [vmem:[#allocation9 + $0x2cc] ss:$16 sps:$4 sm:$0xff]  }
 0x311   :  { %1950 = vmatprep.subr.bf16.mxu1 %v9105_v33 }
 0x313   :  { %1914 = vmatpush1.bf16.msra.mxu0 %v9118_v34  ;;  %v9162_v34 = vld [vmem:[#allocation9 + $0xa4] ss:$16 sps:$4 sm:$0xff]  }
 0x314   :  { %1951 = vmatpush1.bf16.msra.mxu1 %v9103_v35  ;;  %1915 = vmatprep.subr.bf16.mxu0 %v9126_v36  ;;  %v9165_v35 = vld [vmem:[#allocation9 + $0xac] ss:$16 sps:$4 sm:$0xff]  }
 0x315   :  { %1952 = vmatprep.subr.bf16.mxu1 %v9111_v37 }
 0x317   :  { %1916 = vmatpush1.bf16.msra.mxu0 %v9124_v38 }
 0x318   :  { %1953 = vmatpush1.bf16.msra.mxu1 %v9109_v39  ;;  %2147 = vmatprep.subr.bf16.mxu0 %v9132_v40  ;;  %v9160_v39 = vld [vmem:[#allocation9 + $0xa0] ss:$16 sps:$4 sm:$0xff]   ;;  %v9163_v40 = vld [vmem:[#allocation9 + $0xa8] ss:$16 sps:$4 sm:$0xff]  }
 0x319   :  { %1954 = vmatprep.subr.bf16.mxu1 %v9117_v41 }
 0x31c   :  { %1955 = vmatpush1.bf16.msra.mxu1 %v9115_v42  ;;  %v3752_v42 = vld [vmem:[#allocation3 + $0x8] sm:$0xfc] }
 0x31d   :  { %1956 = vmatprep.subr.bf16.mxu1 %v9123_v43  ;;  %v3751_v43 = vld [vmem:[#allocation3] sm:$0xfc] }
 0x320   :  { %1957 = vmatpush1.bf16.msra.mxu1 %v9121_v27  ;;  %v9168_v27 = vld [vmem:[#allocation9 + $0xc4] ss:$16 sps:$4 sm:$0xff]  }
 0x321   :  { %1958 = vmatprep.subr.bf16.mxu1 %v9129_v44  ;;  %v9171_v44 = vld [vmem:[#allocation9 + $0xcc] ss:$16 sps:$4 sm:$0xff]  }
 0x324   :  { %1959 = vmatpush1.bf16.msra.mxu1 %v9127_v45  ;;  %v3756_v45 = vpack.c.bf16 %v10416_v61, %v3752_v42  ;;  %v9240_v42 = vld [vmem:[#allocation9 + $0x344] ss:$16 sps:$4 sm:$0xff]  }
 0x325   :  { %2190 = vmatprep.subr.bf16.mxu1 %v9135_v46  ;;  %v3755_v46 = vpack.c.bf16 %v10418_v63, %v3751_v43  ;;  %v9243_v43 = vld [vmem:[#allocation9 + $0x34c] ss:$16 sps:$4 sm:$0xff]  }
 0x362   :  { %v1735_v32 = vpop.permute.xlu0 %1734 }
 0x363   :  { %v1737_v47 = vpop.permute.xlu1 %1736 }
 0x364   :  { %v1739_v54 = vsel %vm1738_vm11, %v1735_v32, %v1737_v47  ;;  %v9166_v47 = vld [vmem:[#allocation9 + $0xc0] ss:$16 sps:$4 sm:$0xff]  }
 0x365   :  { %1934 = vmatmul.mubr.bf16.vlgmr.msra.gmra.mrb[36].mxu0 %v1739_v54  ;;  %1977 = vmatmul.mubr.bf16.vlgmr.msra.gmra.mrb[36].mxu1 %v1739_v54  ;;  %v9174_v54 = vld [vmem:[#allocation9 + $0xe4] ss:$16 sps:$4 sm:$0xff]  }
 0x366   :  { %2148 = vmatpush1.bf16.msra.mxu0 %v9130_v49  ;;  %2191 = vmatpush1.bf16.msra.mxu1 %v9133_v50  ;;  %v887_v58 = vpop.permute.xlu0 %886  ;;  %v9169_v49 = vld [vmem:[#allocation9 + $0xc8] ss:$16 sps:$4 sm:$0xff]  }
 0x367   :  { %2149 = vmatprep.subr.bf16.mxu0 %v9138_v52  ;;  %2192 = vmatprep.subr.bf16.mxu1 %v9141_v53  ;;  %900 = vst.msk [vmem:[#allocation3 + $0x20] sm:$0x1] %vm899_vm12, %v887_v58  ;;  %v3799_v52 = vrot.slane %v3756_v45, 1  ;;  %v3796_v53 = vrot.slane %v3755_v46, 1  ;;  %v9246_v45 = vld [vmem:[#allocation9 + $0x364] ss:$16 sps:$4 sm:$0xff]  }
 0x368   :  { %902 = vst.msk [vmem:[#allocation3 + $0x28] sm:$0x1] %vm901_vm13, %v887_v58  ;;  %2179 = vmatprep.mubr.bf16.mxu0 %v10104_v13  ;;  %2222 = vmatprep.mubr.bf16.mxu1 %v10104_v13  ;;  %v9180_v58 = vld [vmem:[#allocation9 + $0x204] ss:$16 sps:$4 sm:$0xff]   ;;  %v9249_v46 = vld [vmem:[#allocation9 + $0x36c] ss:$16 sps:$4 sm:$0xff]  }
 0x36a   :  { %2150 = vmatpush1.bf16.msra.mxu0 %v9136_v55  ;;  %2193 = vmatpush1.bf16.msra.mxu1 %v9139_v56  ;;  %v9177_v55 = vld [vmem:[#allocation9 + $0xec] ss:$16 sps:$4 sm:$0xff]   ;;  %v9172_v56 = vld [vmem:[#allocation9 + $0xe0] ss:$16 sps:$4 sm:$0xff]  }
 0x36b   :  { %2151 = vmatprep.subr.bf16.mxu0 %v9144_v59  ;;  %2194 = vmatprep.subr.bf16.mxu1 %v9147_v60  ;;  %v9183_v59 = vld [vmem:[#allocation9 + $0x20c] ss:$16 sps:$4 sm:$0xff]   ;;  %v9178_v60 = vld [vmem:[#allocation9 + $0x200] ss:$16 sps:$4 sm:$0xff]  }
 0x36e   :  { %2152 = vmatpush1.bf16.msra.mxu0 %v9142_v3  ;;  %2195 = vmatpush1.bf16.msra.mxu1 %v9145_v5  ;;  %v2837_v16 = vld [vmem:[#allocation3 + $0x20] sm:$0x1]  ;;  %v9184_v3 = vld [vmem:[#allocation9 + $0x220] ss:$16 sps:$4 sm:$0xff]   ;;  %v9187_v5 = vld [vmem:[#allocation9 + $0x228] ss:$16 sps:$4 sm:$0xff]  }
 0x36f   :  { %2153 = vmatprep.subr.bf16.mxu0 %v9150_v7  ;;  %2196 = vmatprep.subr.bf16.mxu1 %v9153_v4  ;;  %v2838_v15 = vld [vmem:[#allocation3 + $0x28] sm:$0x1]  ;;  %v2841_v19 = vpack.c.bf16 %v2837_v16, %v2837_v16  ;;  %v3753_v11 = vld [vmem:[#allocation3 + $0x20] sm:$0x3]  ;;  %v9202_v16 = vld [vmem:[#allocation9 + $0x280] ss:$16 sps:$4 sm:$0xff]  }
 0x370   :  { %v2842_v17 = vpack.c.bf16 %v2838_v15, %v2838_v15  ;;  %v3754_v28 = vld [vmem:[#allocation3 + $0x28] sm:$0x3]  ;;  %v3757_v41 = vpack.c.bf16 %v3753_v11, %v3753_v11  ;;  %v9195_v4 = vld [vmem:[#allocation9 + $0x24c] ss:$16 sps:$4 sm:$0xff]   ;;  %v9220_v11 = vld [vmem:[#allocation9 + $0x2e0] ss:$16 sps:$4 sm:$0xff]  }
 0x371   :  { %v2884_v26 = vshll.u32 %v2841_v19, 16  ;;  %v3758_v36 = vpack.c.bf16 %v3754_v28, %v3754_v28  ;;  %v9192_v7 = vld [vmem:[#allocation9 + $0x244] ss:$16 sps:$4 sm:$0xff]   ;;  %v9207_v15 = vld [vmem:[#allocation9 + $0x28c] ss:$16 sps:$4 sm:$0xff]  }
 0x372   :  { %2154 = vmatpush1.bf16.msra.mxu0 %v9148_v9  ;;  %2197 = vmatpush1.bf16.msra.mxu1 %v9151_v10  ;;  %v2896_v25 = vshll.u32 %v2842_v17, 16  ;;  %v3797_v32 = vrot.slane %v3757_v41, 1  ;;  %v9198_v9 = vld [vmem:[#allocation9 + $0x264] ss:$16 sps:$4 sm:$0xff]   ;;  %v9196_v10 = vld [vmem:[#allocation9 + $0x260] ss:$16 sps:$4 sm:$0xff]  }
 0x373   :  { %2155 = vmatprep.subr.bf16.mxu0 %v9156_v12  ;;  %2198 = vmatprep.subr.bf16.mxu1 %v9159_v14  ;;  %v2886_v33 = vrot.slane %v2884_v26, 1  ;;  %v3800_v50 = vrot.slane %v3758_v36, 1  ;;  %v9199_v12 = vld [vmem:[#allocation9 + $0x268] ss:$16 sps:$4 sm:$0xff]   ;;  %v9204_v14 = vld [vmem:[#allocation9 + $0x284] ss:$16 sps:$4 sm:$0xff]   ;;  %v2267_v36 = vpop.permute.xlu1 %2266 }
 0x374   :  { %v2898_v30 = vrot.slane %v2896_v25, 1  ;;  %v3798_v63 = vsel %vm3492_vm15, %v3796_v53, %v3797_v32  ;;  %v9205_v17 = vld [vmem:[#allocation9 + $0x288] ss:$16 sps:$4 sm:$0xff]   ;;  %v9213_v19 = vld [vmem:[#allocation9 + $0x2ac] ss:$16 sps:$4 sm:$0xff]  }
 0x375   :  { %v2887_v38 = vsel %vm2565_vm14, %v2882_v31, %v2886_v33  ;;  %v3801_v61 = vsel %vm3492_vm15, %v3799_v52, %v3800_v50  ;;  %v9217_v25 = vld [vmem:[#allocation9 + $0x2c8] ss:$16 sps:$4 sm:$0xff]   ;;  %v9222_v26 = vld [vmem:[#allocation9 + $0x2e4] ss:$16 sps:$4 sm:$0xff]   ;;  %v9225_v28 = vld [vmem:[#allocation9 + $0x2ec] ss:$16 sps:$4 sm:$0xff]   ;;  %v2269_v33 = vpop.permute.xlu0 %2268 }
 0x376   :  { %2156 = vmatpush1.bf16.msra.mxu0 %v9154_v21  ;;  %2199 = vmatpush1.bf16.msra.mxu1 %v9157_v24  ;;  %v2899_v37 = vsel %vm2565_vm14, %v2894_v29, %v2898_v30  ;;  %v9211_v21 = vld [vmem:[#allocation9 + $0x2a8] ss:$16 sps:$4 sm:$0xff]   ;;  %v9214_v24 = vld [vmem:[#allocation9 + $0x2c0] ss:$16 sps:$4 sm:$0xff]   ;;  %v9228_v30 = vld [vmem:[#allocation9 + $0x304] ss:$16 sps:$4 sm:$0xff]  }
 0x377   :  { %2902 = vrot.lane.b32.xlu0 %v2899_v37, %s10101_s20  ;;  %2900 = vrot.lane.b32.xlu1 %v2887_v38, %s10101_s20  ;;  %v9223_v29 = vld [vmem:[#allocation9 + $0x2e8] ss:$16 sps:$4 sm:$0xff]   ;;  %v9231_v31 = vld [vmem:[#allocation9 + $0x30c] ss:$16 sps:$4 sm:$0xff]   ;;  %v9252_v50 = vld [vmem:[#allocation9 + $0x384] ss:$16 sps:$4 sm:$0xff]  }
 0x378   :  { %2157 = vmatprep.subr.bf16.mxu0 %v9162_v34  ;;  %2200 = vmatprep.subr.bf16.mxu1 %v9165_v35  ;;  %v9226_v34 = vld [vmem:[#allocation9 + $0x300] ss:$16 sps:$4 sm:$0xff]   ;;  %v9229_v35 = vld [vmem:[#allocation9 + $0x308] ss:$16 sps:$4 sm:$0xff]   ;;  %v9255_v32 = vld [vmem:[#allocation9 + $0x38c] ss:$16 sps:$4 sm:$0xff]  }
 0x379   :  { %v9235_v41 = vld [vmem:[#allocation9 + $0x328] ss:$16 sps:$4 sm:$0xff]   ;;  %v9250_v52 = vld [vmem:[#allocation9 + $0x380] ss:$16 sps:$4 sm:$0xff]  }
 0x37a   :  { %2158 = vmatpush1.bf16.msra.mxu0 %v9160_v39  ;;  %2201 = vmatpush1.bf16.msra.mxu1 %v9163_v40  ;;  %v2271_v39 = vsel %vm2270_vm0, %v2267_v36, %v2269_v33  ;;  %v9232_v40 = vld [vmem:[#allocation9 + $0x320] ss:$16 sps:$4 sm:$0xff]   ;;  %v9253_v53 = vld [vmem:[#allocation9 + $0x388] ss:$16 sps:$4 sm:$0xff]   ;;  %v9291_v36 = vld [vmem:[#allocation9 + $0x44c] ss:$16 sps:$4 sm:$0xff]  }
 0x37b   :  { %3195 = vrot.lane.b32.xlu0 %v2899_v37, %s10103_s27  ;;  %3193 = vrot.lane.b32.xlu1 %v2887_v38, %s10103_s27  ;;  %v9234_v37 = vld [vmem:[#allocation9 + $0x324] ss:$16 sps:$4 sm:$0xff]   ;;  %v9237_v38 = vld [vmem:[#allocation9 + $0x32c] ss:$16 sps:$4 sm:$0xff]   ;;  %v9280_v33 = vld [vmem:[#allocation9 + $0x420] ss:$16 sps:$4 sm:$0xff]  }
 0x37c   :  { %2159 = vmatprep.subr.bf16.mxu0 %v9168_v27  ;;  %2202 = vmatprep.subr.bf16.mxu1 %v9171_v44  ;;  %v9238_v27 = vld [vmem:[#allocation9 + $0x340] ss:$16 sps:$4 sm:$0xff]   ;;  %v9241_v44 = vld [vmem:[#allocation9 + $0x348] ss:$16 sps:$4 sm:$0xff]  }
 0x37e   :  { %2160 = vmatpush1.bf16.msra.mxu0 %v9166_v47  ;;  %2203 = vmatpush1.bf16.msra.mxu1 %v9169_v49  ;;  %v9244_v47 = vld [vmem:[#allocation9 + $0x360] ss:$16 sps:$4 sm:$0xff]   ;;  %v9247_v49 = vld [vmem:[#allocation9 + $0x368] ss:$16 sps:$4 sm:$0xff]  }
 0x37f   :  { %3804 = vrot.lane.b32.xlu0 %v3801_v61, %s10101_s20  ;;  %3802 = vrot.lane.b32.xlu1 %v3798_v63, %s10101_s20 }
 0x380   :  { %2161 = vmatprep.subr.bf16.mxu0 %v9174_v54  ;;  %2204 = vmatprep.subr.bf16.mxu1 %v9177_v55  ;;  %v9258_v54 = vld [vmem:[#allocation9 + $0x3a4] ss:$16 sps:$4 sm:$0xff]   ;;  %v9261_v55 = vld [vmem:[#allocation9 + $0x3ac] ss:$16 sps:$4 sm:$0xff]  }
 0x382   :  { %2162 = vmatpush1.bf16.msra.mxu0 %v9172_v56  ;;  %2205 = vmatpush1.bf16.msra.mxu1 %v9175_v57  ;;  %v2529_v56 = vld [vmem:[#allocation3 + $0x20] sm:$0x1]  ;;  %v9256_v57 = vld [vmem:[#allocation9 + $0x3a0] ss:$16 sps:$4 sm:$0xff]  }
 0x383   :  { %4097 = vrot.lane.b32.xlu0 %v3801_v61, %s10103_s27  ;;  %4095 = vrot.lane.b32.xlu1 %v3798_v63, %s10103_s27  ;;  %v10473_v61 = vld [vmem:[#allocation3 + $0x10] sm:$0xff]  ;;  %v2527_v63 = vld [vmem:[#allocation3] sm:$0xfe] }
 0x384   :  { %2433 = vmatprep.subr.bf16.mxu0 %v9180_v58  ;;  %2476 = vmatprep.subr.bf16.mxu1 %v9183_v59  ;;  %v9259_v58 = vld [vmem:[#allocation9 + $0x3a8] ss:$16 sps:$4 sm:$0xff]   ;;  %v2530_v59 = vpack.c.bf16 %v10473_v61, %v2527_v63 }
 0x385   :  { %2180 = vmatmul.mubr.bf16.vlgmr.msra.gmra.mrb[36].mxu0 %v10422_v1  ;;  %2223 = vmatmul.mubr.bf16.vlgmr.msra.gmra.mrb[36].mxu1 %v10422_v1  ;;  %v9201_v1 = vld [vmem:[#allocation9 + $0x26c] ss:$16 sps:$4 sm:$0xff]  }
 0x386   :  { %2434 = vmatpush1.bf16.msra.mxu0 %v9178_v60  ;;  %2477 = vmatpush1.bf16.msra.mxu1 %v9181_v62  ;;  %v9264_v60 = vld [vmem:[#allocation9 + $0x3c4] ss:$16 sps:$4 sm:$0xff]   ;;  %v9267_v62 = vld [vmem:[#allocation9 + $0x3cc] ss:$16 sps:$4 sm:$0xff]  }
 0x387   :  { %2435 = vmatprep.subr.bf16.mxu0 %v9186_v0  ;;  %2478 = vmatprep.subr.bf16.mxu1 %v9189_v2  ;;  %v2531_v0 = vpack.c.bf16 %v2529_v56, %v2529_v56  ;;  %v9298_v56 = vld [vmem:[#allocation9 + $0x480] ss:$16 sps:$4 sm:$0xff]  }
 0x388   :  { %2465 = vmatprep.mubr.bf16.mxu0 %v10104_v13  ;;  %2508 = vmatprep.mubr.bf16.mxu1 %v10104_v13 }
 0x38a   :  { %2436 = vmatpush1.bf16.msra.mxu0 %v9184_v3  ;;  %2479 = vmatpush1.bf16.msra.mxu1 %v9187_v5  ;;  %v9262_v3 = vld [vmem:[#allocation9 + $0x3c0] ss:$16 sps:$4 sm:$0xff]   ;;  %v9265_v5 = vld [vmem:[#allocation9 + $0x3c8] ss:$16 sps:$4 sm:$0xff]  }
 0x38b   :  { %2437 = vmatprep.subr.bf16.mxu0 %v9192_v7  ;;  %2480 = vmatprep.subr.bf16.mxu1 %v9195_v4  ;;  %v2569_v7 = vshll.u32 %v2530_v59, 16 }
 0x38e   :  { %2438 = vmatpush1.bf16.msra.mxu0 %v9190_v8  ;;  %2481 = vmatpush1.bf16.msra.mxu1 %v9193_v6  ;;  %v9270_v6 = vld [vmem:[#allocation9 + $0x3e4] ss:$16 sps:$4 sm:$0xff]  }
 0x38f   :  { %2439 = vmatprep.subr.bf16.mxu0 %v9198_v9  ;;  %2482 = vmatprep.subr.bf16.mxu1 %v9201_v1  ;;  %v9273_v9 = vld [vmem:[#allocation9 + $0x3ec] ss:$16 sps:$4 sm:$0xff]  }
 0x392   :  { %2440 = vmatpush1.bf16.msra.mxu0 %v9196_v10  ;;  %2483 = vmatpush1.bf16.msra.mxu1 %v9199_v12  ;;  %v2574_v10 = vshll.u32 %v2531_v0, 16  ;;  %v9312_v0 = vld [vmem:[#allocation9 + $0x4c4] ss:$16 sps:$4 sm:$0xff]  }
 0x393   :  { %2441 = vmatprep.subr.bf16.mxu0 %v9204_v14  ;;  %2484 = vmatprep.subr.bf16.mxu1 %v9207_v15 }
 0x396   :  { %2442 = vmatpush1.bf16.msra.mxu0 %v9202_v16  ;;  %2485 = vmatpush1.bf16.msra.mxu1 %v9205_v17 }
 0x397   :  { %2443 = vmatprep.subr.bf16.mxu0 %v9210_v18  ;;  %2486 = vmatprep.subr.bf16.mxu1 %v9213_v19  ;;  %v9268_v18 = vld [vmem:[#allocation9 + $0x3e0] ss:$16 sps:$4 sm:$0xff]   ;;  %v9271_v19 = vld [vmem:[#allocation9 + $0x3e8] ss:$16 sps:$4 sm:$0xff]  }
 0x39a   :  { %2444 = vmatpush1.bf16.msra.mxu0 %v9208_v20  ;;  %2487 = vmatpush1.bf16.msra.mxu1 %v9211_v21  ;;  %v2571_v20 = vrot.slane %v2569_v7, 1  ;;  %v9310_v7 = vld [vmem:[#allocation9 + $0x4c0] ss:$16 sps:$4 sm:$0xff]  }
 0x39b   :  { %2445 = vmatprep.subr.bf16.mxu0 %v9216_v22  ;;  %2488 = vmatprep.subr.bf16.mxu1 %v9219_v23  ;;  %v9279_v22 = vld [vmem:[#allocation9 + $0x40c] ss:$16 sps:$4 sm:$0xff]  }
 0x39e   :  { %2446 = vmatpush1.bf16.msra.mxu0 %v9214_v24  ;;  %2489 = vmatpush1.bf16.msra.mxu1 %v9217_v25  ;;  %v2567_v25 = vshrl.u32 %v2530_v59, 16  ;;  %v9309_v59 = vld [vmem:[#allocation9 + $0x4ac] ss:$16 sps:$4 sm:$0xff]  }
 0x39f   :  { %2447 = vmatprep.subr.bf16.mxu0 %v9222_v26  ;;  %2490 = vmatprep.subr.bf16.mxu1 %v9225_v28  ;;  %v2576_v26 = vrot.slane %v2574_v10, 1  ;;  %v9274_v28 = vld [vmem:[#allocation9 + $0x400] ss:$16 sps:$4 sm:$0xff]   ;;  %v9321_v10 = vld [vmem:[#allocation9 + $0x4ec] ss:$16 sps:$4 sm:$0xff]  }
 0x3a2   :  { %2448 = vmatpush1.bf16.msra.mxu0 %v9220_v11  ;;  %2491 = vmatpush1.bf16.msra.mxu1 %v9223_v29  ;;  %v9277_v11 = vld [vmem:[#allocation9 + $0x408] ss:$16 sps:$4 sm:$0xff]   ;;  %v9282_v29 = vld [vmem:[#allocation9 + $0x424] ss:$16 sps:$4 sm:$0xff]  }
 0x3a3   :  { %2739 = vmatprep.subr.bf16.mxu0 %v9228_v30  ;;  %2782 = vmatprep.subr.bf16.mxu1 %v9231_v31  ;;  %v9285_v30 = vld [vmem:[#allocation9 + $0x42c] ss:$16 sps:$4 sm:$0xff]  }
 0x3a5   :  { %2466 = vmatmul.mubr.bf16.vlgmr.msra.gmra.mrb[36].mxu0 %v2271_v39  ;;  %2509 = vmatmul.mubr.bf16.vlgmr.msra.gmra.mrb[36].mxu1 %v2271_v39  ;;  %v9289_v39 = vld [vmem:[#allocation9 + $0x448] ss:$16 sps:$4 sm:$0xff]  }
 0x3a6   :  { %2740 = vmatpush1.bf16.msra.mxu0 %v9226_v34  ;;  %2783 = vmatpush1.bf16.msra.mxu1 %v9229_v35  ;;  %v9283_v34 = vld [vmem:[#allocation9 + $0x428] ss:$16 sps:$4 sm:$0xff]   ;;  %v9288_v35 = vld [vmem:[#allocation9 + $0x444] ss:$16 sps:$4 sm:$0xff]  }
 0x3a7   :  { %2741 = vmatprep.subr.bf16.mxu0 %v9234_v37  ;;  %2784 = vmatprep.subr.bf16.mxu1 %v9237_v38  ;;  %v9286_v38 = vld [vmem:[#allocation9 + $0x440] ss:$16 sps:$4 sm:$0xff]  }
 0x3a8   :  { %2771 = vmatprep.mubr.bf16.mxu0 %v10104_v13  ;;  %2814 = vmatprep.mubr.bf16.mxu1 %v10104_v13 }
 0x3aa   :  { %2742 = vmatpush1.bf16.msra.mxu0 %v9232_v40  ;;  %2785 = vmatpush1.bf16.msra.mxu1 %v9235_v41 }
 0x3ab   :  { %2743 = vmatprep.subr.bf16.mxu0 %v9240_v42  ;;  %2786 = vmatprep.subr.bf16.mxu1 %v9243_v43  ;;  %v9294_v42 = vld [vmem:[#allocation9 + $0x464] ss:$16 sps:$4 sm:$0xff]   ;;  %v9297_v43 = vld [vmem:[#allocation9 + $0x46c] ss:$16 sps:$4 sm:$0xff]  }
 0x3ae   :  { %2744 = vmatpush1.bf16.msra.mxu0 %v9238_v27  ;;  %2787 = vmatpush1.bf16.msra.mxu1 %v9241_v44 }
 0x3af   :  { %2745 = vmatprep.subr.bf16.mxu0 %v9246_v45  ;;  %2788 = vmatprep.subr.bf16.mxu1 %v9249_v46 }
 0x3b2   :  { %2746 = vmatpush1.bf16.msra.mxu0 %v9244_v47  ;;  %2789 = vmatpush1.bf16.msra.mxu1 %v9247_v49 }
 0x3b3   :  { %2747 = vmatprep.subr.bf16.mxu0 %v9252_v50  ;;  %2790 = vmatprep.subr.bf16.mxu1 %v9255_v32  ;;  %v9292_v50 = vld [vmem:[#allocation9 + $0x460] ss:$16 sps:$4 sm:$0xff]   ;;  %v9295_v32 = vld [vmem:[#allocation9 + $0x468] ss:$16 sps:$4 sm:$0xff]  }
 0x3b6   :  { %2748 = vmatpush1.bf16.msra.mxu0 %v9250_v52  ;;  %2791 = vmatpush1.bf16.msra.mxu1 %v9253_v53  ;;  %v9300_v53 = vld [vmem:[#allocation9 + $0x484] ss:$16 sps:$4 sm:$0xff]  }
 0x3b7   :  { %2749 = vmatprep.subr.bf16.mxu0 %v9258_v54  ;;  %2792 = vmatprep.subr.bf16.mxu1 %v9261_v55  ;;  %v9303_v54 = vld [vmem:[#allocation9 + $0x48c] ss:$16 sps:$4 sm:$0xff]  }
 0x3ba   :  { %2750 = vmatpush1.bf16.msra.mxu0 %v9256_v57  ;;  %2793 = vmatpush1.bf16.msra.mxu1 %v9259_v58  ;;  %v1294_v2 = vpop.f32.mrb[24].mxu1  ;;  %v9301_v57 = vld [vmem:[#allocation9 + $0x488] ss:$16 sps:$4 sm:$0xff]   ;;  %v9306_v58 = vld [vmem:[#allocation9 + $0x4a4] ss:$16 sps:$4 sm:$0xff]  }
 0x3bb   :  { %v1301_v4 = vadd.f32 %v1294_v2, %v10401_v48  ;;  %v8687_v8 = vpop.f32.mrb[25].mxu1  ;;  %2751 = vmatprep.subr.bf16.mxu0 %v9264_v60  ;;  %2794 = vmatprep.subr.bf16.mxu1 %v9267_v62  ;;  %v9276_v48 = vld [vmem:[#allocation9 + $0x404] ss:$16 sps:$4 sm:$0xff]   ;;  %v9304_v60 = vld [vmem:[#allocation9 + $0x4a0] ss:$16 sps:$4 sm:$0xff]  }
 0x3bc   :  { %v1297_v1 = vpop.f32.mrb[26].mxu1  ;;  %v9307_v62 = vld [vmem:[#allocation9 + $0x4a8] ss:$16 sps:$4 sm:$0xff]   ;;  %v9315_v2 = vld [vmem:[#allocation9 + $0x4cc] ss:$16 sps:$4 sm:$0xff]  }
 0x3bd   :  { %v1302_v12 = vadd.f32 %v1297_v1, %v10403_v51  ;;  %v8688_v14 = vpop.f32.mrb[27].mxu1  ;;  %v1374_v15 = vpop.f32.mrb[28].mxu0  ;;  %v2572_v51 = vor.u32 %v2571_v20, %v2567_v25  ;;  %v9948_v8 = vld [vmem:[#allocation3 + $0x30] sm:$0xff] }
 0x3be   :  { %2752 = vmatpush1.bf16.msra.mxu0 %v9262_v3  ;;  %2795 = vmatpush1.bf16.msra.mxu1 %v9265_v5  ;;  %v1381_v16 = vadd.f32 %v1374_v15, %v1301_v4  ;;  %v8699_v17 = vpop.f32.mrb[29].mxu0  ;;  %v7702_v3 = vld [vmem:[#allocation7] ss:$0 sm:$0xff]  ;;  %v9313_v4 = vld [vmem:[#allocation9 + $0x4c8] ss:$16 sps:$4 sm:$0xff]  }
 0x3bf   :  { %v1377_v21 = vpop.f32.mrb[30].mxu0  ;;  %2753 = vmatprep.subr.bf16.mxu0 %v9270_v6  ;;  %2796 = vmatprep.subr.bf16.mxu1 %v9273_v9  ;;  %v2577_v31 = vsel %vm2565_vm14, %v2572_v51, %v2576_v26  ;;  %108 = vst.msk [vmem:[#allocation3 + $0x48] sm:$0xf] %vm107_vm1, %v9948_v8  ;;  %v9318_v1 = vld [vmem:[#allocation9 + $0x4e4] ss:$16 sps:$4 sm:$0xff]  }
 0x3c0   :  { %v1382_v23 = vadd.f32 %v1377_v21, %v1302_v12  ;;  %v8700_v24 = vpop.f32.mrb[31].mxu0  ;;  %v9316_v17 = vld [vmem:[#allocation9 + $0x4e0] ss:$16 sps:$4 sm:$0xff]   ;;  %v9324_v21 = vld [vmem:[#allocation9 + $0x504] ss:$16 sps:$4 sm:$0xff]  }
 0x3c1   :  { %v9322_v26 = vld [vmem:[#allocation9 + $0x500] ss:$16 sps:$4 sm:$0xff]   ;;  %v9325_v51 = vld [vmem:[#allocation9 + $0x508] ss:$16 sps:$4 sm:$0xff]  }
 0x3c2   :  { %2754 = vmatpush1.bf16.msra.mxu0 %v9268_v18  ;;  %2797 = vmatpush1.bf16.msra.mxu1 %v9271_v19  ;;  %v9319_v18 = vld [vmem:[#allocation9 + $0x4e8] ss:$16 sps:$4 sm:$0xff]  }
 0x3c3   :  { %3066 = vmatprep.subr.bf16.mxu0 %v9276_v48  ;;  %3109 = vmatprep.subr.bf16.mxu1 %v9279_v22  ;;  %v9327_v48 = vld [vmem:[#allocation9 + $0x50c] ss:$16 sps:$4 sm:$0xff]   ;;  %v9379_v8 = vld [vmem:[#allocation9 + $0x628] ss:$16 sps:$4 sm:$0xff]  }
 0x3c5   :  { %2772 = vmatmul.mubr.bf16.vlgmr.msra.gmra.mrb[36].mxu0 %v2577_v31  ;;  %2815 = vmatmul.mubr.bf16.vlgmr.msra.gmra.mrb[36].mxu1 %v2577_v31 }
 0x3c6   :  { %3067 = vmatpush1.bf16.msra.mxu0 %v9274_v28  ;;  %3110 = vmatpush1.bf16.msra.mxu1 %v9277_v11 }
 0x3c7   :  { %3068 = vmatprep.subr.bf16.mxu0 %v9282_v29  ;;  %3111 = vmatprep.subr.bf16.mxu1 %v9285_v30  ;;  %v9330_v29 = vld [vmem:[#allocation9 + $0x524] ss:$16 sps:$4 sm:$0xff]   ;;  %v9333_v30 = vld [vmem:[#allocation9 + $0x52c] ss:$16 sps:$4 sm:$0xff]  }
 0x3c8   :  { %3098 = vmatprep.mubr.bf16.mxu0 %v10104_v13  ;;  %3141 = vmatprep.mubr.bf16.mxu1 %v10104_v13 }
 0x3ca   :  { %v1455_v37 = vpop.f32.mrb[28].mxu1  ;;  %3069 = vmatpush1.bf16.msra.mxu0 %v9280_v33  ;;  %3112 = vmatpush1.bf16.msra.mxu1 %v9283_v34  ;;  %v9328_v33 = vld [vmem:[#allocation9 + $0x520] ss:$16 sps:$4 sm:$0xff]   ;;  %v9331_v34 = vld [vmem:[#allocation9 + $0x528] ss:$16 sps:$4 sm:$0xff]  }
 0x3cb   :  { %v1462_v40 = vadd.f32 %v1455_v37, %v1381_v16  ;;  %v8711_v41 = vpop.f32.mrb[29].mxu1  ;;  %3070 = vmatprep.subr.bf16.mxu0 %v9288_v35  ;;  %3113 = vmatprep.subr.bf16.mxu1 %v9291_v36  ;;  %v9336_v35 = vld [vmem:[#allocation9 + $0x544] ss:$16 sps:$4 sm:$0xff]   ;;  %v9339_v36 = vld [vmem:[#allocation9 + $0x54c] ss:$16 sps:$4 sm:$0xff]  }
 0x3cc   :  { %v1458_v27 = vpop.f32.mrb[30].mxu1  ;;  %v9334_v37 = vld [vmem:[#allocation9 + $0x540] ss:$16 sps:$4 sm:$0xff]  }
 0x3cd   :  { %v1463_v44 = vadd.f32 %v1458_v27, %v1382_v23  ;;  %v8712_v45 = vpop.f32.mrb[31].mxu1  ;;  %v1536_v46 = vpop.f32.mrb[32].mxu0  ;;  %v9340_v41 = vld [vmem:[#allocation9 + $0x560] ss:$16 sps:$4 sm:$0xff]   ;;  %v9351_v27 = vld [vmem:[#allocation9 + $0x58c] ss:$16 sps:$4 sm:$0xff]  }
 0x3ce   :  { %v1543_v47 = vadd.f32 %v1536_v46, %v1462_v40  ;;  %v8723_v49 = vpop.f32.mrb[33].mxu0  ;;  %3071 = vmatpush1.bf16.msra.mxu0 %v9286_v38  ;;  %3114 = vmatpush1.bf16.msra.mxu1 %v9289_v39  ;;  %v9337_v38 = vld [vmem:[#allocation9 + $0x548] ss:$16 sps:$4 sm:$0xff]   ;;  %v9342_v39 = vld [vmem:[#allocation9 + $0x564] ss:$16 sps:$4 sm:$0xff]  }
 0x3cf   :  { %v1539_v52 = vpop.f32.mrb[34].mxu0  ;;  %3072 = vmatprep.subr.bf16.mxu0 %v9294_v42  ;;  %3115 = vmatprep.subr.bf16.mxu1 %v9297_v43  ;;  %v9345_v40 = vld [vmem:[#allocation9 + $0x56c] ss:$16 sps:$4 sm:$0xff]   ;;  %v9343_v42 = vld [vmem:[#allocation9 + $0x568] ss:$16 sps:$4 sm:$0xff]  }
 0x3d0   :  { %v1544_v55 = vadd.f32 %v1539_v52, %v1463_v44  ;;  %v8724_v63 = vpop.f32.mrb[35].mxu0  ;;  %v9348_v43 = vld [vmem:[#allocation9 + $0x584] ss:$16 sps:$4 sm:$0xff]   ;;  %v9346_v44 = vld [vmem:[#allocation9 + $0x580] ss:$16 sps:$4 sm:$0xff]  }
 0x3d1   :  { %v9349_v45 = vld [vmem:[#allocation9 + $0x588] ss:$16 sps:$4 sm:$0xff]   ;;  %v9354_v46 = vld [vmem:[#allocation9 + $0x5a4] ss:$16 sps:$4 sm:$0xff]   ;;  %v9352_v49 = vld [vmem:[#allocation9 + $0x5a0] ss:$16 sps:$4 sm:$0xff]  }
 0x3d2   :  { %3073 = vmatpush1.bf16.msra.mxu0 %v9292_v50  ;;  %3116 = vmatpush1.bf16.msra.mxu1 %v9295_v32  ;;  %v9355_v50 = vld [vmem:[#allocation9 + $0x5a8] ss:$16 sps:$4 sm:$0xff]   ;;  %v9360_v32 = vld [vmem:[#allocation9 + $0x5c4] ss:$16 sps:$4 sm:$0xff]   ;;  %v9363_v52 = vld [vmem:[#allocation9 + $0x5cc] ss:$16 sps:$4 sm:$0xff]  }
 0x3d3   :  { %3074 = vmatprep.subr.bf16.mxu0 %v9300_v53  ;;  %3117 = vmatprep.subr.bf16.mxu1 %v9303_v54  ;;  %v9358_v53 = vld [vmem:[#allocation9 + $0x5c0] ss:$16 sps:$4 sm:$0xff]   ;;  %v9361_v54 = vld [vmem:[#allocation9 + $0x5c8] ss:$16 sps:$4 sm:$0xff]   ;;  %v9369_v63 = vld [vmem:[#allocation9 + $0x5ec] ss:$16 sps:$4 sm:$0xff]  }
 0x3d6   :  { %3075 = vmatpush1.bf16.msra.mxu0 %v9298_v56  ;;  %3118 = vmatpush1.bf16.msra.mxu1 %v9301_v57  ;;  %v9364_v56 = vld [vmem:[#allocation9 + $0x5e0] ss:$16 sps:$4 sm:$0xff]   ;;  %v9367_v57 = vld [vmem:[#allocation9 + $0x5e8] ss:$16 sps:$4 sm:$0xff]  }
 0x3d7   :  { %3076 = vmatprep.subr.bf16.mxu0 %v9306_v58  ;;  %3119 = vmatprep.subr.bf16.mxu1 %v9309_v59  ;;  %v9372_v58 = vld [vmem:[#allocation9 + $0x604] ss:$16 sps:$4 sm:$0xff]   ;;  %v9375_v59 = vld [vmem:[#allocation9 + $0x60c] ss:$16 sps:$4 sm:$0xff]  }
 0x3da   :  { %v1616_v5 = vpop.f32.mrb[32].mxu1  ;;  %3077 = vmatpush1.bf16.msra.mxu0 %v9304_v60  ;;  %3120 = vmatpush1.bf16.msra.mxu1 %v9307_v62 }
 0x3db   :  { %v1623_v6 = vadd.f32 %v1616_v5, %v1543_v47  ;;  %v8735_v9 = vpop.f32.mrb[33].mxu1  ;;  %3078 = vmatprep.subr.bf16.mxu0 %v9312_v0  ;;  %3121 = vmatprep.subr.bf16.mxu1 %v9315_v2  ;;  %v9357_v47 = vld [vmem:[#allocation9 + $0x5ac] ss:$16 sps:$4 sm:$0xff]   ;;  %v9370_v0 = vld [vmem:[#allocation9 + $0x600] ss:$16 sps:$4 sm:$0xff]  }
 0x3dc   :  { %v1619_v12 = vpop.f32.mrb[34].mxu1  ;;  %v9373_v2 = vld [vmem:[#allocation9 + $0x608] ss:$16 sps:$4 sm:$0xff]   ;;  %v9381_v5 = vld [vmem:[#allocation9 + $0x62c] ss:$16 sps:$4 sm:$0xff]  }
 0x3dd   :  { %v1632_v14 = vadd.f32 %v7702_v3, %v1623_v6  ;;  %v1624_v15 = vadd.f32 %v1619_v12, %v1544_v55  ;;  %v8736_v16 = vpop.f32.mrb[35].mxu1  ;;  %v9366_v55 = vld [vmem:[#allocation9 + $0x5e4] ss:$16 sps:$4 sm:$0xff]   ;;  %v9387_v9 = vld [vmem:[#allocation9 + $0x64c] ss:$16 sps:$4 sm:$0xff]  }
 0x3de   :  { %3079 = vmatpush1.bf16.msra.mxu0 %v9310_v7  ;;  %3122 = vmatpush1.bf16.msra.mxu1 %v9313_v4  ;;  %v9376_v4 = vld [vmem:[#allocation9 + $0x620] ss:$16 sps:$4 sm:$0xff]   ;;  %v9384_v6 = vld [vmem:[#allocation9 + $0x644] ss:$16 sps:$4 sm:$0xff]   ;;  %v9391_v16 = vld [vmem:[#allocation9 + $0x668] ss:$16 sps:$4 sm:$0xff]  }
 0x3df   :  { %v1634_v19 = vmax.f32 %v1632_v14, 0.0  ;;  %v1633_v20 = vadd.f32 %v7702_v3, %v1624_v15  ;;  %3080 = vmatprep.subr.bf16.mxu0 %v9318_v1  ;;  %3123 = vmatprep.subr.bf16.mxu1 %v9321_v10  ;;  %v9378_v3 = vld [vmem:[#allocation9 + $0x624] ss:$16 sps:$4 sm:$0xff]   ;;  %v9382_v1 = vld [vmem:[#allocation9 + $0x640] ss:$16 sps:$4 sm:$0xff]  }
 0x3e0   :  { %v9385_v10 = vld [vmem:[#allocation9 + $0x648] ss:$16 sps:$4 sm:$0xff]   ;;  %v9390_v12 = vld [vmem:[#allocation9 + $0x664] ss:$16 sps:$4 sm:$0xff]   ;;  %v9393_v14 = vld [vmem:[#allocation9 + $0x66c] ss:$16 sps:$4 sm:$0xff]  }
 0x3e1   :  { %v1639_v22 = vrot.slane %v1634_v19, 5  ;;  %v1635_v23 = vmax.f32 %v1633_v20, 0.0  ;;  %v9388_v15 = vld [vmem:[#allocation9 + $0x660] ss:$16 sps:$4 sm:$0xff]   ;;  %v9397_v20 = vld [vmem:[#allocation9 + $0x688] ss:$16 sps:$4 sm:$0xff]  }
 0x3e2   :  { %3081 = vmatpush1.bf16.msra.mxu0 %v9316_v17  ;;  %3124 = vmatpush1.bf16.msra.mxu1 %v9319_v18  ;;  %v9396_v17 = vld [vmem:[#allocation9 + $0x684] ss:$16 sps:$4 sm:$0xff]   ;;  %v9399_v18 = vld [vmem:[#allocation9 + $0x68c] ss:$16 sps:$4 sm:$0xff]   ;;  %v9394_v19 = vld [vmem:[#allocation9 + $0x680] ss:$16 sps:$4 sm:$0xff]  }
 0x3e3   :  { %v1640_v24 = vrot.slane %v1635_v23, 5  ;;  %1642 = vrot.lane.b32.xlu1 %v1639_v22, %s10102_s0  ;;  %3359 = vmatprep.subr.bf16.mxu0 %v9324_v21  ;;  %v9402_v21 = vld [vmem:[#allocation9 + $0x6a4] ss:$16 sps:$4 sm:$0xff]   ;;  %v9403_v23 = vld [vmem:[#allocation9 + $0x6a8] ss:$16 sps:$4 sm:$0xff]  }
 0x3e4   :  { %3402 = vmatprep.subr.bf16.mxu1 %v9327_v48  ;;  %v9405_v48 = vld [vmem:[#allocation9 + $0x6ac] ss:$16 sps:$4 sm:$0xff]  }
 0x3e5   :  { %v1641_v25 = vsel %vm1638_vm2, %v1639_v22, %v1640_v24  ;;  %v9400_v22 = vld [vmem:[#allocation9 + $0x6a0] ss:$16 sps:$4 sm:$0xff]  }
 0x3e6   :  { %1644 = vrot.lane.b32.xlu0 %v1641_v25, %s10102_s0  ;;  %v9411_v25 = vld [vmem:[#allocation9 + $0x6cc] ss:$16 sps:$4 sm:$0xff]  }
 0x3e7   :  { %1646 = vrot.lane.b32.xlu1 %v1640_v24, %s10102_s0  ;;  %v9408_v24 = vld [vmem:[#allocation9 + $0x6c4] ss:$16 sps:$4 sm:$0xff]  }
 0x3e9   :  { %v2903_v28 = vpop.permute.xlu0 %2902  ;;  %v2901_v11 = vpop.permute.xlu1 %2900 }
 0x3ea   :  { %v2904_v31 = vsel %vm1738_vm11, %v2901_v11, %v2903_v28  ;;  %v9409_v28 = vld [vmem:[#allocation9 + $0x6c8] ss:$16 sps:$4 sm:$0xff]   ;;  %v9414_v11 = vld [vmem:[#allocation9 + $0x6e4] ss:$16 sps:$4 sm:$0xff]  }
 0x3eb   :  { %3099 = vmatmul.mubr.bf16.vlgmr.msra.gmra.mrb[36].mxu0 %v2904_v31  ;;  %3142 = vmatmul.mubr.bf16.vlgmr.msra.gmra.mrb[36].mxu1 %v2904_v31  ;;  %v3453_v31 = vld [vmem:[#allocation3] sm:$0xfc] }
 0x3ec   :  { %3360 = vmatpush1.bf16.msra.mxu0 %v9322_v26  ;;  %3403 = vmatpush1.bf16.msra.mxu1 %v9325_v51  ;;  %v3454_v26 = vld [vmem:[#allocation3 + $0x20] sm:$0x3]  ;;  %v9406_v51 = vld [vmem:[#allocation9 + $0x6c0] ss:$16 sps:$4 sm:$0xff]  }
 0x3ed   :  { %3361 = vmatprep.subr.bf16.mxu0 %v9330_v29  ;;  %3404 = vmatprep.subr.bf16.mxu1 %v9333_v30  ;;  %v3196_v60 = vpop.permute.xlu0 %3195  ;;  %v3194_v62 = vpop.permute.xlu1 %3193  ;;  %v9417_v29 = vld [vmem:[#allocation9 + $0x6ec] ss:$16 sps:$4 sm:$0xff]   ;;  %v3456_v30 = vpack.c.bf16 %v3454_v26, %v3454_v26 }
 0x3ee   :  { %3391 = vmatprep.mubr.bf16.mxu0 %v10104_v13  ;;  %3434 = vmatprep.mubr.bf16.mxu1 %v10104_v13  ;;  %v3197_v7 = vsel %vm2270_vm0, %v3194_v62, %v3196_v60  ;;  %v9451_v60 = vld [vmem:[#allocation9 + $0x7a8] ss:$16 sps:$4 sm:$0xff]   ;;  %v9456_v62 = vld [vmem:[#allocation9 + $0x7c4] ss:$16 sps:$4 sm:$0xff]  }
 0x3f0   :  { %3362 = vmatpush1.bf16.msra.mxu0 %v9328_v33  ;;  %3405 = vmatpush1.bf16.msra.mxu1 %v9331_v34  ;;  %v9412_v33 = vld [vmem:[#allocation9 + $0x6e0] ss:$16 sps:$4 sm:$0xff]   ;;  %v9415_v34 = vld [vmem:[#allocation9 + $0x6e8] ss:$16 sps:$4 sm:$0xff]  }
 0x3f1   :  { %3363 = vmatprep.subr.bf16.mxu0 %v9336_v35  ;;  %3406 = vmatprep.subr.bf16.mxu1 %v9339_v36  ;;  %v3455_v35 = vpack.c.bf16 %v10473_v61, %v3453_v31  ;;  %v9420_v36 = vld [vmem:[#allocation9 + $0x704] ss:$16 sps:$4 sm:$0xff]   ;;  %v9424_v61 = vld [vmem:[#allocation9 + $0x720] ss:$16 sps:$4 sm:$0xff]  }
 0x3f4   :  { %3364 = vmatpush1.bf16.msra.mxu0 %v9334_v37  ;;  %3407 = vmatpush1.bf16.msra.mxu1 %v9337_v38  ;;  %v9423_v37 = vld [vmem:[#allocation9 + $0x70c] ss:$16 sps:$4 sm:$0xff]   ;;  %v3494_v38 = vrot.slane %v3456_v30, 1 }
 0x3f5   :  { %3365 = vmatprep.subr.bf16.mxu0 %v9342_v39  ;;  %3408 = vmatprep.subr.bf16.mxu1 %v9345_v40  ;;  %v3493_v39 = vrot.slane %v3455_v35, 1  ;;  %v9418_v40 = vld [vmem:[#allocation9 + $0x700] ss:$16 sps:$4 sm:$0xff]   ;;  %v9495_v30 = vld [vmem:[#allocation9 + $0x88c] ss:$16 sps:$4 sm:$0xff]  }
 0x3f8   :  { %3366 = vmatpush1.bf16.msra.mxu0 %v9340_v41  ;;  %3409 = vmatpush1.bf16.msra.mxu1 %v9343_v42  ;;  %v9421_v41 = vld [vmem:[#allocation9 + $0x708] ss:$16 sps:$4 sm:$0xff]   ;;  %v9426_v42 = vld [vmem:[#allocation9 + $0x724] ss:$16 sps:$4 sm:$0xff]  }
 0x3f9   :  { %3367 = vmatprep.subr.bf16.mxu0 %v9348_v43  ;;  %3410 = vmatprep.subr.bf16.mxu1 %v9351_v27  ;;  %v9429_v43 = vld [vmem:[#allocation9 + $0x72c] ss:$16 sps:$4 sm:$0xff]   ;;  %v3495_v27 = vsel %vm3492_vm15, %v3493_v39, %v3494_v38  ;;  %v9496_v38 = vld [vmem:[#allocation9 + $0x8a0] ss:$16 sps:$4 sm:$0xff]   ;;  %v9499_v39 = vld [vmem:[#allocation9 + $0x8a8] ss:$16 sps:$4 sm:$0xff]  }
 0x3fc   :  { %3368 = vmatpush1.bf16.msra.mxu0 %v9346_v44  ;;  %3411 = vmatpush1.bf16.msra.mxu1 %v9349_v45  ;;  %v9427_v44 = vld [vmem:[#allocation9 + $0x728] ss:$16 sps:$4 sm:$0xff]   ;;  %v9432_v45 = vld [vmem:[#allocation9 + $0x744] ss:$16 sps:$4 sm:$0xff]  }
 0x3fd   :  { %3369 = vmatprep.subr.bf16.mxu0 %v9354_v46  ;;  %3412 = vmatprep.subr.bf16.mxu1 %v9357_v47  ;;  %v9435_v46 = vld [vmem:[#allocation9 + $0x74c] ss:$16 sps:$4 sm:$0xff]   ;;  %v9430_v47 = vld [vmem:[#allocation9 + $0x740] ss:$16 sps:$4 sm:$0xff]  }
 0x400   :  { %3370 = vmatpush1.bf16.msra.mxu0 %v9352_v49  ;;  %3413 = vmatpush1.bf16.msra.mxu1 %v9355_v50  ;;  %v9433_v49 = vld [vmem:[#allocation9 + $0x748] ss:$16 sps:$4 sm:$0xff]   ;;  %v9438_v50 = vld [vmem:[#allocation9 + $0x764] ss:$16 sps:$4 sm:$0xff]  }
 0x401   :  { %3371 = vmatprep.subr.bf16.mxu0 %v9360_v32  ;;  %3414 = vmatprep.subr.bf16.mxu1 %v9363_v52  ;;  %v9441_v32 = vld [vmem:[#allocation9 + $0x76c] ss:$16 sps:$4 sm:$0xff]   ;;  %v9436_v52 = vld [vmem:[#allocation9 + $0x760] ss:$16 sps:$4 sm:$0xff]  }
 0x404   :  { %3372 = vmatpush1.bf16.msra.mxu0 %v9358_v53  ;;  %3415 = vmatpush1.bf16.msra.mxu1 %v9361_v54  ;;  %v9439_v53 = vld [vmem:[#allocation9 + $0x768] ss:$16 sps:$4 sm:$0xff]   ;;  %v9444_v54 = vld [vmem:[#allocation9 + $0x784] ss:$16 sps:$4 sm:$0xff]  }
 0x405   :  { %3373 = vmatprep.subr.bf16.mxu0 %v9366_v55  ;;  %3416 = vmatprep.subr.bf16.mxu1 %v9369_v63  ;;  %v9447_v55 = vld [vmem:[#allocation9 + $0x78c] ss:$16 sps:$4 sm:$0xff]   ;;  %v9442_v63 = vld [vmem:[#allocation9 + $0x780] ss:$16 sps:$4 sm:$0xff]  }
 0x408   :  { %3374 = vmatpush1.bf16.msra.mxu0 %v9364_v56  ;;  %3417 = vmatpush1.bf16.msra.mxu1 %v9367_v57  ;;  %v9445_v56 = vld [vmem:[#allocation9 + $0x788] ss:$16 sps:$4 sm:$0xff]   ;;  %v9450_v57 = vld [vmem:[#allocation9 + $0x7a4] ss:$16 sps:$4 sm:$0xff]  }
 0x409   :  { %3657 = vmatprep.subr.bf16.mxu0 %v9372_v58  ;;  %3700 = vmatprep.subr.bf16.mxu1 %v9375_v59  ;;  %v9453_v58 = vld [vmem:[#allocation9 + $0x7ac] ss:$16 sps:$4 sm:$0xff]   ;;  %v9448_v59 = vld [vmem:[#allocation9 + $0x7a0] ss:$16 sps:$4 sm:$0xff]  }
 0x40b   :  { %3392 = vmatmul.mubr.bf16.vlgmr.msra.gmra.mrb[36].mxu0 %v3197_v7  ;;  %3435 = vmatmul.mubr.bf16.vlgmr.msra.gmra.mrb[36].mxu1 %v3197_v7  ;;  %v9465_v7 = vld [vmem:[#allocation9 + $0x7ec] ss:$16 sps:$4 sm:$0xff]  }
 0x40c   :  { %3658 = vmatpush1.bf16.msra.mxu0 %v9370_v0  ;;  %3701 = vmatpush1.bf16.msra.mxu1 %v9373_v2  ;;  %v9459_v0 = vld [vmem:[#allocation9 + $0x7cc] ss:$16 sps:$4 sm:$0xff]   ;;  %v9454_v2 = vld [vmem:[#allocation9 + $0x7c0] ss:$16 sps:$4 sm:$0xff]  }
 0x40d   :  { %3659 = vmatprep.subr.bf16.mxu0 %v9378_v3  ;;  %3702 = vmatprep.subr.bf16.mxu1 %v9381_v5  ;;  %v9457_v3 = vld [vmem:[#allocation9 + $0x7c8] ss:$16 sps:$4 sm:$0xff]   ;;  %v9462_v5 = vld [vmem:[#allocation9 + $0x7e4] ss:$16 sps:$4 sm:$0xff]  }
 0x40e   :  { %3689 = vmatprep.mubr.bf16.mxu0 %v10104_v13  ;;  %3732 = vmatprep.mubr.bf16.mxu1 %v10104_v13 }
 0x410   :  { %3660 = vmatpush1.bf16.msra.mxu0 %v9376_v4  ;;  %3703 = vmatpush1.bf16.msra.mxu1 %v9379_v8  ;;  %v9460_v4 = vld [vmem:[#allocation9 + $0x7e0] ss:$16 sps:$4 sm:$0xff]   ;;  %v9463_v8 = vld [vmem:[#allocation9 + $0x7e8] ss:$16 sps:$4 sm:$0xff]  }
 0x411   :  { %3661 = vmatprep.subr.bf16.mxu0 %v9384_v6  ;;  %3704 = vmatprep.subr.bf16.mxu1 %v9387_v9  ;;  %v9468_v6 = vld [vmem:[#allocation9 + $0x804] ss:$16 sps:$4 sm:$0xff]   ;;  %v9471_v9 = vld [vmem:[#allocation9 + $0x80c] ss:$16 sps:$4 sm:$0xff]  }
 0x414   :  { %3662 = vmatpush1.bf16.msra.mxu0 %v9382_v1  ;;  %3705 = vmatpush1.bf16.msra.mxu1 %v9385_v10  ;;  %v3805_v1 = vpop.permute.xlu0 %3804  ;;  %v3803_v10 = vpop.permute.xlu1 %3802 }
 0x415   :  { %3663 = vmatprep.subr.bf16.mxu0 %v9390_v12  ;;  %3706 = vmatprep.subr.bf16.mxu1 %v9393_v14  ;;  %v9466_v12 = vld [vmem:[#allocation9 + $0x800] ss:$16 sps:$4 sm:$0xff]   ;;  %v9469_v14 = vld [vmem:[#allocation9 + $0x808] ss:$16 sps:$4 sm:$0xff]  }
 0x418   :  { %3664 = vmatpush1.bf16.msra.mxu0 %v9388_v15  ;;  %3707 = vmatpush1.bf16.msra.mxu1 %v9391_v16  ;;  %v9474_v15 = vld [vmem:[#allocation9 + $0x824] ss:$16 sps:$4 sm:$0xff]   ;;  %v9477_v16 = vld [vmem:[#allocation9 + $0x82c] ss:$16 sps:$4 sm:$0xff]   ;;  %v10499_v26 = vpop.permute.xlu0 %4097 }
 0x419   :  { %3665 = vmatprep.subr.bf16.mxu0 %v9396_v17  ;;  %3708 = vmatprep.subr.bf16.mxu1 %v9399_v18  ;;  %v3806_v17 = vsel %vm1738_vm11, %v3803_v10, %v3805_v1  ;;  %v9472_v18 = vld [vmem:[#allocation9 + $0x820] ss:$16 sps:$4 sm:$0xff]  }
 0x41c   :  { %3666 = vmatpush1.bf16.msra.mxu0 %v9394_v19  ;;  %3709 = vmatpush1.bf16.msra.mxu1 %v9397_v20  ;;  %v9475_v19 = vld [vmem:[#allocation9 + $0x828] ss:$16 sps:$4 sm:$0xff]   ;;  %v9480_v20 = vld [vmem:[#allocation9 + $0x844] ss:$16 sps:$4 sm:$0xff]  }
 0x41d   :  { %3667 = vmatprep.subr.bf16.mxu0 %v9402_v21  ;;  %3710 = vmatprep.subr.bf16.mxu1 %v9405_v48  ;;  %v9483_v21 = vld [vmem:[#allocation9 + $0x84c] ss:$16 sps:$4 sm:$0xff]   ;;  %v9478_v48 = vld [vmem:[#allocation9 + $0x840] ss:$16 sps:$4 sm:$0xff]  }
 0x420   :  { %3668 = vmatpush1.bf16.msra.mxu0 %v9400_v22  ;;  %3711 = vmatpush1.bf16.msra.mxu1 %v9403_v23  ;;  %v9481_v22 = vld [vmem:[#allocation9 + $0x848] ss:$16 sps:$4 sm:$0xff]   ;;  %v10497_v23 = vpop.permute.xlu1 %4095 }
 0x421   :  { %3669 = vmatprep.subr.bf16.mxu0 %v9408_v24  ;;  %3712 = vmatprep.subr.bf16.mxu1 %v9411_v25  ;;  %v9486_v24 = vld [vmem:[#allocation9 + $0x864] ss:$16 sps:$4 sm:$0xff]   ;;  %v9489_v25 = vld [vmem:[#allocation9 + $0x86c] ss:$16 sps:$4 sm:$0xff]  }
 0x424   :  { %3670 = vmatpush1.bf16.msra.mxu0 %v9406_v51  ;;  %3713 = vmatpush1.bf16.msra.mxu1 %v9409_v28  ;;  %v9484_v51 = vld [vmem:[#allocation9 + $0x860] ss:$16 sps:$4 sm:$0xff]   ;;  %v9487_v28 = vld [vmem:[#allocation9 + $0x868] ss:$16 sps:$4 sm:$0xff]  }
 0x425   :  { %3671 = vmatprep.subr.bf16.mxu0 %v9414_v11  ;;  %3714 = vmatprep.subr.bf16.mxu1 %v9417_v29  ;;  %v9492_v29 = vld [vmem:[#allocation9 + $0x884] ss:$16 sps:$4 sm:$0xff]  }
 0x428   :  { %3672 = vmatpush1.bf16.msra.mxu0 %v9412_v33  ;;  %3715 = vmatpush1.bf16.msra.mxu1 %v9415_v34  ;;  %v9490_v33 = vld [vmem:[#allocation9 + $0x880] ss:$16 sps:$4 sm:$0xff]   ;;  %v9493_v34 = vld [vmem:[#allocation9 + $0x888] ss:$16 sps:$4 sm:$0xff]  }
 0x429   :  { %3968 = vmatprep.subr.bf16.mxu0 %v9420_v36  ;;  %4011 = vmatprep.subr.bf16.mxu1 %v9423_v37  ;;  %v9498_v36 = vld [vmem:[#allocation9 + $0x8a4] ss:$16 sps:$4 sm:$0xff]   ;;  %v9501_v37 = vld [vmem:[#allocation9 + $0x8ac] ss:$16 sps:$4 sm:$0xff]  }
 0x42b   :  { %3690 = vmatmul.mubr.bf16.vlgmr.msra.gmra.mrb[36].mxu0 %v3495_v27  ;;  %3733 = vmatmul.mubr.bf16.vlgmr.msra.gmra.mrb[36].mxu1 %v3495_v27  ;;  %v9510_v27 = vld [vmem:[#allocation9 + $0x8e4] ss:$16 sps:$4 sm:$0xff]  }
 0x42c   :  { %3969 = vmatpush1.bf16.msra.mxu0 %v9418_v40  ;;  %4012 = vmatpush1.bf16.msra.mxu1 %v9421_v41  ;;  %v9504_v40 = vld [vmem:[#allocation9 + $0x8c4] ss:$16 sps:$4 sm:$0xff]   ;;  %v9507_v41 = vld [vmem:[#allocation9 + $0x8cc] ss:$16 sps:$4 sm:$0xff]  }
 0x42d   :  { %3970 = vmatprep.subr.bf16.mxu0 %v9426_v42  ;;  %4013 = vmatprep.subr.bf16.mxu1 %v9429_v43  ;;  %v9502_v42 = vld [vmem:[#allocation9 + $0x8c0] ss:$16 sps:$4 sm:$0xff]   ;;  %v9505_v43 = vld [vmem:[#allocation9 + $0x8c8] ss:$16 sps:$4 sm:$0xff]  }
 0x42e   :  { %4000 = vmatprep.mubr.bf16.mxu0 %v10104_v13  ;;  %4043 = vmatprep.mubr.bf16.mxu1 %v10104_v13 }
 0x430   :  { %3971 = vmatpush1.bf16.msra.mxu0 %v9424_v61  ;;  %4014 = vmatpush1.bf16.msra.mxu1 %v9427_v44  ;;  %v9513_v61 = vld [vmem:[#allocation9 + $0x8ec] ss:$16 sps:$4 sm:$0xff]  }
 0x431   :  { %3972 = vmatprep.subr.bf16.mxu0 %v9432_v45  ;;  %4015 = vmatprep.subr.bf16.mxu1 %v9435_v46 }
 0x434   :  { %3973 = vmatpush1.bf16.msra.mxu0 %v9430_v47  ;;  %4016 = vmatpush1.bf16.msra.mxu1 %v9433_v49 }
 0x435   :  { %3974 = vmatprep.subr.bf16.mxu0 %v9438_v50  ;;  %4017 = vmatprep.subr.bf16.mxu1 %v9441_v32 }
 0x438   :  { %3975 = vmatpush1.bf16.msra.mxu0 %v9436_v52  ;;  %4018 = vmatpush1.bf16.msra.mxu1 %v9439_v53 }
 0x439   :  { %3976 = vmatprep.subr.bf16.mxu0 %v9444_v54  ;;  %4019 = vmatprep.subr.bf16.mxu1 %v9447_v55 }
 0x43c   :  { %3977 = vmatpush1.bf16.msra.mxu0 %v9442_v63  ;;  %4020 = vmatpush1.bf16.msra.mxu1 %v9445_v56 }
 0x43d   :  { %3978 = vmatprep.subr.bf16.mxu0 %v9450_v57  ;;  %4021 = vmatprep.subr.bf16.mxu1 %v9453_v58 }
 0x440   :  { %3979 = vmatpush1.bf16.msra.mxu0 %v9448_v59  ;;  %4022 = vmatpush1.bf16.msra.mxu1 %v9451_v60 }
 0x441   :  { %3980 = vmatprep.subr.bf16.mxu0 %v9456_v62  ;;  %4023 = vmatprep.subr.bf16.mxu1 %v9459_v0  ;;  %v9508_v62 = vld [vmem:[#allocation9 + $0x8e0] ss:$16 sps:$4 sm:$0xff]  }
 0x444   :  { %3981 = vmatpush1.bf16.msra.mxu0 %v9454_v2  ;;  %4024 = vmatpush1.bf16.msra.mxu1 %v9457_v3 }
 0x445   :  { %3982 = vmatprep.subr.bf16.mxu0 %v9462_v5  ;;  %4025 = vmatprep.subr.bf16.mxu1 %v9465_v7  ;;  %v9511_v7 = vld [vmem:[#allocation9 + $0x8e8] ss:$16 sps:$4 sm:$0xff]  }
 0x448   :  { %3983 = vmatpush1.bf16.msra.mxu0 %v9460_v4  ;;  %4026 = vmatpush1.bf16.msra.mxu1 %v9463_v8 }
 0x449   :  { %4261 = vmatprep.subr.bf16.mxu0 %v9468_v6  ;;  %4304 = vmatprep.subr.bf16.mxu1 %v9471_v9 }
 0x44b   :  { %4001 = vmatmul.mubr.bf16.vlgmr.msra.gmra.mrb[36].mxu0 %v3806_v17  ;;  %4044 = vmatmul.mubr.bf16.vlgmr.msra.gmra.mrb[36].mxu1 %v3806_v17 }
 0x44c   :  { %4262 = vmatpush1.bf16.msra.mxu0 %v9466_v12  ;;  %4305 = vmatpush1.bf16.msra.mxu1 %v9469_v14 }
 0x44d   :  { %4263 = vmatprep.subr.bf16.mxu0 %v9474_v15  ;;  %4306 = vmatprep.subr.bf16.mxu1 %v9477_v16 }
 0x44e   :  { %4293 = vmatprep.mubr.bf16.mxu0 %v10104_v13  ;;  %4336 = vmatprep.mubr.bf16.mxu1 %v10104_v13 }
 0x450   :  { %4264 = vmatpush1.bf16.msra.mxu0 %v9472_v18  ;;  %4307 = vmatpush1.bf16.msra.mxu1 %v9475_v19 }
 0x451   :  { %4265 = vmatprep.subr.bf16.mxu0 %v9480_v20  ;;  %4308 = vmatprep.subr.bf16.mxu1 %v9483_v21 }
 0x454   :  { %4266 = vmatpush1.bf16.msra.mxu0 %v9478_v48  ;;  %4309 = vmatpush1.bf16.msra.mxu1 %v9481_v22 }
 0x455   :  { %v1643_v11 = vpop.permute.xlu1 %1642  ;;  %4267 = vmatprep.subr.bf16.mxu0 %v9486_v24  ;;  %4310 = vmatprep.subr.bf16.mxu1 %v9489_v25  ;;  %v4099_v24 = vsel %vm2270_vm0, %v10497_v23, %v10499_v26 }
 0x456   :  { %1652 = vst.msk [vmem:[#allocation3 + $0x20] sm:$0xf8] %vm1651_vm3, %v1643_v11 }
 0x457   :  { %1654 = vst.msk [vmem:[#allocation3 + $0x28] sm:$0xf8] %vm1653_vm4, %v1643_v11 }
 0x458   :  { %4268 = vmatpush1.bf16.msra.mxu0 %v9484_v51  ;;  %4311 = vmatpush1.bf16.msra.mxu1 %v9487_v28  ;;  %v1645_v31 = vpop.permute.xlu0 %1644 }
 0x459   :  { %1655 = vst.msk [vmem:[#allocation3 + $0x30] sm:$0xff] %vm895_vm9, %v1645_v31  ;;  %v1647_v35 = vpop.permute.xlu1 %1646  ;;  %4269 = vmatprep.subr.bf16.mxu0 %v9492_v29  ;;  %4312 = vmatprep.subr.bf16.mxu1 %v9495_v30  ;;  %vm4607_vm9 = vcmask 15360  }
 0x45a   :  { %1656 = vst.msk [vmem:[#allocation3 + $0x38] sm:$0xff] %vm897_vm10, %v1645_v31  ;;  %vm4619_vm10 = vcmask 8192  }
 0x45b   :  { %1658 = vst.msk [vmem:[#allocation3 + $0x40] sm:$0x7] %vm1657_vm5, %v1647_v35 }
 0x45c   :  { %1660 = vst.msk [vmem:[#allocation3 + $0x48] sm:$0x7] %vm1659_vm6, %v1647_v35  ;;  %4270 = vmatpush1.bf16.msra.mxu0 %v9490_v33  ;;  %4313 = vmatpush1.bf16.msra.mxu1 %v9493_v34 }
 0x45d   :  { %4271 = vmatprep.subr.bf16.mxu0 %v9498_v36  ;;  %4314 = vmatprep.subr.bf16.mxu1 %v9501_v37  ;;  %v4621_v45 = vld [vmem:[#allocation3 + $0x20] sm:$0xfc] }
 0x45e   :  { %v4658_v44 = vld [vmem:[#allocation3 + $0x28] sm:$0xfc]  ;;  %v5805_v50 = vld [vmem:[#allocation3 + $0x20] sm:$0xf8] }
 0x45f   :  { %v5806_v46 = vld [vmem:[#allocation3 + $0x28] sm:$0xf8]  ;;  %v5496_v35 = vld [vmem:[#allocation3 + $0x20] sm:$0xf8] }
 0x460   :  { %4272 = vmatpush1.bf16.msra.mxu0 %v9496_v38  ;;  %4315 = vmatpush1.bf16.msra.mxu1 %v9499_v39  ;;  %v10505_v49 = vld [vmem:[#allocation3 + $0x30] sm:$0xff]  ;;  %v6729_v28 = vld [vmem:[#allocation3 + $0x28] sm:$0xf0]  ;;  %v6728_v38 = vld [vmem:[#allocation3 + $0x20] sm:$0xf0] }
 0x461   :  { %v10503_v47 = vld [vmem:[#allocation3 + $0x38] sm:$0xff]  ;;  %4273 = vmatprep.subr.bf16.mxu0 %v9504_v40  ;;  %4316 = vmatprep.subr.bf16.mxu1 %v9507_v41  ;;  %v4624_v54 = vpack.c.bf16 %v10505_v49, %v4621_v45  ;;  %v5809_v60 = vpack.c.bf16 %v10505_v49, %v5805_v50  ;;  %v5498_v23 = vpack.c.bf16 %v10505_v49, %v5496_v35 }
 0x462   :  { %v4661_v52 = vpack.c.bf16 %v10503_v47, %v4658_v44  ;;  %v4623_v53 = vld [vmem:[#allocation3 + $0x40] sm:$0x3]  ;;  %v5810_v63 = vpack.c.bf16 %v10503_v47, %v5806_v46  ;;  %v6733_v33 = vpack.c.bf16 %v10503_v47, %v6729_v28  ;;  %v6732_v40 = vpack.c.bf16 %v10505_v49, %v6728_v38  ;;  %v4397_v35 = vld [vmem:[%s11009_s5 + $0x20] sm:$0xff] }
 0x463   :  { %v4660_v32 = vld [vmem:[#allocation3 + $0x48] sm:$0x3]  ;;  %v4625_v57 = vpack.c.bf16 %v4623_v53, %v4623_v53  ;;  %v5807_v59 = vld [vmem:[#allocation3 + $0x40] sm:$0x7]  ;;  %v4699_v2 = vrot.slane %v4624_v54, 1  ;;  %v5846_v14 = vshrl.u32 %v5809_v60, 16 }
 0x464   :  { %v5808_v55 = vld [vmem:[#allocation3 + $0x48] sm:$0x7]  ;;  %v4662_v56 = vpack.c.bf16 %v4660_v32, %v4660_v32  ;;  %v4702_v0 = vrot.slane %v4661_v52, 1  ;;  %v5863_v3 = vshrl.u32 %v5810_v63, 16  ;;  %v5866_v5 = vshll.u32 %v5810_v63, 16  ;;  %4274 = vmatpush1.bf16.msra.mxu0 %v9502_v42  ;;  %4317 = vmatpush1.bf16.msra.mxu1 %v9505_v43  ;;  %v4409_v52 = vld [vmem:[%s11009_s5 + $0x80] sm:$0xff] }
 0x465   :  { %v5812_v58 = vpack.c.bf16 %v5808_v55, %v5808_v55  ;;  %v4700_v8 = vrot.slane %v4625_v57, 1  ;;  %4275 = vmatprep.subr.bf16.mxu0 %v9510_v27  ;;  %4318 = vmatprep.subr.bf16.mxu1 %v9513_v61  ;;  %v5811_v12 = vpack.c.bf16 %v5807_v59, %v5807_v59  ;;  %v5848_v19 = vrot.slane %v5846_v14, 1  ;;  %v10518_v22 = vld [vmem:[#allocation3 + $0x48] sm:$0xf]  ;;  %v5497_v11 = vld [vmem:[#allocation3 + $0x40] sm:$0x7] }
 0x466   :  { %v4703_v4 = vrot.slane %v4662_v56, 1  ;;  %v5865_v1 = vrot.slane %v5863_v3, 1  ;;  %v5868_v10 = vrot.slane %v5866_v5, 2  ;;  %v5849_v20 = vshll.u32 %v5809_v60, 16  ;;  %v6730_v34 = vld [vmem:[#allocation3 + $0x40] sm:$0xf] }
 0x467   :  { %v5871_v6 = vshrl.u32 %v5812_v58, 16  ;;  %v5874_v9 = vshll.u32 %v5812_v58, 16  ;;  %v10513_v16 = vsel %vm3492_vm15, %v4699_v2, %v4700_v8  ;;  %v5854_v21 = vshrl.u32 %v5811_v12, 16  ;;  %v6432_v26 = vld [vmem:[#allocation3 + $0x40] sm:$0xf]  ;;  %v4441_v54 = vld [vmem:[%s11009_s5 + $0x180] sm:$0xff] }
 0x468   :  { %v4704_v15 = vsel %vm3492_vm15, %v4702_v0, %v4703_v4  ;;  %4705 = vrot.lane.b32.xlu0 %v10513_v16, %s10101_s20  ;;  %4276 = vmatpush1.bf16.msra.mxu0 %v9508_v62  ;;  %v5857_v48 = vshll.u32 %v5811_v12, 16  ;;  %v5851_v25 = vrot.slane %v5849_v20, 2  ;;  %v5869_v29 = vor.u32 %v5868_v10, %v5865_v1  ;;  %v6431_v42 = vld [vmem:[#allocation3 + $0x20] sm:$0xf0]  ;;  %v4393_v58 = vld [vmem:[%s11009_s5] sm:$0xff]  ;;  %v4412_v1 = vld [vmem:[%s11009_s5 + $0x98] sm:$0xff] }
 0x469   :  { %v5873_v17 = vrot.slane %v5871_v6, 1  ;;  %v5876_v18 = vrot.slane %v5874_v9, 2  ;;  %4707 = vrot.lane.b32.xlu1 %v4704_v15, %s10101_s20  ;;  %4319 = vmatpush1.bf16.msra.mxu1 %v9511_v7  ;;  %v5856_v51 = vrot.slane %v5854_v21, 1  ;;  %v6735_v37 = vpack.c.bf16 %v10518_v22, %v10518_v22  ;;  %v4410_v53 = vld [vmem:[%s11009_s5 + $0x88] sm:$0xff]  ;;  %v4425_v5 = vld [vmem:[%s11009_s5 + $0x100] sm:$0xff]  ;;  %v4411_v9 = vld [vmem:[%s11009_s5 + $0x90] sm:$0xff] }
 0x46a   :  { %v5859_v31 = vrot.slane %v5857_v48, 2  ;;  %v5852_v36 = vor.u32 %v5851_v25, %v5848_v19  ;;  %v5499_v41 = vpack.c.bf16 %v5497_v11, %v5497_v11  ;;  %v6734_v43 = vpack.c.bf16 %v6730_v34, %v6730_v34  ;;  %v4442_v57 = vld [vmem:[%s11009_s5 + $0x188] sm:$0xff]  ;;  %v4443_v10 = vld [vmem:[%s11009_s5 + $0x190] sm:$0xff]  ;;  %v4444_v20 = vld [vmem:[%s11009_s5 + $0x198] sm:$0xff] }
 0x46b   :  { %v5877_v30 = vor.u32 %v5876_v18, %v5873_v17  ;;  %4294 = vmatmul.mubr.bf16.vlgmr.msra.gmra.mrb[36].mxu0 %v4099_v24  ;;  %v5534_v27 = vshrl.u32 %v5498_v23, 16  ;;  %v5537_v61 = vshll.u32 %v5498_v23, 16  ;;  %v6433_v44 = vpack.c.bf16 %v10505_v49, %v6431_v42  ;;  %v4394_v3 = vld [vmem:[%s11009_s5 + $0x8] sm:$0xff]  ;;  %v4395_v21 = vld [vmem:[%s11009_s5 + $0x10] sm:$0xff]  ;;  %v4396_v48 = vld [vmem:[%s11009_s5 + $0x18] sm:$0xff] }
 0x46c   :  { %4337 = vmatmul.mubr.bf16.vlgmr.msra.gmra.mrb[36].mxu1 %v4099_v24  ;;  %5236 = vrot.lane.b32.xlu0 %v10513_v16, %s10103_s27  ;;  %v5860_v39 = vor.u32 %v5859_v31, %v5856_v51  ;;  %v5542_v46 = vshrl.u32 %v5499_v41, 16  ;;  %v5545_v47 = vshll.u32 %v5499_v41, 16  ;;  %v6434_v50 = vpack.c.bf16 %v6432_v26, %v6432_v26  ;;  %v4426_v7 = vld [vmem:[%s11009_s5 + $0x108] sm:$0xff]  ;;  %v4427_v24 = vld [vmem:[%s11009_s5 + $0x110] sm:$0xff]  ;;  %v4428_v25 = vld [vmem:[%s11009_s5 + $0x118] sm:$0xff] }
 0x46d   :  { %5238 = vrot.lane.b32.xlu1 %v4704_v15, %s10103_s27  ;;  %v5878_v45 = vsel %vm5532_vm7, %v5869_v29, %v5877_v30  ;;  %v5536_v49 = vrot.slane %v5534_v27, 1  ;;  %v5539_v55 = vrot.slane %v5537_v61, 2  ;;  %v6470_v63 = vrot.slane %v6433_v44, 2  ;;  %v4413_v29 = vld [vmem:[%s11009_s5 + $0xa0] sm:$0xff]  ;;  %v4414_v30 = vld [vmem:[%s11009_s5 + $0xa8] sm:$0xff]  ;;  %v4416_v41 = vld [vmem:[%s11009_s5 + $0xb8] sm:$0xff] }
 0x46e   :  { %v5861_v32 = vsel %vm5532_vm7, %v5852_v36, %v5860_v39  ;;  %v8737_v56 = vpack.c.bf16 %v4410_v53, %v4409_v52  ;;  %v5544_v59 = vrot.slane %v5542_v46, 1  ;;  %v5547_v60 = vrot.slane %v5545_v47, 2  ;;  %v4445_v31 = vld [vmem:[%s11009_s5 + $0x1a0] sm:$0xff]  ;;  %v4446_v34 = vld [vmem:[%s11009_s5 + $0x1a8] sm:$0xff]  ;;  %v4447_v42 = vld [vmem:[%s11009_s5 + $0x1b0] sm:$0xff] }
 0x46f   :  { %v6471_v62 = vrot.slane %v6434_v50, 2  ;;  %v6775_v0 = vrot.slane %v6733_v33, 2  ;;  %v8769_v2 = vpack.c.bf16 %v4442_v57, %v4441_v54  ;;  %v5540_v4 = vor.u32 %v5539_v55, %v5536_v49  ;;  %v4398_v36 = vld [vmem:[%s11009_s5 + $0x28] sm:$0xff]  ;;  %v4429_v26 = vld [vmem:[%s11009_s5 + $0x120] sm:$0xff]  ;;  %v4448_v61 = vld [vmem:[%s11009_s5 + $0x1b8] sm:$0xff] }
 0x470   :  { %5879 = vrot.lane.b32.xlu0 %v5861_v32, %s10101_s20  ;;  %8738 = vmatprep.subr.bf16.mxu0 %v8737_v56  ;;  %v8739_v8 = vpack.c.bf16 %v4394_v3, %v4393_v58  ;;  %v8771_v6 = vpack.c.bf16 %v4426_v7, %v4425_v5  ;;  %v5548_v12 = vor.u32 %v5547_v60, %v5544_v59  ;;  %v6776_v15 = vrot.slane %v6735_v37, 2  ;;  %v4430_v39 = vld [vmem:[%s11009_s5 + $0x128] sm:$0xff]  ;;  %v4399_v44 = vld [vmem:[%s11009_s5 + $0x30] sm:$0xff]  ;;  %v4417_v52 = vld [vmem:[%s11009_s5 + $0xc0] sm:$0xff] }
 0x471   :  { %5881 = vrot.lane.b32.xlu1 %v5878_v45, %s10101_s20  ;;  %v10570_v14 = vsel %vm6469_vm8, %v6470_v63, %v6471_v62  ;;  %v6772_v17 = vrot.slane %v6732_v40, 2  ;;  %v6773_v18 = vrot.slane %v6734_v43, 2  ;;  %8770 = vmatprep.subr.bf16.mxu1 %v8769_v2  ;;  %v8741_v19 = vpack.c.bf16 %v4412_v1, %v4411_v9  ;;  %v4415_v40 = vld [vmem:[%s11009_s5 + $0xb0] sm:$0xff]  ;;  %v4418_v53 = vld [vmem:[%s11009_s5 + $0xc8] sm:$0xff]  ;;  %v4449_v54 = vld [vmem:[%s11009_s5 + $0x1c0] sm:$0xff] }
 0x472   :  { %v8773_v22 = vpack.c.bf16 %v4444_v20, %v4443_v10  ;;  %v10590_v51 = vsel %vm5532_vm7, %v5540_v4, %v5548_v12  ;;  %8740 = vmatpush3.bf16.msra.mxu0 %v8739_v8  ;;  %8772 = vmatpush3.bf16.msra.mxu1 %v8771_v6  ;;  %v8743_v28 = vpack.c.bf16 %v4396_v48, %v4395_v21  ;;  %v4431_v50 = vld [vmem:[%s11009_s5 + $0x130] sm:$0xff]  ;;  %v4450_v49 = vld [vmem:[%s11009_s5 + $0x1c8] sm:$0xff]  ;;  %v4401_v56 = vld [vmem:[%s11009_s5 + $0x40] sm:$0xff] }
 0x473   :  { %v8775_v11 = vpack.c.bf16 %v4428_v25, %v4427_v24  ;;  %8742 = vmatprep.subr.bf16.mxu0 %v8741_v19  ;;  %v8745_v33 = vpack.c.bf16 %v4414_v30, %v4413_v29  ;;  %v6777_v37 = vsel %vm6469_vm8, %v6775_v0, %v6776_v15  ;;  %v6774_v38 = vsel %vm6469_vm8, %v6772_v17, %v6773_v18  ;;  %v4402_v57 = vld [vmem:[%s11009_s5 + $0x48] sm:$0xff]  ;;  %v4433_v60 = vld [vmem:[%s11009_s5 + $0x140] sm:$0xff]  ;;  %v4419_v0 = vld [vmem:[%s11009_s5 + $0xd0] sm:$0xff] }
 0x474   :  { %6171 = vrot.lane.b32.xlu0 %v5861_v32, %s10103_s27  ;;  %8774 = vmatprep.subr.bf16.mxu1 %v8773_v22  ;;  %v8777_v23 = vpack.c.bf16 %v4446_v34, %v4445_v31  ;;  %v8747_v43 = vpack.c.bf16 %v4398_v36, %v4397_v35  ;;  %v8779_v27 = vpack.c.bf16 %v4430_v39, %v4429_v26  ;;  %v4432_v32 = vld [vmem:[%s11009_s5 + $0x138] sm:$0xff]  ;;  %v4434_v62 = vld [vmem:[%s11009_s5 + $0x148] sm:$0xff]  ;;  %v4451_v3 = vld [vmem:[%s11009_s5 + $0x1d0] sm:$0xff] }
 0x475   :  { %6173 = vrot.lane.b32.xlu1 %v5878_v45, %s10103_s27  ;;  %v4400_v45 = vld [vmem:[%s11009_s5 + $0x38] sm:$0xff]  ;;  %v8749_v46 = vpack.c.bf16 %v4416_v41, %v4415_v40  ;;  %v8781_v47 = vpack.c.bf16 %v4448_v61, %v4447_v42  ;;  %v8783_v63 = vpack.c.bf16 %v4432_v32, %v4431_v50  ;;  %v8753_v58 = vpack.c.bf16 %v4418_v53, %v4417_v52  ;;  %v4403_v8 = vld [vmem:[%s11009_s5 + $0x50] sm:$0xff]  ;;  %v4421_v15 = vld [vmem:[%s11009_s5 + $0xe0] sm:$0xff] }
 0x476   :  { %8744 = vmatpush3.bf16.msra.mxu0 %v8743_v28  ;;  %8776 = vmatpush3.bf16.msra.mxu1 %v8775_v11  ;;  %v8751_v55 = vpack.c.bf16 %v4400_v45, %v4399_v44  ;;  %v8785_v59 = vpack.c.bf16 %v4450_v49, %v4449_v54  ;;  %v4420_v2 = vld [vmem:[%s11009_s5 + $0xd8] sm:$0xff]  ;;  %v8755_v7 = vpack.c.bf16 %v4402_v57, %v4401_v56  ;;  %v4435_v10 = vld [vmem:[%s11009_s5 + $0x150] sm:$0xff]  ;;  %v4422_v17 = vld [vmem:[%s11009_s5 + $0xe8] sm:$0xff] }
 0x477   :  { %8746 = vmatprep.subr.bf16.mxu0 %v8745_v33  ;;  %8778 = vmatprep.subr.bf16.mxu1 %v8777_v23  ;;  %v4452_v5 = vld [vmem:[%s11009_s5 + $0x1d8] sm:$0xff]  ;;  %v8787_v4 = vpack.c.bf16 %v4434_v62, %v4433_v60  ;;  %v8757_v9 = vpack.c.bf16 %v4420_v2, %v4419_v0  ;;  %v4453_v18 = vld [vmem:[%s11009_s5 + $0x1e0] sm:$0xff]  ;;  %v4454_v19 = vld [vmem:[%s11009_s5 + $0x1e8] sm:$0xff]  ;;  %v8761_v22 = vpack.c.bf16 %v4422_v17, %v4421_v15 }
 0x478   :  { %6778 = vrot.lane.b32.xlu0 %v6774_v38, %s10101_s20  ;;  %v4404_v6 = vld [vmem:[%s11009_s5 + $0x58] sm:$0xff]  ;;  %v8789_v1 = vpack.c.bf16 %v4452_v5, %v4451_v3  ;;  %v4405_v48 = vld [vmem:[%s11009_s5 + $0x60] sm:$0xff]  ;;  %v8793_v24 = vpack.c.bf16 %v4454_v19, %v4453_v18  ;;  %v4406_v25 = vld [vmem:[%s11009_s5 + $0x68] sm:$0xff] }
 0x479   :  { %6780 = vrot.lane.b32.xlu1 %v6777_v37, %s10101_s20  ;;  %v4436_v12 = vld [vmem:[%s11009_s5 + $0x158] sm:$0xff]  ;;  %v8759_v20 = vpack.c.bf16 %v4404_v6, %v4403_v8  ;;  %v4437_v28 = vld [vmem:[%s11009_s5 + $0x160] sm:$0xff]  ;;  %v4438_v11 = vld [vmem:[%s11009_s5 + $0x168] sm:$0xff]  ;;  %v8763_v29 = vpack.c.bf16 %v4406_v25, %v4405_v48 }
 0x47a   :  { %8748 = vmatpush3.bf16.msra.mxu0 %v8747_v43  ;;  %8780 = vmatpush3.bf16.msra.mxu1 %v8779_v27  ;;  %v8791_v21 = vpack.c.bf16 %v4436_v12, %v4435_v10  ;;  %v8795_v30 = vpack.c.bf16 %v4438_v11, %v4437_v28  ;;  %v4423_v31 = vld [vmem:[%s11009_s5 + $0xf0] sm:$0xff]  ;;  %v4424_v33 = vld [vmem:[%s11009_s5 + $0xf8] sm:$0xff]  ;;  %v4357_v27 = vlaneseq }
 0x47b   :  { %8750 = vmatprep.subr.bf16.mxu0 %v8749_v46  ;;  %8782 = vmatprep.subr.bf16.mxu1 %v8781_v47  ;;  %v4455_v34 = vld [vmem:[%s11009_s5 + $0x1f0] sm:$0xff]  ;;  %v4456_v35 = vld [vmem:[%s11009_s5 + $0x1f8] sm:$0xff] }
 0x47c   :  { %7070 = vrot.lane.b32.xlu0 %v6774_v38, %s10103_s27  ;;  %v4407_v36 = vld [vmem:[%s11009_s5 + $0x70] sm:$0xff]  ;;  %v8765_v38 = vpack.c.bf16 %v4424_v33, %v4423_v31  ;;  %v8797_v23 = vpack.c.bf16 %v4456_v35, %v4455_v34  ;;  %v4440_v40 = vld [vmem:[%s11009_s5 + $0x178] sm:$0xff]  ;;  %v10742_v61 = vshrl.u32 %v4357_v27, 7 }
 0x47d   :  { %7072 = vrot.lane.b32.xlu1 %v6777_v37, %s10103_s27  ;;  %v4408_v37 = vld [vmem:[%s11009_s5 + $0x78] sm:$0xff]  ;;  %v4439_v39 = vld [vmem:[%s11009_s5 + $0x170] sm:$0xff] }
 0x47e   :  { %8752 = vmatpush3.bf16.msra.mxu0 %v8751_v55  ;;  %8784 = vmatpush3.bf16.msra.mxu1 %v8783_v63  ;;  %v8767_v26 = vpack.c.bf16 %v4408_v37, %v4407_v36  ;;  %v8799_v41 = vpack.c.bf16 %v4440_v40, %v4439_v39  ;;  %v9516_v42 = vld [vmem:[#allocation9 + $0x104] ss:$16 sps:$4 sm:$0xff]   ;;  %v9519_v43 = vld [vmem:[#allocation9 + $0x10c] ss:$16 sps:$4 sm:$0xff]   ;;  %v4359_v44 = vsub.s32 0, %v10742_v61  ;;  %v4367_v45 = vsub.s32 2, %v10742_v61 }
 0x47f   :  { %8754 = vmatprep.subr.bf16.mxu0 %v8753_v58  ;;  %8786 = vmatprep.subr.bf16.mxu1 %v8785_v59  ;;  %v4355_v46 = vld [vmem:[#allocation10] sm:$0xf]  ;;  %v4363_v47 = vsub.s32 1, %v10742_v61  ;;  %v4371_v50 = vsub.s32 3, %v10742_v61  ;;  %v9522_v19 = vld [vmem:[#allocation9 + $0x124] ss:$16 sps:$4 sm:$0xff]  }
 0x480   :  { %v4360_v32 = vrot.slane %v4355_v46, %v4359_v44  ;;  %v4368_v52 = vrot.slane %v4355_v46, %v4367_v45  ;;  %v9514_v6 = vld [vmem:[#allocation9 + $0x100] ss:$16 sps:$4 sm:$0xff]   ;;  %v9523_v48 = vld [vmem:[#allocation9 + $0x128] ss:$16 sps:$4 sm:$0xff]   ;;  %v9528_v25 = vld [vmem:[#allocation9 + $0x144] ss:$16 sps:$4 sm:$0xff]  }
 0x481   :  { %v4364_v53 = vrot.slane %v4355_v46, %v4363_v47  ;;  %v4372_v54 = vrot.slane %v4355_v46, %v4371_v50  ;;  %v9531_v28 = vld [vmem:[#allocation9 + $0x14c] ss:$16 sps:$4 sm:$0xff]   ;;  %v9526_v11 = vld [vmem:[#allocation9 + $0x140] ss:$16 sps:$4 sm:$0xff]   ;;  %v9535_v34 = vld [vmem:[#allocation9 + $0x168] ss:$16 sps:$4 sm:$0xff]  }
 0x482   :  { %8756 = vmatpush3.bf16.msra.mxu0 %v8755_v7  ;;  %8788 = vmatpush3.bf16.msra.mxu1 %v8787_v4  ;;  %v9537_v31 = vld [vmem:[#allocation9 + $0x16c] ss:$16 sps:$4 sm:$0xff]   ;;  %v9532_v33 = vld [vmem:[#allocation9 + $0x160] ss:$16 sps:$4 sm:$0xff]   ;;  %v9540_v35 = vld [vmem:[#allocation9 + $0x184] ss:$16 sps:$4 sm:$0xff]  }
 0x483   :  { %8758 = vmatprep.subr.bf16.mxu0 %v8757_v9  ;;  %8790 = vmatprep.subr.bf16.mxu1 %v8789_v1  ;;  %v9517_v9 = vld [vmem:[#allocation9 + $0x108] ss:$16 sps:$4 sm:$0xff]   ;;  %v9543_v36 = vld [vmem:[#allocation9 + $0x18c] ss:$16 sps:$4 sm:$0xff]   ;;  %v9538_v37 = vld [vmem:[#allocation9 + $0x180] ss:$16 sps:$4 sm:$0xff]  }
 0x484   :  { %v9544_v39 = vld [vmem:[#allocation9 + $0x1a0] ss:$16 sps:$4 sm:$0xff]   ;;  %v9547_v40 = vld [vmem:[#allocation9 + $0x1a8] ss:$16 sps:$4 sm:$0xff]   ;;  %v9558_v46 = vld [vmem:[#allocation9 + $0x1e4] ss:$16 sps:$4 sm:$0xff]  }
 0x485   :  { %v9553_v27 = vld [vmem:[#allocation9 + $0x1c8] ss:$16 sps:$4 sm:$0xff]  }
 0x486   :  { %8760 = vmatpush3.bf16.msra.mxu0 %v8759_v20  ;;  %8792 = vmatpush3.bf16.msra.mxu1 %v8791_v21  ;;  %v9525_v20 = vld [vmem:[#allocation9 + $0x12c] ss:$16 sps:$4 sm:$0xff]   ;;  %v9520_v21 = vld [vmem:[#allocation9 + $0x120] ss:$16 sps:$4 sm:$0xff]  }
 0x487   :  { %8762 = vmatprep.subr.bf16.mxu0 %v8761_v22  ;;  %8794 = vmatprep.subr.bf16.mxu1 %v8793_v24 }
 0x48a   :  { %8764 = vmatpush3.bf16.msra.mxu0 %v8763_v29  ;;  %8796 = vmatpush3.bf16.msra.mxu1 %v8795_v30  ;;  %v9529_v29 = vld [vmem:[#allocation9 + $0x148] ss:$16 sps:$4 sm:$0xff]   ;;  %v9534_v30 = vld [vmem:[#allocation9 + $0x164] ss:$16 sps:$4 sm:$0xff]  }
 0x48b   :  { %8766 = vmatprep.subr.bf16.mxu0 %v8765_v38  ;;  %8798 = vmatprep.subr.bf16.mxu1 %v8797_v23  ;;  %v9541_v38 = vld [vmem:[#allocation9 + $0x188] ss:$16 sps:$4 sm:$0xff]   ;;  %v9546_v23 = vld [vmem:[#allocation9 + $0x1a4] ss:$16 sps:$4 sm:$0xff]  }
 0x48e   :  { %8768 = vmatpush3.bf16.msra.mxu0 %v8767_v26  ;;  %8800 = vmatpush3.bf16.msra.mxu1 %v8799_v41  ;;  %v9549_v26 = vld [vmem:[#allocation9 + $0x1ac] ss:$16 sps:$4 sm:$0xff]   ;;  %v9552_v41 = vld [vmem:[#allocation9 + $0x1c4] ss:$16 sps:$4 sm:$0xff]  }
 0x48f   :  { %4871 = vmatprep.subr.bf16.mxu0 %v9516_v42  ;;  %4914 = vmatprep.subr.bf16.mxu1 %v9519_v43  ;;  %v9555_v42 = vld [vmem:[#allocation9 + $0x1cc] ss:$16 sps:$4 sm:$0xff]   ;;  %v9550_v43 = vld [vmem:[#allocation9 + $0x1c0] ss:$16 sps:$4 sm:$0xff]  }
 0x53e   :  { %v4295_v49 = vpop.f32.mrb[36].mxu0 }
 0x53f   :  { %v4338_v55 = vpop.f32.mrb[36].mxu1  ;;  %v4377_v63 = vadd.f32 %v4360_v32, %v4295_v49  ;;  %v4297_v57 = vpop.f32.mrb[37].mxu0  ;;  %v9567_v49 = vld [vmem:[#allocation9 + $0xc] ss:$16 sps:$4 sm:$0xff]  }
 0x540   :  { %v4379_v56 = vadd.f32 %v4368_v52, %v4338_v55  ;;  %v4340_v58 = vpop.f32.mrb[37].mxu1  ;;  %v4378_v59 = vadd.f32 %v4364_v53, %v4297_v57  ;;  %v4299_v62 = vpop.f32.mrb[38].mxu0  ;;  %v9565_v57 = vld [vmem:[#allocation9 + $0x8] ss:$16 sps:$4 sm:$0xff]  }
 0x541   :  { %v4380_v60 = vadd.f32 %v4372_v54, %v4340_v58  ;;  %v4342_v0 = vpop.f32.mrb[38].mxu1  ;;  %v4301_v2 = vpop.f32.mrb[39].mxu0  ;;  %v4385_v1 = vmax.f32 %v4377_v63, 0.0  ;;  %v4381_v12 = vadd.f32 %v4360_v32, %v4299_v62  ;;  %v9561_v32 = vld [vmem:[#allocation9 + $0x1ec] ss:$16 sps:$4 sm:$0xff]  }
 0x542   :  { %v4344_v3 = vpop.f32.mrb[39].mxu1  ;;  %v4386_v5 = vmax.f32 %v4378_v59, 0.0  ;;  %v4382_v4 = vadd.f32 %v4364_v53, %v4301_v2  ;;  %v4387_v10 = vmax.f32 %v4379_v56, 0.0  ;;  %v4383_v15 = vadd.f32 %v4368_v52, %v4342_v0  ;;  %v9556_v52 = vld [vmem:[#allocation9 + $0x1e0] ss:$16 sps:$4 sm:$0xff]   ;;  %v4708_v55 = vpop.permute.xlu1 %4707 }
 0x543   :  { %v4388_v7 = vmax.f32 %v4380_v60, 0.0  ;;  %v4384_v8 = vadd.f32 %v4372_v54, %v4344_v3  ;;  %v4389_v22 = vmax.f32 %v4381_v12, 0.0  ;;  %v9559_v53 = vld [vmem:[#allocation9 + $0x1e8] ss:$16 sps:$4 sm:$0xff]   ;;  %v9564_v54 = vld [vmem:[#allocation9 + $0x4] ss:$16 sps:$4 sm:$0xff]   ;;  %v4706_v63 = vpop.permute.xlu0 %4705 }
 0x544   :  { %v4390_v17 = vmax.f32 %v4382_v4, 0.0  ;;  %4521 = vmatprep.mubr.f32.mxu0 %v4386_v5  ;;  %v4391_v24 = vmax.f32 %v4383_v15, 0.0  ;;  %v9562_v56 = vld [vmem:[#allocation9] ss:$16 sps:$4 sm:$0xff]   ;;  %v9570_v58 = vld [vmem:[#allocation9 + $0x24] ss:$16 sps:$4 sm:$0xff]   ;;  %v4709_v60 = vsel %vm1738_vm11, %v4706_v63, %v4708_v55 }
 0x545   :  { %v4392_v18 = vmax.f32 %v4384_v8, 0.0  ;;  %4596 = vmatprep.mubr.f32.mxu1 %v4388_v7  ;;  %4522 = vmatmul.mubr.f32.vlgmr.msra.gmra.mrb[40].mxu0 %v4385_v1  ;;  %v9573_v59 = vld [vmem:[#allocation9 + $0x2c] ss:$16 sps:$4 sm:$0xff]   ;;  %v9568_v62 = vld [vmem:[#allocation9 + $0x20] ss:$16 sps:$4 sm:$0xff]  }
 0x546   :  { %4597 = vmatmul.mubr.f32.vlgmr.msra.gmra.mrb[40].mxu1 %v4387_v10  ;;  %4872 = vmatpush1.bf16.msra.mxu0 %v9514_v6  ;;  %v9571_v0 = vld [vmem:[#allocation9 + $0x28] ss:$16 sps:$4 sm:$0xff]   ;;  %v9576_v2 = vld [vmem:[#allocation9 + $0x44] ss:$16 sps:$4 sm:$0xff]   ;;  %v9579_v3 = vld [vmem:[#allocation9 + $0x4c] ss:$16 sps:$4 sm:$0xff]  }
 0x547   :  { %4915 = vmatpush1.bf16.msra.mxu1 %v9517_v9  ;;  %4526 = vmatprep.mubr.f32.mxu0 %v4390_v17  ;;  %v9574_v5 = vld [vmem:[#allocation9 + $0x40] ss:$16 sps:$4 sm:$0xff]   ;;  %v9577_v7 = vld [vmem:[#allocation9 + $0x48] ss:$16 sps:$4 sm:$0xff]   ;;  %v9582_v4 = vld [vmem:[#allocation9 + $0x64] ss:$16 sps:$4 sm:$0xff]  }
 0x548   :  { %4601 = vmatprep.mubr.f32.mxu1 %v4392_v18  ;;  %4873 = vmatprep.subr.bf16.mxu0 %v9522_v19  ;;  %v9585_v8 = vld [vmem:[#allocation9 + $0x6c] ss:$16 sps:$4 sm:$0xff]   ;;  %v9580_v6 = vld [vmem:[#allocation9 + $0x60] ss:$16 sps:$4 sm:$0xff]   ;;  %v9583_v9 = vld [vmem:[#allocation9 + $0x68] ss:$16 sps:$4 sm:$0xff]  }
 0x549   :  { %4916 = vmatprep.subr.bf16.mxu1 %v9525_v20  ;;  %4527 = vmatmul.mubr.f32.gmra.mrb[42].mxu0 %v4389_v22  ;;  %v9588_v1 = vld [vmem:[#allocation9 + $0x84] ss:$16 sps:$4 sm:$0xff]   ;;  %v9591_v10 = vld [vmem:[#allocation9 + $0x8c] ss:$16 sps:$4 sm:$0xff]   ;;  %v9586_v12 = vld [vmem:[#allocation9 + $0x80] ss:$16 sps:$4 sm:$0xff]  }
 0x54a   :  { %4602 = vmatmul.mubr.f32.gmra.mrb[42].mxu1 %v4391_v24  ;;  %4874 = vmatpush1.bf16.msra.mxu0 %v9520_v21  ;;  %v9589_v15 = vld [vmem:[#allocation9 + $0x88] ss:$16 sps:$4 sm:$0xff]   ;;  %v9594_v17 = vld [vmem:[#allocation9 + $0xa4] ss:$16 sps:$4 sm:$0xff]   ;;  %v9597_v18 = vld [vmem:[#allocation9 + $0xac] ss:$16 sps:$4 sm:$0xff]  }
 0x54b   :  { %4917 = vmatpush1.bf16.msra.mxu1 %v9523_v48  ;;  %4875 = vmatprep.subr.bf16.mxu0 %v9528_v25  ;;  %v9592_v19 = vld [vmem:[#allocation9 + $0xa0] ss:$16 sps:$4 sm:$0xff]   ;;  %v9595_v20 = vld [vmem:[#allocation9 + $0xa8] ss:$16 sps:$4 sm:$0xff]   ;;  %v9600_v21 = vld [vmem:[#allocation9 + $0xc4] ss:$16 sps:$4 sm:$0xff]  }
 0x54c   :  { %4918 = vmatprep.subr.bf16.mxu1 %v9531_v28  ;;  %4903 = vmatprep.mubr.bf16.mxu0 %v10104_v13  ;;  %v9603_v48 = vld [vmem:[#allocation9 + $0xcc] ss:$16 sps:$4 sm:$0xff]   ;;  %v9598_v22 = vld [vmem:[#allocation9 + $0xc0] ss:$16 sps:$4 sm:$0xff]   ;;  %v9601_v24 = vld [vmem:[#allocation9 + $0xc8] ss:$16 sps:$4 sm:$0xff]  }
 0x54d   :  { %4946 = vmatprep.mubr.bf16.mxu1 %v10104_v13  ;;  %v9606_v25 = vld [vmem:[#allocation9 + $0xe4] ss:$16 sps:$4 sm:$0xff]   ;;  %v9609_v28 = vld [vmem:[#allocation9 + $0xec] ss:$16 sps:$4 sm:$0xff]   ;;  %v9643_v55 = vld [vmem:[#allocation9 + $0x2a8] ss:$16 sps:$4 sm:$0xff]  }
 0x54e   :  { %4876 = vmatpush1.bf16.msra.mxu0 %v9526_v11  ;;  %v9604_v11 = vld [vmem:[#allocation9 + $0xe0] ss:$16 sps:$4 sm:$0xff]   ;;  %v9648_v63 = vld [vmem:[#allocation9 + $0x2c4] ss:$16 sps:$4 sm:$0xff]  }
 0x54f   :  { %4919 = vmatpush1.bf16.msra.mxu1 %v9529_v29  ;;  %4877 = vmatprep.subr.bf16.mxu0 %v9534_v30  ;;  %v9607_v29 = vld [vmem:[#allocation9 + $0xe8] ss:$16 sps:$4 sm:$0xff]   ;;  %v9612_v30 = vld [vmem:[#allocation9 + $0x204] ss:$16 sps:$4 sm:$0xff]  }
 0x550   :  { %4920 = vmatprep.subr.bf16.mxu1 %v9537_v31  ;;  %v9615_v31 = vld [vmem:[#allocation9 + $0x20c] ss:$16 sps:$4 sm:$0xff]  }
 0x552   :  { %4878 = vmatpush1.bf16.msra.mxu0 %v9532_v33  ;;  %v9610_v33 = vld [vmem:[#allocation9 + $0x200] ss:$16 sps:$4 sm:$0xff]  }
 0x553   :  { %4921 = vmatpush1.bf16.msra.mxu1 %v9535_v34  ;;  %4879 = vmatprep.subr.bf16.mxu0 %v9540_v35  ;;  %v9613_v34 = vld [vmem:[#allocation9 + $0x208] ss:$16 sps:$4 sm:$0xff]   ;;  %v9618_v35 = vld [vmem:[#allocation9 + $0x224] ss:$16 sps:$4 sm:$0xff]  }
 0x554   :  { %4922 = vmatprep.subr.bf16.mxu1 %v9543_v36  ;;  %v9621_v36 = vld [vmem:[#allocation9 + $0x22c] ss:$16 sps:$4 sm:$0xff]  }
 0x556   :  { %4880 = vmatpush1.bf16.msra.mxu0 %v9538_v37  ;;  %v9616_v37 = vld [vmem:[#allocation9 + $0x220] ss:$16 sps:$4 sm:$0xff]  }
 0x557   :  { %4923 = vmatpush1.bf16.msra.mxu1 %v9541_v38  ;;  %4881 = vmatprep.subr.bf16.mxu0 %v9546_v23  ;;  %v9619_v38 = vld [vmem:[#allocation9 + $0x228] ss:$16 sps:$4 sm:$0xff]   ;;  %v9624_v23 = vld [vmem:[#allocation9 + $0x244] ss:$16 sps:$4 sm:$0xff]  }
 0x558   :  { %4924 = vmatprep.subr.bf16.mxu1 %v9549_v26  ;;  %v9627_v26 = vld [vmem:[#allocation9 + $0x24c] ss:$16 sps:$4 sm:$0xff]  }
 0x55a   :  { %4882 = vmatpush1.bf16.msra.mxu0 %v9544_v39  ;;  %v9622_v39 = vld [vmem:[#allocation9 + $0x240] ss:$16 sps:$4 sm:$0xff]  }
 0x55b   :  { %4925 = vmatpush1.bf16.msra.mxu1 %v9547_v40  ;;  %4883 = vmatprep.subr.bf16.mxu0 %v9552_v41  ;;  %v9625_v40 = vld [vmem:[#allocation9 + $0x248] ss:$16 sps:$4 sm:$0xff]   ;;  %v9630_v41 = vld [vmem:[#allocation9 + $0x264] ss:$16 sps:$4 sm:$0xff]  }
 0x55c   :  { %4926 = vmatprep.subr.bf16.mxu1 %v9555_v42  ;;  %v9628_v42 = vld [vmem:[#allocation9 + $0x260] ss:$16 sps:$4 sm:$0xff]  }
 0x55e   :  { %4884 = vmatpush1.bf16.msra.mxu0 %v9550_v43  ;;  %v9631_v43 = vld [vmem:[#allocation9 + $0x268] ss:$16 sps:$4 sm:$0xff]  }
 0x55f   :  { %4927 = vmatpush1.bf16.msra.mxu1 %v9553_v27  ;;  %4885 = vmatprep.subr.bf16.mxu0 %v9558_v46  ;;  %v9636_v27 = vld [vmem:[#allocation9 + $0x284] ss:$16 sps:$4 sm:$0xff]   ;;  %v9639_v46 = vld [vmem:[#allocation9 + $0x28c] ss:$16 sps:$4 sm:$0xff]  }
 0x560   :  { %4928 = vmatprep.subr.bf16.mxu1 %v9561_v32  ;;  %v9634_v32 = vld [vmem:[#allocation9 + $0x280] ss:$16 sps:$4 sm:$0xff]  }
 0x562   :  { %4886 = vmatpush1.bf16.msra.mxu0 %v9556_v52  ;;  %v9637_v52 = vld [vmem:[#allocation9 + $0x288] ss:$16 sps:$4 sm:$0xff]  }
 0x563   :  { %4929 = vmatpush1.bf16.msra.mxu1 %v9559_v53  ;;  %5118 = vmatprep.subr.bf16.mxu0 %v9564_v54  ;;  %v9642_v53 = vld [vmem:[#allocation9 + $0x2a4] ss:$16 sps:$4 sm:$0xff]   ;;  %v9645_v54 = vld [vmem:[#allocation9 + $0x2ac] ss:$16 sps:$4 sm:$0xff]  }
 0x564   :  { %5161 = vmatprep.subr.bf16.mxu1 %v9567_v49  ;;  %v9640_v49 = vld [vmem:[#allocation9 + $0x2a0] ss:$16 sps:$4 sm:$0xff]  }
 0x565   :  { %4904 = vmatmul.mubr.bf16.vlgmr.msra.gmra.mrb[44].mxu0 %v4709_v60 }
 0x566   :  { %4947 = vmatmul.mubr.bf16.vlgmr.msra.gmra.mrb[44].mxu1 %v4709_v60  ;;  %5119 = vmatpush1.bf16.msra.mxu0 %v9562_v56  ;;  %v9651_v56 = vld [vmem:[#allocation9 + $0x2cc] ss:$16 sps:$4 sm:$0xff]  }
 0x567   :  { %5162 = vmatpush1.bf16.msra.mxu1 %v9565_v57  ;;  %5120 = vmatprep.subr.bf16.mxu0 %v9570_v58  ;;  %v9646_v57 = vld [vmem:[#allocation9 + $0x2c0] ss:$16 sps:$4 sm:$0xff]   ;;  %v9649_v58 = vld [vmem:[#allocation9 + $0x2c8] ss:$16 sps:$4 sm:$0xff]   ;;  %v9657_v60 = vld [vmem:[#allocation9 + $0x2ec] ss:$16 sps:$4 sm:$0xff]  }
 0x568   :  { %5163 = vmatprep.subr.bf16.mxu1 %v9573_v59  ;;  %5150 = vmatprep.mubr.bf16.mxu0 %v10104_v13  ;;  %v9654_v59 = vld [vmem:[#allocation9 + $0x2e4] ss:$16 sps:$4 sm:$0xff]  }
 0x569   :  { %5193 = vmatprep.mubr.bf16.mxu1 %v10104_v13 }
 0x56a   :  { %5121 = vmatpush1.bf16.msra.mxu0 %v9568_v62  ;;  %v9652_v62 = vld [vmem:[#allocation9 + $0x2e0] ss:$16 sps:$4 sm:$0xff]  }
 0x56b   :  { %5164 = vmatpush1.bf16.msra.mxu1 %v9571_v0  ;;  %5122 = vmatprep.subr.bf16.mxu0 %v9576_v2  ;;  %v9655_v0 = vld [vmem:[#allocation9 + $0x2e8] ss:$16 sps:$4 sm:$0xff]   ;;  %v9660_v2 = vld [vmem:[#allocation9 + $0x304] ss:$16 sps:$4 sm:$0xff]  }
 0x56c   :  { %5165 = vmatprep.subr.bf16.mxu1 %v9579_v3  ;;  %v9663_v3 = vld [vmem:[#allocation9 + $0x30c] ss:$16 sps:$4 sm:$0xff]  }
 0x56e   :  { %5123 = vmatpush1.bf16.msra.mxu0 %v9574_v5  ;;  %v5239_v5 = vpop.permute.xlu1 %5238 }
 0x56f   :  { %5166 = vmatpush1.bf16.msra.mxu1 %v9577_v7  ;;  %5124 = vmatprep.subr.bf16.mxu0 %v9582_v4  ;;  %v5237_v7 = vpop.permute.xlu0 %5236  ;;  %v9658_v4 = vld [vmem:[#allocation9 + $0x300] ss:$16 sps:$4 sm:$0xff]  }
 0x570   :  { %5167 = vmatprep.subr.bf16.mxu1 %v9585_v8  ;;  %v9661_v8 = vld [vmem:[#allocation9 + $0x308] ss:$16 sps:$4 sm:$0xff]  }
 0x572   :  { %5125 = vmatpush1.bf16.msra.mxu0 %v9580_v6  ;;  %v9666_v6 = vld [vmem:[#allocation9 + $0x324] ss:$16 sps:$4 sm:$0xff]  }
 0x573   :  { %5168 = vmatpush1.bf16.msra.mxu1 %v9583_v9  ;;  %5126 = vmatprep.subr.bf16.mxu0 %v9588_v1  ;;  %v9669_v9 = vld [vmem:[#allocation9 + $0x32c] ss:$16 sps:$4 sm:$0xff]   ;;  %v5240_v1 = vsel %vm2270_vm0, %v5237_v7, %v5239_v5  ;;  %v9744_v5 = vld [vmem:[#allocation9 + $0x4c4] ss:$16 sps:$4 sm:$0xff]  }
 0x574   :  { %5169 = vmatprep.subr.bf16.mxu1 %v9591_v10  ;;  %v9664_v10 = vld [vmem:[#allocation9 + $0x320] ss:$16 sps:$4 sm:$0xff]   ;;  %v9747_v7 = vld [vmem:[#allocation9 + $0x4cc] ss:$16 sps:$4 sm:$0xff]  }
 0x576   :  { %5127 = vmatpush1.bf16.msra.mxu0 %v9586_v12  ;;  %v9667_v12 = vld [vmem:[#allocation9 + $0x328] ss:$16 sps:$4 sm:$0xff]  }
 0x577   :  { %5170 = vmatpush1.bf16.msra.mxu1 %v9589_v15  ;;  %5128 = vmatprep.subr.bf16.mxu0 %v9594_v17  ;;  %v9672_v15 = vld [vmem:[#allocation9 + $0x344] ss:$16 sps:$4 sm:$0xff]   ;;  %v9675_v17 = vld [vmem:[#allocation9 + $0x34c] ss:$16 sps:$4 sm:$0xff]  }
 0x578   :  { %5171 = vmatprep.subr.bf16.mxu1 %v9597_v18  ;;  %v9670_v18 = vld [vmem:[#allocation9 + $0x340] ss:$16 sps:$4 sm:$0xff]  }
 0x57a   :  { %5129 = vmatpush1.bf16.msra.mxu0 %v9592_v19  ;;  %v9673_v19 = vld [vmem:[#allocation9 + $0x348] ss:$16 sps:$4 sm:$0xff]  }
 0x57b   :  { %5172 = vmatpush1.bf16.msra.mxu1 %v9595_v20  ;;  %5130 = vmatprep.subr.bf16.mxu0 %v9600_v21  ;;  %v9678_v20 = vld [vmem:[#allocation9 + $0x364] ss:$16 sps:$4 sm:$0xff]   ;;  %v9681_v21 = vld [vmem:[#allocation9 + $0x36c] ss:$16 sps:$4 sm:$0xff]  }
 0x57c   :  { %5173 = vmatprep.subr.bf16.mxu1 %v9603_v48  ;;  %v9676_v48 = vld [vmem:[#allocation9 + $0x360] ss:$16 sps:$4 sm:$0xff]  }
 0x57e   :  { %5131 = vmatpush1.bf16.msra.mxu0 %v9598_v22  ;;  %v9679_v22 = vld [vmem:[#allocation9 + $0x368] ss:$16 sps:$4 sm:$0xff]  }
 0x57f   :  { %5174 = vmatpush1.bf16.msra.mxu1 %v9601_v24  ;;  %5132 = vmatprep.subr.bf16.mxu0 %v9606_v25  ;;  %v9684_v24 = vld [vmem:[#allocation9 + $0x384] ss:$16 sps:$4 sm:$0xff]   ;;  %v9687_v25 = vld [vmem:[#allocation9 + $0x38c] ss:$16 sps:$4 sm:$0xff]  }
 0x580   :  { %5175 = vmatprep.subr.bf16.mxu1 %v9609_v28  ;;  %v9682_v28 = vld [vmem:[#allocation9 + $0x380] ss:$16 sps:$4 sm:$0xff]  }
 0x582   :  { %5133 = vmatpush1.bf16.msra.mxu0 %v9604_v11  ;;  %v9685_v11 = vld [vmem:[#allocation9 + $0x388] ss:$16 sps:$4 sm:$0xff]  }
 0x583   :  { %5176 = vmatpush1.bf16.msra.mxu1 %v9607_v29  ;;  %5402 = vmatprep.subr.bf16.mxu0 %v9612_v30  ;;  %v9690_v29 = vld [vmem:[#allocation9 + $0x3a4] ss:$16 sps:$4 sm:$0xff]   ;;  %v9693_v30 = vld [vmem:[#allocation9 + $0x3ac] ss:$16 sps:$4 sm:$0xff]  }
 0x584   :  { %5445 = vmatprep.subr.bf16.mxu1 %v9615_v31  ;;  %v9688_v31 = vld [vmem:[#allocation9 + $0x3a0] ss:$16 sps:$4 sm:$0xff]  }
 0x585   :  { %5151 = vmatmul.mubr.bf16.vlgmr.msra.gmra.mrb[44].mxu0 %v10513_v16 }
 0x586   :  { %5194 = vmatmul.mubr.bf16.vlgmr.msra.gmra.mrb[44].mxu1 %v10513_v16  ;;  %5403 = vmatpush1.bf16.msra.mxu0 %v9610_v33  ;;  %v9633_v16 = vld [vmem:[#allocation9 + $0x26c] ss:$16 sps:$4 sm:$0xff]   ;;  %v9691_v33 = vld [vmem:[#allocation9 + $0x3a8] ss:$16 sps:$4 sm:$0xff]  }
 0x587   :  { %5446 = vmatpush1.bf16.msra.mxu1 %v9613_v34  ;;  %5404 = vmatprep.subr.bf16.mxu0 %v9618_v35  ;;  %v9696_v34 = vld [vmem:[#allocation9 + $0x3c4] ss:$16 sps:$4 sm:$0xff]   ;;  %v9699_v35 = vld [vmem:[#allocation9 + $0x3cc] ss:$16 sps:$4 sm:$0xff]  }
 0x588   :  { %5447 = vmatprep.subr.bf16.mxu1 %v9621_v36  ;;  %5434 = vmatprep.mubr.bf16.mxu0 %v10104_v13  ;;  %v9694_v36 = vld [vmem:[#allocation9 + $0x3c0] ss:$16 sps:$4 sm:$0xff]  }
 0x589   :  { %5477 = vmatprep.mubr.bf16.mxu1 %v10104_v13 }
 0x58a   :  { %5405 = vmatpush1.bf16.msra.mxu0 %v9616_v37  ;;  %v9697_v37 = vld [vmem:[#allocation9 + $0x3c8] ss:$16 sps:$4 sm:$0xff]  }
 0x58b   :  { %5448 = vmatpush1.bf16.msra.mxu1 %v9619_v38  ;;  %5406 = vmatprep.subr.bf16.mxu0 %v9624_v23  ;;  %v9702_v38 = vld [vmem:[#allocation9 + $0x3e4] ss:$16 sps:$4 sm:$0xff]   ;;  %v9705_v23 = vld [vmem:[#allocation9 + $0x3ec] ss:$16 sps:$4 sm:$0xff]  }
 0x58c   :  { %5449 = vmatprep.subr.bf16.mxu1 %v9627_v26  ;;  %v9700_v26 = vld [vmem:[#allocation9 + $0x3e0] ss:$16 sps:$4 sm:$0xff]  }
 0x58e   :  { %5407 = vmatpush1.bf16.msra.mxu0 %v9622_v39  ;;  %v9703_v39 = vld [vmem:[#allocation9 + $0x3e8] ss:$16 sps:$4 sm:$0xff]  }
 0x58f   :  { %5450 = vmatpush1.bf16.msra.mxu1 %v9625_v40  ;;  %5408 = vmatprep.subr.bf16.mxu0 %v9630_v41  ;;  %v9708_v40 = vld [vmem:[#allocation9 + $0x404] ss:$16 sps:$4 sm:$0xff]   ;;  %v9711_v41 = vld [vmem:[#allocation9 + $0x40c] ss:$16 sps:$4 sm:$0xff]  }
 0x590   :  { %5451 = vmatprep.subr.bf16.mxu1 %v9633_v16  ;;  %v9706_v16 = vld [vmem:[#allocation9 + $0x400] ss:$16 sps:$4 sm:$0xff]  }
 0x592   :  { %5409 = vmatpush1.bf16.msra.mxu0 %v9628_v42  ;;  %v9709_v42 = vld [vmem:[#allocation9 + $0x408] ss:$16 sps:$4 sm:$0xff]  }
 0x593   :  { %5452 = vmatpush1.bf16.msra.mxu1 %v9631_v43  ;;  %5410 = vmatprep.subr.bf16.mxu0 %v9636_v27  ;;  %v9714_v43 = vld [vmem:[#allocation9 + $0x424] ss:$16 sps:$4 sm:$0xff]   ;;  %v9717_v27 = vld [vmem:[#allocation9 + $0x42c] ss:$16 sps:$4 sm:$0xff]  }
 0x594   :  { %5453 = vmatprep.subr.bf16.mxu1 %v9639_v46  ;;  %v9712_v46 = vld [vmem:[#allocation9 + $0x420] ss:$16 sps:$4 sm:$0xff]  }
 0x596   :  { %5411 = vmatpush1.bf16.msra.mxu0 %v9634_v32  ;;  %v9715_v32 = vld [vmem:[#allocation9 + $0x428] ss:$16 sps:$4 sm:$0xff]  }
 0x597   :  { %5454 = vmatpush1.bf16.msra.mxu1 %v9637_v52  ;;  %5412 = vmatprep.subr.bf16.mxu0 %v9642_v53  ;;  %v9720_v52 = vld [vmem:[#allocation9 + $0x444] ss:$16 sps:$4 sm:$0xff]   ;;  %v9723_v53 = vld [vmem:[#allocation9 + $0x44c] ss:$16 sps:$4 sm:$0xff]  }
 0x598   :  { %5455 = vmatprep.subr.bf16.mxu1 %v9645_v54  ;;  %v9718_v54 = vld [vmem:[#allocation9 + $0x440] ss:$16 sps:$4 sm:$0xff]  }
 0x59a   :  { %5413 = vmatpush1.bf16.msra.mxu0 %v9640_v49  ;;  %v9721_v49 = vld [vmem:[#allocation9 + $0x448] ss:$16 sps:$4 sm:$0xff]  }
 0x59b   :  { %5456 = vmatpush1.bf16.msra.mxu1 %v9643_v55  ;;  %5414 = vmatprep.subr.bf16.mxu0 %v9648_v63  ;;  %v9726_v55 = vld [vmem:[#allocation9 + $0x464] ss:$16 sps:$4 sm:$0xff]   ;;  %v9724_v63 = vld [vmem:[#allocation9 + $0x460] ss:$16 sps:$4 sm:$0xff]  }
 0x59c   :  { %5457 = vmatprep.subr.bf16.mxu1 %v9651_v56  ;;  %v9727_v56 = vld [vmem:[#allocation9 + $0x468] ss:$16 sps:$4 sm:$0xff]  }
 0x59e   :  { %5415 = vmatpush1.bf16.msra.mxu0 %v9646_v57  ;;  %v9732_v57 = vld [vmem:[#allocation9 + $0x484] ss:$16 sps:$4 sm:$0xff]  }
 0x59f   :  { %5458 = vmatpush1.bf16.msra.mxu1 %v9649_v58  ;;  %5416 = vmatprep.subr.bf16.mxu0 %v9654_v59  ;;  %v9735_v58 = vld [vmem:[#allocation9 + $0x48c] ss:$16 sps:$4 sm:$0xff]   ;;  %v9730_v59 = vld [vmem:[#allocation9 + $0x480] ss:$16 sps:$4 sm:$0xff]  }
 0x5a0   :  { %5459 = vmatprep.subr.bf16.mxu1 %v9657_v60  ;;  %v9733_v60 = vld [vmem:[#allocation9 + $0x488] ss:$16 sps:$4 sm:$0xff]  }
 0x5a2   :  { %5417 = vmatpush1.bf16.msra.mxu0 %v9652_v62  ;;  %v9738_v62 = vld [vmem:[#allocation9 + $0x4a4] ss:$16 sps:$4 sm:$0xff]  }
 0x5a3   :  { %5460 = vmatpush1.bf16.msra.mxu1 %v9655_v0  ;;  %5711 = vmatprep.subr.bf16.mxu0 %v9660_v2  ;;  %v9741_v0 = vld [vmem:[#allocation9 + $0x4ac] ss:$16 sps:$4 sm:$0xff]   ;;  %v9736_v2 = vld [vmem:[#allocation9 + $0x4a0] ss:$16 sps:$4 sm:$0xff]  }
 0x5a4   :  { %5754 = vmatprep.subr.bf16.mxu1 %v9663_v3  ;;  %v9739_v3 = vld [vmem:[#allocation9 + $0x4a8] ss:$16 sps:$4 sm:$0xff]  }
 0x5a5   :  { %5435 = vmatmul.mubr.bf16.vlgmr.msra.gmra.mrb[44].mxu0 %v5240_v1 }
 0x5a6   :  { %5478 = vmatmul.mubr.bf16.vlgmr.msra.gmra.mrb[44].mxu1 %v5240_v1  ;;  %5712 = vmatpush1.bf16.msra.mxu0 %v9658_v4  ;;  %v9742_v4 = vld [vmem:[#allocation9 + $0x4c0] ss:$16 sps:$4 sm:$0xff]  }
 0x5a7   :  { %5755 = vmatpush1.bf16.msra.mxu1 %v9661_v8  ;;  %5713 = vmatprep.subr.bf16.mxu0 %v9666_v6  ;;  %v9745_v8 = vld [vmem:[#allocation9 + $0x4c8] ss:$16 sps:$4 sm:$0xff]   ;;  %v9750_v6 = vld [vmem:[#allocation9 + $0x4e4] ss:$16 sps:$4 sm:$0xff]   ;;  %v9748_v1 = vld [vmem:[#allocation9 + $0x4e0] ss:$16 sps:$4 sm:$0xff]  }
 0x5a8   :  { %5756 = vmatprep.subr.bf16.mxu1 %v9669_v9  ;;  %5743 = vmatprep.mubr.bf16.mxu0 %v10104_v13  ;;  %v9753_v9 = vld [vmem:[#allocation9 + $0x4ec] ss:$16 sps:$4 sm:$0xff]  }
 0x5a9   :  { %5786 = vmatprep.mubr.bf16.mxu1 %v10104_v13 }
 0x5aa   :  { %5714 = vmatpush1.bf16.msra.mxu0 %v9664_v10  ;;  %v9751_v10 = vld [vmem:[#allocation9 + $0x4e8] ss:$16 sps:$4 sm:$0xff]  }
 0x5ab   :  { %5757 = vmatpush1.bf16.msra.mxu1 %v9667_v12  ;;  %5715 = vmatprep.subr.bf16.mxu0 %v9672_v15  ;;  %v9756_v12 = vld [vmem:[#allocation9 + $0x504] ss:$16 sps:$4 sm:$0xff]   ;;  %v9759_v15 = vld [vmem:[#allocation9 + $0x50c] ss:$16 sps:$4 sm:$0xff]  }
 0x5ac   :  { %5758 = vmatprep.subr.bf16.mxu1 %v9675_v17  ;;  %v5882_v17 = vpop.permute.xlu1 %5881 }
 0x5ae   :  { %5716 = vmatpush1.bf16.msra.mxu0 %v9670_v18  ;;  %v5880_v18 = vpop.permute.xlu0 %5879 }
 0x5af   :  { %5759 = vmatpush1.bf16.msra.mxu1 %v9673_v19  ;;  %5717 = vmatprep.subr.bf16.mxu0 %v9678_v20  ;;  %v9754_v19 = vld [vmem:[#allocation9 + $0x500] ss:$16 sps:$4 sm:$0xff]   ;;  %v9757_v20 = vld [vmem:[#allocation9 + $0x508] ss:$16 sps:$4 sm:$0xff]  }
 0x5b0   :  { %5760 = vmatprep.subr.bf16.mxu1 %v9681_v21  ;;  %v9762_v21 = vld [vmem:[#allocation9 + $0x524] ss:$16 sps:$4 sm:$0xff]  }
 0x5b2   :  { %5718 = vmatpush1.bf16.msra.mxu0 %v9676_v48  ;;  %v9765_v48 = vld [vmem:[#allocation9 + $0x52c] ss:$16 sps:$4 sm:$0xff]  }
 0x5b3   :  { %5761 = vmatpush1.bf16.msra.mxu1 %v9679_v22  ;;  %5719 = vmatprep.subr.bf16.mxu0 %v9684_v24  ;;  %v5883_v22 = vsel %vm1738_vm11, %v5880_v18, %v5882_v17  ;;  %v9760_v24 = vld [vmem:[#allocation9 + $0x520] ss:$16 sps:$4 sm:$0xff]   ;;  %v9837_v17 = vld [vmem:[#allocation9 + $0x6ac] ss:$16 sps:$4 sm:$0xff]  }
 0x5b4   :  { %5762 = vmatprep.subr.bf16.mxu1 %v9687_v25  ;;  %v9763_v25 = vld [vmem:[#allocation9 + $0x528] ss:$16 sps:$4 sm:$0xff]   ;;  %v9832_v18 = vld [vmem:[#allocation9 + $0x6a0] ss:$16 sps:$4 sm:$0xff]  }
 0x5b6   :  { %5720 = vmatpush1.bf16.msra.mxu0 %v9682_v28  ;;  %v9768_v28 = vld [vmem:[#allocation9 + $0x544] ss:$16 sps:$4 sm:$0xff]  }
 0x5b7   :  { %5763 = vmatpush1.bf16.msra.mxu1 %v9685_v11  ;;  %5721 = vmatprep.subr.bf16.mxu0 %v9690_v29  ;;  %v9771_v11 = vld [vmem:[#allocation9 + $0x54c] ss:$16 sps:$4 sm:$0xff]   ;;  %v9766_v29 = vld [vmem:[#allocation9 + $0x540] ss:$16 sps:$4 sm:$0xff]  }
 0x5b8   :  { %5764 = vmatprep.subr.bf16.mxu1 %v9693_v30  ;;  %v9769_v30 = vld [vmem:[#allocation9 + $0x548] ss:$16 sps:$4 sm:$0xff]  }
 0x5ba   :  { %5722 = vmatpush1.bf16.msra.mxu0 %v9688_v31  ;;  %v9774_v31 = vld [vmem:[#allocation9 + $0x564] ss:$16 sps:$4 sm:$0xff]  }
 0x5bb   :  { %5765 = vmatpush1.bf16.msra.mxu1 %v9691_v33  ;;  %5723 = vmatprep.subr.bf16.mxu0 %v9696_v34  ;;  %v9777_v33 = vld [vmem:[#allocation9 + $0x56c] ss:$16 sps:$4 sm:$0xff]   ;;  %v9772_v34 = vld [vmem:[#allocation9 + $0x560] ss:$16 sps:$4 sm:$0xff]  }
 0x5bc   :  { %5766 = vmatprep.subr.bf16.mxu1 %v9699_v35  ;;  %v9775_v35 = vld [vmem:[#allocation9 + $0x568] ss:$16 sps:$4 sm:$0xff]  }
 0x5be   :  { %5724 = vmatpush1.bf16.msra.mxu0 %v9694_v36  ;;  %v9780_v36 = vld [vmem:[#allocation9 + $0x584] ss:$16 sps:$4 sm:$0xff]  }
 0x5bf   :  { %5767 = vmatpush1.bf16.msra.mxu1 %v9697_v37  ;;  %5725 = vmatprep.subr.bf16.mxu0 %v9702_v38  ;;  %v9783_v37 = vld [vmem:[#allocation9 + $0x58c] ss:$16 sps:$4 sm:$0xff]   ;;  %v9778_v38 = vld [vmem:[#allocation9 + $0x580] ss:$16 sps:$4 sm:$0xff]  }
 0x5c0   :  { %5768 = vmatprep.subr.bf16.mxu1 %v9705_v23  ;;  %v9781_v23 = vld [vmem:[#allocation9 + $0x588] ss:$16 sps:$4 sm:$0xff]  }
 0x5c2   :  { %5726 = vmatpush1.bf16.msra.mxu0 %v9700_v26  ;;  %v9786_v26 = vld [vmem:[#allocation9 + $0x5a4] ss:$16 sps:$4 sm:$0xff]  }
 0x5c3   :  { %5769 = vmatpush1.bf16.msra.mxu1 %v9703_v39  ;;  %6045 = vmatprep.subr.bf16.mxu0 %v9708_v40  ;;  %v9789_v39 = vld [vmem:[#allocation9 + $0x5ac] ss:$16 sps:$4 sm:$0xff]   ;;  %v9784_v40 = vld [vmem:[#allocation9 + $0x5a0] ss:$16 sps:$4 sm:$0xff]  }
 0x5c4   :  { %6088 = vmatprep.subr.bf16.mxu1 %v9711_v41  ;;  %v9787_v41 = vld [vmem:[#allocation9 + $0x5a8] ss:$16 sps:$4 sm:$0xff]  }
 0x5c5   :  { %5744 = vmatmul.mubr.bf16.vlgmr.msra.gmra.mrb[44].mxu0 %v10590_v51 }
 0x5c6   :  { %5787 = vmatmul.mubr.bf16.vlgmr.msra.gmra.mrb[44].mxu1 %v10590_v51  ;;  %6046 = vmatpush1.bf16.msra.mxu0 %v9706_v16  ;;  %v9729_v51 = vld [vmem:[#allocation9 + $0x46c] ss:$16 sps:$4 sm:$0xff]   ;;  %v9792_v16 = vld [vmem:[#allocation9 + $0x5c4] ss:$16 sps:$4 sm:$0xff]  }
 0x5c7   :  { %6089 = vmatpush1.bf16.msra.mxu1 %v9709_v42  ;;  %6047 = vmatprep.subr.bf16.mxu0 %v9714_v43  ;;  %v9795_v42 = vld [vmem:[#allocation9 + $0x5cc] ss:$16 sps:$4 sm:$0xff]   ;;  %v9790_v43 = vld [vmem:[#allocation9 + $0x5c0] ss:$16 sps:$4 sm:$0xff]  }
 0x5c8   :  { %6090 = vmatprep.subr.bf16.mxu1 %v9717_v27  ;;  %6077 = vmatprep.mubr.bf16.mxu0 %v10104_v13  ;;  %v9793_v27 = vld [vmem:[#allocation9 + $0x5c8] ss:$16 sps:$4 sm:$0xff]  }
 0x5c9   :  { %6120 = vmatprep.mubr.bf16.mxu1 %v10104_v13 }
 0x5ca   :  { %6048 = vmatpush1.bf16.msra.mxu0 %v9712_v46  ;;  %v9798_v46 = vld [vmem:[#allocation9 + $0x5e4] ss:$16 sps:$4 sm:$0xff]  }
 0x5cb   :  { %6091 = vmatpush1.bf16.msra.mxu1 %v9715_v32  ;;  %6049 = vmatprep.subr.bf16.mxu0 %v9720_v52  ;;  %v9801_v32 = vld [vmem:[#allocation9 + $0x5ec] ss:$16 sps:$4 sm:$0xff]   ;;  %v9796_v52 = vld [vmem:[#allocation9 + $0x5e0] ss:$16 sps:$4 sm:$0xff]  }
 0x5cc   :  { %6092 = vmatprep.subr.bf16.mxu1 %v9723_v53  ;;  %v9799_v53 = vld [vmem:[#allocation9 + $0x5e8] ss:$16 sps:$4 sm:$0xff]  }
 0x5ce   :  { %6050 = vmatpush1.bf16.msra.mxu0 %v9718_v54  ;;  %v9804_v54 = vld [vmem:[#allocation9 + $0x604] ss:$16 sps:$4 sm:$0xff]  }
 0x5cf   :  { %6093 = vmatpush1.bf16.msra.mxu1 %v9721_v49  ;;  %6051 = vmatprep.subr.bf16.mxu0 %v9726_v55  ;;  %v9807_v49 = vld [vmem:[#allocation9 + $0x60c] ss:$16 sps:$4 sm:$0xff]   ;;  %v6174_v55 = vpop.permute.xlu1 %6173 }
 0x5d0   :  { %6094 = vmatprep.subr.bf16.mxu1 %v9729_v51  ;;  %v6172_v51 = vpop.permute.xlu0 %6171 }
 0x5d2   :  { %6052 = vmatpush1.bf16.msra.mxu0 %v9724_v63  ;;  %v9802_v63 = vld [vmem:[#allocation9 + $0x600] ss:$16 sps:$4 sm:$0xff]  }
 0x5d3   :  { %6095 = vmatpush1.bf16.msra.mxu1 %v9727_v56  ;;  %6053 = vmatprep.subr.bf16.mxu0 %v9732_v57  ;;  %v9805_v56 = vld [vmem:[#allocation9 + $0x608] ss:$16 sps:$4 sm:$0xff]   ;;  %v9810_v57 = vld [vmem:[#allocation9 + $0x624] ss:$16 sps:$4 sm:$0xff]  }
 0x5d4   :  { %6096 = vmatprep.subr.bf16.mxu1 %v9735_v58  ;;  %v9813_v58 = vld [vmem:[#allocation9 + $0x62c] ss:$16 sps:$4 sm:$0xff]  }
 0x5d6   :  { %6054 = vmatpush1.bf16.msra.mxu0 %v9730_v59  ;;  %v6175_v59 = vsel %vm2270_vm0, %v6172_v51, %v6174_v55  ;;  %v9856_v55 = vld [vmem:[#allocation9 + $0x720] ss:$16 sps:$4 sm:$0xff]   ;;  %v9859_v51 = vld [vmem:[#allocation9 + $0x728] ss:$16 sps:$4 sm:$0xff]  }
 0x5d7   :  { %6097 = vmatpush1.bf16.msra.mxu1 %v9733_v60  ;;  %6055 = vmatprep.subr.bf16.mxu0 %v9738_v62  ;;  %v9808_v60 = vld [vmem:[#allocation9 + $0x620] ss:$16 sps:$4 sm:$0xff]   ;;  %v9811_v62 = vld [vmem:[#allocation9 + $0x628] ss:$16 sps:$4 sm:$0xff]  }
 0x5d8   :  { %6098 = vmatprep.subr.bf16.mxu1 %v9741_v0  ;;  %v9816_v0 = vld [vmem:[#allocation9 + $0x644] ss:$16 sps:$4 sm:$0xff]  }
 0x5da   :  { %6056 = vmatpush1.bf16.msra.mxu0 %v9736_v2  ;;  %v9819_v2 = vld [vmem:[#allocation9 + $0x64c] ss:$16 sps:$4 sm:$0xff]  }
 0x5db   :  { %6099 = vmatpush1.bf16.msra.mxu1 %v9739_v3  ;;  %6057 = vmatprep.subr.bf16.mxu0 %v9744_v5  ;;  %v9814_v3 = vld [vmem:[#allocation9 + $0x640] ss:$16 sps:$4 sm:$0xff]   ;;  %v9817_v5 = vld [vmem:[#allocation9 + $0x648] ss:$16 sps:$4 sm:$0xff]  }
 0x5dc   :  { %6100 = vmatprep.subr.bf16.mxu1 %v9747_v7  ;;  %v9822_v7 = vld [vmem:[#allocation9 + $0x664] ss:$16 sps:$4 sm:$0xff]  }
 0x5de   :  { %6058 = vmatpush1.bf16.msra.mxu0 %v9742_v4  ;;  %v9825_v4 = vld [vmem:[#allocation9 + $0x66c] ss:$16 sps:$4 sm:$0xff]  }
 0x5df   :  { %6101 = vmatpush1.bf16.msra.mxu1 %v9745_v8  ;;  %6059 = vmatprep.subr.bf16.mxu0 %v9750_v6  ;;  %v9820_v8 = vld [vmem:[#allocation9 + $0x660] ss:$16 sps:$4 sm:$0xff]   ;;  %v9823_v6 = vld [vmem:[#allocation9 + $0x668] ss:$16 sps:$4 sm:$0xff]  }
 0x5e0   :  { %6102 = vmatprep.subr.bf16.mxu1 %v9753_v9  ;;  %v9828_v9 = vld [vmem:[#allocation9 + $0x684] ss:$16 sps:$4 sm:$0xff]  }
 0x5e2   :  { %6060 = vmatpush1.bf16.msra.mxu0 %v9748_v1  ;;  %v9831_v1 = vld [vmem:[#allocation9 + $0x68c] ss:$16 sps:$4 sm:$0xff]  }
 0x5e3   :  { %6103 = vmatpush1.bf16.msra.mxu1 %v9751_v10  ;;  %6337 = vmatprep.subr.bf16.mxu0 %v9756_v12  ;;  %v9826_v10 = vld [vmem:[#allocation9 + $0x680] ss:$16 sps:$4 sm:$0xff]   ;;  %v9829_v12 = vld [vmem:[#allocation9 + $0x688] ss:$16 sps:$4 sm:$0xff]  }
 0x5e4   :  { %6380 = vmatprep.subr.bf16.mxu1 %v9759_v15  ;;  %v9834_v15 = vld [vmem:[#allocation9 + $0x6a4] ss:$16 sps:$4 sm:$0xff]  }
 0x5e5   :  { %6078 = vmatmul.mubr.bf16.vlgmr.msra.gmra.mrb[44].mxu0 %v5883_v22 }
 0x5e6   :  { %6121 = vmatmul.mubr.bf16.vlgmr.msra.gmra.mrb[44].mxu1 %v5883_v22  ;;  %6338 = vmatpush1.bf16.msra.mxu0 %v9754_v19  ;;  %v9835_v19 = vld [vmem:[#allocation9 + $0x6a8] ss:$16 sps:$4 sm:$0xff]  }
 0x5e7   :  { %6381 = vmatpush1.bf16.msra.mxu1 %v9757_v20  ;;  %6339 = vmatprep.subr.bf16.mxu0 %v9762_v21  ;;  %v9840_v20 = vld [vmem:[#allocation9 + $0x6c4] ss:$16 sps:$4 sm:$0xff]   ;;  %v9843_v21 = vld [vmem:[#allocation9 + $0x6cc] ss:$16 sps:$4 sm:$0xff]  }
 0x5e8   :  { %6382 = vmatprep.subr.bf16.mxu1 %v9765_v48  ;;  %6369 = vmatprep.mubr.bf16.mxu0 %v10104_v13 }
 0x5e9   :  { %6412 = vmatprep.mubr.bf16.mxu1 %v10104_v13 }
 0x5ea   :  { %6340 = vmatpush1.bf16.msra.mxu0 %v9760_v24 }
 0x5eb   :  { %6383 = vmatpush1.bf16.msra.mxu1 %v9763_v25  ;;  %6341 = vmatprep.subr.bf16.mxu0 %v9768_v28 }
 0x5ec   :  { %6384 = vmatprep.subr.bf16.mxu1 %v9771_v11 }
 0x5ee   :  { %6342 = vmatpush1.bf16.msra.mxu0 %v9766_v29  ;;  %v9838_v29 = vld [vmem:[#allocation9 + $0x6c0] ss:$16 sps:$4 sm:$0xff]  }
 0x5ef   :  { %6385 = vmatpush1.bf16.msra.mxu1 %v9769_v30  ;;  %6343 = vmatprep.subr.bf16.mxu0 %v9774_v31  ;;  %v9841_v30 = vld [vmem:[#allocation9 + $0x6c8] ss:$16 sps:$4 sm:$0xff]   ;;  %v9846_v31 = vld [vmem:[#allocation9 + $0x6e4] ss:$16 sps:$4 sm:$0xff]  }
 0x5f0   :  { %6386 = vmatprep.subr.bf16.mxu1 %v9777_v33  ;;  %v9849_v33 = vld [vmem:[#allocation9 + $0x6ec] ss:$16 sps:$4 sm:$0xff]  }
 0x5f2   :  { %6344 = vmatpush1.bf16.msra.mxu0 %v9772_v34 }
 0x5f3   :  { %6387 = vmatpush1.bf16.msra.mxu1 %v9775_v35  ;;  %6345 = vmatprep.subr.bf16.mxu0 %v9780_v36 }
 0x5f4   :  { %6388 = vmatprep.subr.bf16.mxu1 %v9783_v37 }
 0x5f6   :  { %6346 = vmatpush1.bf16.msra.mxu0 %v9778_v38 }
 0x5f7   :  { %6389 = vmatpush1.bf16.msra.mxu1 %v9781_v23  ;;  %6347 = vmatprep.subr.bf16.mxu0 %v9786_v26 }
 0x5f8   :  { %6390 = vmatprep.subr.bf16.mxu1 %v9789_v39  ;;  %v9844_v39 = vld [vmem:[#allocation9 + $0x6e0] ss:$16 sps:$4 sm:$0xff]  }
 0x5fa   :  { %6348 = vmatpush1.bf16.msra.mxu0 %v9784_v40  ;;  %v9847_v40 = vld [vmem:[#allocation9 + $0x6e8] ss:$16 sps:$4 sm:$0xff]  }
 0x5fb   :  { %6391 = vmatpush1.bf16.msra.mxu1 %v9787_v41  ;;  %6349 = vmatprep.subr.bf16.mxu0 %v9792_v16  ;;  %v9852_v41 = vld [vmem:[#allocation9 + $0x704] ss:$16 sps:$4 sm:$0xff]   ;;  %v9855_v16 = vld [vmem:[#allocation9 + $0x70c] ss:$16 sps:$4 sm:$0xff]  }
 0x5fc   :  { %6392 = vmatprep.subr.bf16.mxu1 %v9795_v42 }
 0x5fe   :  { %6350 = vmatpush1.bf16.msra.mxu0 %v9790_v43 }
 0x5ff   :  { %6393 = vmatpush1.bf16.msra.mxu1 %v9793_v27  ;;  %6351 = vmatprep.subr.bf16.mxu0 %v9798_v46  ;;  %v9850_v46 = vld [vmem:[#allocation9 + $0x700] ss:$16 sps:$4 sm:$0xff]  }
 0x600   :  { %6394 = vmatprep.subr.bf16.mxu1 %v9801_v32  ;;  %v9853_v32 = vld [vmem:[#allocation9 + $0x708] ss:$16 sps:$4 sm:$0xff]  }
 0x602   :  { %6352 = vmatpush1.bf16.msra.mxu0 %v9796_v52 }
 0x603   :  { %6395 = vmatpush1.bf16.msra.mxu1 %v9799_v53  ;;  %6634 = vmatprep.subr.bf16.mxu0 %v9804_v54  ;;  %v9858_v53 = vld [vmem:[#allocation9 + $0x724] ss:$16 sps:$4 sm:$0xff]   ;;  %v9861_v54 = vld [vmem:[#allocation9 + $0x72c] ss:$16 sps:$4 sm:$0xff]  }
 0x604   :  { %6677 = vmatprep.subr.bf16.mxu1 %v9807_v49 }
 0x605   :  { %6370 = vmatmul.mubr.bf16.vlgmr.msra.gmra.mrb[44].mxu0 %v6175_v59 }
 0x606   :  { %6413 = vmatmul.mubr.bf16.vlgmr.msra.gmra.mrb[44].mxu1 %v6175_v59  ;;  %6635 = vmatpush1.bf16.msra.mxu0 %v9802_v63  ;;  %v9862_v59 = vld [vmem:[#allocation9 + $0x740] ss:$16 sps:$4 sm:$0xff]  }
 0x607   :  { %6678 = vmatpush1.bf16.msra.mxu1 %v9805_v56  ;;  %6636 = vmatprep.subr.bf16.mxu0 %v9810_v57  ;;  %v9864_v56 = vld [vmem:[#allocation9 + $0x744] ss:$16 sps:$4 sm:$0xff]   ;;  %v9867_v57 = vld [vmem:[#allocation9 + $0x74c] ss:$16 sps:$4 sm:$0xff]  }
 0x608   :  { %6679 = vmatprep.subr.bf16.mxu1 %v9813_v58  ;;  %6666 = vmatprep.mubr.bf16.mxu0 %v10104_v13 }
 0x609   :  { %6709 = vmatprep.mubr.bf16.mxu1 %v10104_v13 }
 0x60a   :  { %6637 = vmatpush1.bf16.msra.mxu0 %v9808_v60  ;;  %v9865_v60 = vld [vmem:[#allocation9 + $0x748] ss:$16 sps:$4 sm:$0xff]  }
 0x60b   :  { %6680 = vmatpush1.bf16.msra.mxu1 %v9811_v62  ;;  %6638 = vmatprep.subr.bf16.mxu0 %v9816_v0  ;;  %v9873_v0 = vld [vmem:[#allocation9 + $0x76c] ss:$16 sps:$4 sm:$0xff]  }
 0x60c   :  { %6681 = vmatprep.subr.bf16.mxu1 %v9819_v2 }
 0x60e   :  { %6639 = vmatpush1.bf16.msra.mxu0 %v9814_v3  ;;  %v9868_v3 = vld [vmem:[#allocation9 + $0x760] ss:$16 sps:$4 sm:$0xff]  }
 0x60f   :  { %6682 = vmatpush1.bf16.msra.mxu1 %v9817_v5  ;;  %6640 = vmatprep.subr.bf16.mxu0 %v9822_v7  ;;  %v9871_v5 = vld [vmem:[#allocation9 + $0x768] ss:$16 sps:$4 sm:$0xff]   ;;  %v4617_v7 = vld [vmem:[#allocation12] sm:$0x1] }
 0x610   :  { %6683 = vmatprep.subr.bf16.mxu1 %v9825_v4  ;;  %v9876_v4 = vld [vmem:[#allocation9 + $0x784] ss:$16 sps:$4 sm:$0xff]  }
 0x612   :  { %6641 = vmatpush1.bf16.msra.mxu0 %v9820_v8  ;;  %v9879_v8 = vld [vmem:[#allocation9 + $0x78c] ss:$16 sps:$4 sm:$0xff]  }
 0x613   :  { %6684 = vmatpush1.bf16.msra.mxu1 %v9823_v6  ;;  %6642 = vmatprep.subr.bf16.mxu0 %v9828_v9 }
 0x614   :  { %6685 = vmatprep.subr.bf16.mxu1 %v9831_v1  ;;  %v9874_v1 = vld [vmem:[#allocation9 + $0x780] ss:$16 sps:$4 sm:$0xff]  }
 0x616   :  { %6643 = vmatpush1.bf16.msra.mxu0 %v9826_v10  ;;  %v9877_v10 = vld [vmem:[#allocation9 + $0x788] ss:$16 sps:$4 sm:$0xff]  }
 0x617   :  { %6686 = vmatpush1.bf16.msra.mxu1 %v9829_v12  ;;  %6644 = vmatprep.subr.bf16.mxu0 %v9834_v15  ;;  %v9882_v12 = vld [vmem:[#allocation9 + $0x7a4] ss:$16 sps:$4 sm:$0xff]   ;;  %v9885_v15 = vld [vmem:[#allocation9 + $0x7ac] ss:$16 sps:$4 sm:$0xff]  }
 0x618   :  { %6687 = vmatprep.subr.bf16.mxu1 %v9837_v17  ;;  %v8401_v48 = vpop.f32.mrb[40].mxu0  ;;  %v9880_v17 = vld [vmem:[#allocation9 + $0x7a0] ss:$16 sps:$4 sm:$0xff]  }
 0x619   :  { %v8439_v22 = vpop.f32.mrb[40].mxu1  ;;  %v8402_v24 = vpop.f32.mrb[41].mxu0 }
 0x61a   :  { %v8440_v25 = vpop.f32.mrb[41].mxu1  ;;  %v8403_v28 = vadd.f32 %v8402_v24, %v8401_v48  ;;  %6645 = vmatpush1.bf16.msra.mxu0 %v9832_v18  ;;  %v9883_v18 = vld [vmem:[#allocation9 + $0x7a8] ss:$16 sps:$4 sm:$0xff]   ;;  %v9897_v24 = vld [vmem:[#allocation9 + $0x7ec] ss:$16 sps:$4 sm:$0xff]  }
 0x61b   :  { %v8441_v11 = vadd.f32 %v8440_v25, %v8439_v22  ;;  %6688 = vmatpush1.bf16.msra.mxu1 %v9835_v19  ;;  %6646 = vmatprep.subr.bf16.mxu0 %v9840_v20  ;;  %v9888_v19 = vld [vmem:[#allocation9 + $0x7c4] ss:$16 sps:$4 sm:$0xff]   ;;  %v9891_v20 = vld [vmem:[#allocation9 + $0x7cc] ss:$16 sps:$4 sm:$0xff]   ;;  %v9889_v48 = vld [vmem:[#allocation9 + $0x7c8] ss:$16 sps:$4 sm:$0xff]  }
 0x61c   :  { %6689 = vmatprep.subr.bf16.mxu1 %v9843_v21  ;;  %v8404_v35 = vpop.f32.mrb[42].mxu0  ;;  %v9886_v21 = vld [vmem:[#allocation9 + $0x7c0] ss:$16 sps:$4 sm:$0xff]   ;;  %v9894_v22 = vld [vmem:[#allocation9 + $0x7e4] ss:$16 sps:$4 sm:$0xff]  }
 0x61d   :  { %v4599_v34 = vadd.f32 %v8441_v11, %v8403_v28  ;;  %v8442_v36 = vpop.f32.mrb[42].mxu1  ;;  %v8405_v37 = vpop.f32.mrb[43].mxu0  ;;  %v9892_v25 = vld [vmem:[#allocation9 + $0x7e0] ss:$16 sps:$4 sm:$0xff]   ;;  %v9895_v28 = vld [vmem:[#allocation9 + $0x7e8] ss:$16 sps:$4 sm:$0xff]  }
 0x61e   :  { %v8443_v38 = vpop.f32.mrb[43].mxu1  ;;  %v8406_v23 = vadd.f32 %v8405_v37, %v8404_v35  ;;  %6647 = vmatpush1.bf16.msra.mxu0 %v9838_v29  ;;  %v9900_v11 = vld [vmem:[#allocation9 + $0x804] ss:$16 sps:$4 sm:$0xff]   ;;  %v9903_v29 = vld [vmem:[#allocation9 + $0x80c] ss:$16 sps:$4 sm:$0xff]  }
 0x61f   :  { %v8444_v26 = vadd.f32 %v8443_v38, %v8442_v36  ;;  %6690 = vmatpush1.bf16.msra.mxu1 %v9841_v30  ;;  %6648 = vmatprep.subr.bf16.mxu0 %v9846_v31  ;;  %v4608_v43 = vsel %vm4607_vm9, %v4599_v34, 0.0  ;;  %v6781_v30 = vpop.permute.xlu1 %6780  ;;  %v6779_v31 = vpop.permute.xlu0 %6778  ;;  %v9901_v34 = vld [vmem:[#allocation9 + $0x808] ss:$16 sps:$4 sm:$0xff]   ;;  %v9906_v35 = vld [vmem:[#allocation9 + $0x824] ss:$16 sps:$4 sm:$0xff]  }
 0x620   :  { %6691 = vmatprep.subr.bf16.mxu1 %v9849_v33  ;;  %v9898_v33 = vld [vmem:[#allocation9 + $0x800] ss:$16 sps:$4 sm:$0xff]   ;;  %v9909_v36 = vld [vmem:[#allocation9 + $0x82c] ss:$16 sps:$4 sm:$0xff]   ;;  %v6782_v37 = vsel %vm1738_vm11, %v6779_v31, %v6781_v30 }
 0x621   :  { %v4604_v42 = vadd.f32 %v8444_v26, %v8406_v23  ;;  %v9904_v38 = vld [vmem:[#allocation9 + $0x820] ss:$16 sps:$4 sm:$0xff]   ;;  %v9907_v23 = vld [vmem:[#allocation9 + $0x828] ss:$16 sps:$4 sm:$0xff]   ;;  %v9912_v26 = vld [vmem:[#allocation9 + $0x844] ss:$16 sps:$4 sm:$0xff]  }
 0x622   :  { %6649 = vmatpush1.bf16.msra.mxu0 %v9844_v39  ;;  %v9915_v39 = vld [vmem:[#allocation9 + $0x84c] ss:$16 sps:$4 sm:$0xff]  }
 0x623   :  { %v4609_v27 = vsel %vm4607_vm9, %v4604_v42, 0.0  ;;  %6692 = vmatpush1.bf16.msra.mxu1 %v9847_v40  ;;  %6944 = vmatprep.subr.bf16.mxu0 %v9852_v41  ;;  %v9910_v40 = vld [vmem:[#allocation9 + $0x840] ss:$16 sps:$4 sm:$0xff]   ;;  %v9913_v41 = vld [vmem:[#allocation9 + $0x848] ss:$16 sps:$4 sm:$0xff]  }
 0x624   :  { %v4610_v52 = vadd.f32 %v4609_v27, %v4608_v43  ;;  %6987 = vmatprep.subr.bf16.mxu1 %v9855_v16  ;;  %v9918_v16 = vld [vmem:[#allocation9 + $0x864] ss:$16 sps:$4 sm:$0xff]   ;;  %v9921_v42 = vld [vmem:[#allocation9 + $0x86c] ss:$16 sps:$4 sm:$0xff]   ;;  %v9916_v43 = vld [vmem:[#allocation9 + $0x860] ss:$16 sps:$4 sm:$0xff]  }
 0x625   :  { %6667 = vmatmul.mubr.bf16.vlgmr.msra.gmra.mrb[44].mxu0 %v10570_v14  ;;  %v9919_v27 = vld [vmem:[#allocation9 + $0x868] ss:$16 sps:$4 sm:$0xff]   ;;  %v7389_v30 = vld [vmem:[%s11009_s5 + $0xa8] sm:$0xff] }
 0x626   :  { %v4611_v49 = vrot.slane %v4610_v52, 4  ;;  %6710 = vmatmul.mubr.bf16.vlgmr.msra.gmra.mrb[44].mxu1 %v10570_v14  ;;  %6945 = vmatpush1.bf16.msra.mxu0 %v9850_v46  ;;  %v9870_v14 = vld [vmem:[#allocation9 + $0x764] ss:$16 sps:$4 sm:$0xff]  }
 0x627   :  { %6988 = vmatpush1.bf16.msra.mxu1 %v9853_v32  ;;  %6946 = vmatprep.subr.bf16.mxu0 %v9858_v53  ;;  %v9924_v46 = vld [vmem:[#allocation9 + $0x884] ss:$16 sps:$4 sm:$0xff]   ;;  %v9927_v32 = vld [vmem:[#allocation9 + $0x88c] ss:$16 sps:$4 sm:$0xff]  }
 0x628   :  { %v4612_v63 = vadd.f32 %v4611_v49, %v4610_v52  ;;  %6989 = vmatprep.subr.bf16.mxu1 %v9861_v54  ;;  %6976 = vmatprep.mubr.bf16.mxu0 %v10104_v13  ;;  %v9922_v52 = vld [vmem:[#allocation9 + $0x880] ss:$16 sps:$4 sm:$0xff]   ;;  %v9930_v53 = vld [vmem:[#allocation9 + $0x8a4] ss:$16 sps:$4 sm:$0xff]   ;;  %v9933_v54 = vld [vmem:[#allocation9 + $0x8ac] ss:$16 sps:$4 sm:$0xff]  }
 0x629   :  { %7019 = vmatprep.mubr.bf16.mxu1 %v10104_v13  ;;  %v9928_v49 = vld [vmem:[#allocation9 + $0x8a0] ss:$16 sps:$4 sm:$0xff]   ;;  %v7420_v31 = vld [vmem:[%s11009_s5 + $0x1a0] sm:$0xff] }
 0x62a   :  { %v4613_v58 = vrot.slane %v4612_v63, 2  ;;  %6947 = vmatpush1.bf16.msra.mxu0 %v9856_v55  ;;  %v9931_v55 = vld [vmem:[#allocation9 + $0x8a8] ss:$16 sps:$4 sm:$0xff]  }
 0x62b   :  { %6990 = vmatpush1.bf16.msra.mxu1 %v9859_v51  ;;  %6948 = vmatprep.subr.bf16.mxu0 %v9864_v56  ;;  %v9936_v51 = vld [vmem:[#allocation9 + $0x8c4] ss:$16 sps:$4 sm:$0xff]   ;;  %v9934_v56 = vld [vmem:[#allocation9 + $0x8c0] ss:$16 sps:$4 sm:$0xff]  }
 0x62c   :  { %v4614_v62 = vadd.f32 %v4613_v58, %v4612_v63  ;;  %6991 = vmatprep.subr.bf16.mxu1 %v9867_v57  ;;  %v9939_v63 = vld [vmem:[#allocation9 + $0x8cc] ss:$16 sps:$4 sm:$0xff]   ;;  %v9937_v57 = vld [vmem:[#allocation9 + $0x8c8] ss:$16 sps:$4 sm:$0xff]   ;;  %v9942_v58 = vld [vmem:[#allocation9 + $0x8e4] ss:$16 sps:$4 sm:$0xff]  }
 0x62e   :  { %v4615_v2 = vrot.slane %v4614_v62, 1  ;;  %6949 = vmatpush1.bf16.msra.mxu0 %v9862_v59  ;;  %v9945_v59 = vld [vmem:[#allocation9 + $0x8ec] ss:$16 sps:$4 sm:$0xff]  }
 0x62f   :  { %6992 = vmatpush1.bf16.msra.mxu1 %v9865_v60  ;;  %6950 = vmatprep.subr.bf16.mxu0 %v9870_v14  ;;  %v7384_v60 = vld [vmem:[%s11009_s5 + $0x80] sm:$0xff] }
 0x630   :  { %6993 = vmatprep.subr.bf16.mxu1 %v9873_v0  ;;  %v4616_v6 = vadd.f32 %v4615_v2, %v4614_v62  ;;  %v7385_v62 = vld [vmem:[%s11009_s5 + $0x88] sm:$0xff]  ;;  %v7416_v14 = vld [vmem:[%s11009_s5 + $0x180] sm:$0xff] }
 0x631   :  { %v7417_v0 = vld [vmem:[%s11009_s5 + $0x188] sm:$0xff] }
 0x632   :  { %v4618_v9 = vadd.f32 %v4617_v7, %v4616_v6  ;;  %6951 = vmatpush1.bf16.msra.mxu0 %v9868_v3  ;;  %v9940_v2 = vld [vmem:[#allocation9 + $0x8e0] ss:$16 sps:$4 sm:$0xff]   ;;  %v9943_v3 = vld [vmem:[#allocation9 + $0x8e8] ss:$16 sps:$4 sm:$0xff]  }
 0x633   :  { %6994 = vmatpush1.bf16.msra.mxu1 %v9871_v5  ;;  %6952 = vmatprep.subr.bf16.mxu0 %v9876_v4  ;;  %v7368_v5 = vld [vmem:[%s11009_s5] sm:$0xff]  ;;  %v7369_v7 = vld [vmem:[%s11009_s5 + $0x8] sm:$0xff]  ;;  %v8801_v4 = vpack.c.bf16 %v7385_v62, %v7384_v60 }
 0x634   :  { %6995 = vmatprep.subr.bf16.mxu1 %v9879_v8  ;;  %4620 = vst.msk [vmem:[#allocation13] sm:$0x1] %vm4619_vm10, %v4618_v9  ;;  %v8833_v8 = vpack.c.bf16 %v7417_v0, %v7416_v14  ;;  %v7400_v6 = vld [vmem:[%s11009_s5 + $0x100] sm:$0xff]  ;;  %v7401_v9 = vld [vmem:[%s11009_s5 + $0x108] sm:$0xff] }
 0x635   :  { %v7408_v14 = vld [vmem:[%s11009_s5 + $0x140] sm:$0xff]  ;;  %v7409_v0 = vld [vmem:[%s11009_s5 + $0x148] sm:$0xff] }
 0x636   :  { %6953 = vmatpush1.bf16.msra.mxu0 %v9874_v1  ;;  %v7386_v1 = vld [vmem:[%s11009_s5 + $0x90] sm:$0xff] }
 0x637   :  { %6996 = vmatpush1.bf16.msra.mxu1 %v9877_v10  ;;  %6954 = vmatprep.subr.bf16.mxu0 %v9882_v12  ;;  %v7387_v10 = vld [vmem:[%s11009_s5 + $0x98] sm:$0xff]  ;;  %v7418_v12 = vld [vmem:[%s11009_s5 + $0x190] sm:$0xff] }
 0x638   :  { %6997 = vmatprep.subr.bf16.mxu1 %v9885_v15  ;;  %v7419_v15 = vld [vmem:[%s11009_s5 + $0x198] sm:$0xff] }
 0x63a   :  { %6955 = vmatpush1.bf16.msra.mxu0 %v9880_v17  ;;  %v7073_v17 = vpop.permute.xlu1 %7072 }
 0x63b   :  { %6998 = vmatpush1.bf16.msra.mxu1 %v9883_v18  ;;  %6956 = vmatprep.subr.bf16.mxu0 %v9888_v19  ;;  %v7071_v18 = vpop.permute.xlu0 %7070  ;;  %v8803_v19 = vpack.c.bf16 %v7369_v7, %v7368_v5  ;;  %v7426_v5 = vld [vmem:[%s11009_s5 + $0x1d0] sm:$0xff]  ;;  %v7427_v7 = vld [vmem:[%s11009_s5 + $0x1d8] sm:$0xff] }
 0x63c   :  { %6999 = vmatprep.subr.bf16.mxu1 %v9891_v20  ;;  %v8835_v20 = vpack.c.bf16 %v7401_v9, %v7400_v6  ;;  %v7378_v6 = vld [vmem:[%s11009_s5 + $0x50] sm:$0xff]  ;;  %v7379_v9 = vld [vmem:[%s11009_s5 + $0x58] sm:$0xff] }
 0x63e   :  { %6957 = vmatpush1.bf16.msra.mxu0 %v9886_v21  ;;  %v7370_v21 = vld [vmem:[%s11009_s5 + $0x10] sm:$0xff] }
 0x63f   :  { %7000 = vmatpush1.bf16.msra.mxu1 %v9889_v48  ;;  %6958 = vmatprep.subr.bf16.mxu0 %v9894_v22  ;;  %v7371_v48 = vld [vmem:[%s11009_s5 + $0x18] sm:$0xff]  ;;  %v8805_v22 = vpack.c.bf16 %v7387_v10, %v7386_v1  ;;  %v8853_v10 = vpack.c.bf16 %v7427_v7, %v7426_v5 }
 0x640   :  { %7001 = vmatprep.subr.bf16.mxu1 %v9897_v24  ;;  %v8837_v24 = vpack.c.bf16 %v7419_v15, %v7418_v12  ;;  %v7410_v12 = vld [vmem:[%s11009_s5 + $0x150] sm:$0xff]  ;;  %v7411_v15 = vld [vmem:[%s11009_s5 + $0x158] sm:$0xff] }
 0x642   :  { %6959 = vmatpush1.bf16.msra.mxu0 %v9892_v25  ;;  %v7402_v25 = vld [vmem:[%s11009_s5 + $0x110] sm:$0xff] }
 0x643   :  { %7002 = vmatpush1.bf16.msra.mxu1 %v9895_v28  ;;  %7236 = vmatprep.subr.bf16.mxu0 %v9900_v11  ;;  %v7403_v28 = vld [vmem:[%s11009_s5 + $0x118] sm:$0xff]  ;;  %v7388_v11 = vld [vmem:[%s11009_s5 + $0xa0] sm:$0xff] }
 0x644   :  { %7279 = vmatprep.subr.bf16.mxu1 %v9903_v29  ;;  %v7074_v29 = vsel %vm2270_vm0, %v7071_v18, %v7073_v17  ;;  %v7396_v17 = vld [vmem:[%s11009_s5 + $0xe0] sm:$0xff]  ;;  %v7397_v18 = vld [vmem:[%s11009_s5 + $0xe8] sm:$0xff] }
 0x645   :  { %6977 = vmatmul.mubr.bf16.vlgmr.msra.gmra.mrb[44].mxu0 %v6782_v37 }
 0x646   :  { %7020 = vmatmul.mubr.bf16.vlgmr.msra.gmra.mrb[44].mxu1 %v6782_v37  ;;  %7237 = vmatpush1.bf16.msra.mxu0 %v9898_v33  ;;  %v7421_v33 = vld [vmem:[%s11009_s5 + $0x1a8] sm:$0xff] }
 0x647   :  { %7280 = vmatpush1.bf16.msra.mxu1 %v9901_v34  ;;  %7238 = vmatprep.subr.bf16.mxu0 %v9906_v35  ;;  %v8807_v34 = vpack.c.bf16 %v7371_v48, %v7370_v21  ;;  %v8839_v35 = vpack.c.bf16 %v7403_v28, %v7402_v25  ;;  %v7373_v37 = vld [vmem:[%s11009_s5 + $0x28] sm:$0xff]  ;;  %v8823_v21 = vpack.c.bf16 %v7379_v9, %v7378_v6  ;;  %v7380_v25 = vld [vmem:[%s11009_s5 + $0x60] sm:$0xff] }
 0x648   :  { %7281 = vmatprep.subr.bf16.mxu1 %v9909_v36  ;;  %7268 = vmatprep.mubr.bf16.mxu0 %v10104_v13  ;;  %v7372_v36 = vld [vmem:[%s11009_s5 + $0x20] sm:$0xff]  ;;  %v8855_v48 = vpack.c.bf16 %v7411_v15, %v7410_v12  ;;  %v7381_v28 = vld [vmem:[%s11009_s5 + $0x68] sm:$0xff] }
 0x649   :  { %7311 = vmatprep.mubr.bf16.mxu1 %v10104_v13  ;;  %v9925_v13 = vld [vmem:[#allocation9 + $0x888] ss:$16 sps:$4 sm:$0xff]  }
 0x64a   :  { %7239 = vmatpush1.bf16.msra.mxu0 %v9904_v38  ;;  %v8809_v38 = vpack.c.bf16 %v7389_v30, %v7388_v11  ;;  %v7412_v11 = vld [vmem:[%s11009_s5 + $0x160] sm:$0xff]  ;;  %v7413_v30 = vld [vmem:[%s11009_s5 + $0x168] sm:$0xff] }
 0x64b   :  { %7282 = vmatpush1.bf16.msra.mxu1 %v9907_v23  ;;  %7240 = vmatprep.subr.bf16.mxu0 %v9912_v26  ;;  %v8841_v23 = vpack.c.bf16 %v7421_v33, %v7420_v31  ;;  %v7404_v26 = vld [vmem:[%s11009_s5 + $0x120] sm:$0xff]  ;;  %v8859_v31 = vpack.c.bf16 %v7413_v30, %v7412_v11  ;;  %v7398_v33 = vld [vmem:[%s11009_s5 + $0xf0] sm:$0xff] }
 0x64c   :  { %7283 = vmatprep.subr.bf16.mxu1 %v9915_v39  ;;  %v7405_v39 = vld [vmem:[%s11009_s5 + $0x128] sm:$0xff] }
 0x64e   :  { %7241 = vmatpush1.bf16.msra.mxu0 %v9910_v40  ;;  %v7390_v40 = vld [vmem:[%s11009_s5 + $0xb0] sm:$0xff] }
 0x64f   :  { %7284 = vmatpush1.bf16.msra.mxu1 %v9913_v41  ;;  %7242 = vmatprep.subr.bf16.mxu0 %v9918_v16  ;;  %v7391_v41 = vld [vmem:[%s11009_s5 + $0xb8] sm:$0xff]  ;;  %v7422_v16 = vld [vmem:[%s11009_s5 + $0x1b0] sm:$0xff] }
 0x650   :  { %7285 = vmatprep.subr.bf16.mxu1 %v9921_v42  ;;  %v7423_v42 = vld [vmem:[%s11009_s5 + $0x1b8] sm:$0xff] }
 0x652   :  { %7243 = vmatpush1.bf16.msra.mxu0 %v9916_v43  ;;  %v8811_v43 = vpack.c.bf16 %v7373_v37, %v7372_v36  ;;  %v7431_v37 = vld [vmem:[%s11009_s5 + $0x1f8] sm:$0xff] }
 0x653   :  { %7286 = vmatpush1.bf16.msra.mxu1 %v9919_v27  ;;  %7244 = vmatprep.subr.bf16.mxu0 %v9924_v46  ;;  %v8843_v27 = vpack.c.bf16 %v7405_v39, %v7404_v26  ;;  %v7374_v46 = vld [vmem:[%s11009_s5 + $0x30] sm:$0xff] }
 0x654   :  { %7287 = vmatprep.subr.bf16.mxu1 %v9927_v32  ;;  %v7375_v32 = vld [vmem:[%s11009_s5 + $0x38] sm:$0xff] }
 0x656   :  { %7245 = vmatpush1.bf16.msra.mxu0 %v9922_v52  ;;  %v8813_v52 = vpack.c.bf16 %v7391_v41, %v7390_v40  ;;  %v7414_v40 = vld [vmem:[%s11009_s5 + $0x170] sm:$0xff]  ;;  %v7415_v41 = vld [vmem:[%s11009_s5 + $0x178] sm:$0xff] }
 0x657   :  { %7288 = vmatpush1.bf16.msra.mxu1 %v9925_v13  ;;  %7246 = vmatprep.subr.bf16.mxu0 %v9930_v53  ;;  %v8845_v13 = vpack.c.bf16 %v7423_v42, %v7422_v16  ;;  %v7406_v53 = vld [vmem:[%s11009_s5 + $0x130] sm:$0xff]  ;;  %v8863_v16 = vpack.c.bf16 %v7415_v41, %v7414_v40  ;;  %v7330_v42 = vld [vmem:[#allocation10] sm:$0xf] }
 0x658   :  { %7289 = vmatprep.subr.bf16.mxu1 %v9933_v54  ;;  %v7407_v54 = vld [vmem:[%s11009_s5 + $0x138] sm:$0xff] }
 0x65a   :  { %7247 = vmatpush1.bf16.msra.mxu0 %v9928_v49  ;;  %v7392_v49 = vld [vmem:[%s11009_s5 + $0xc0] sm:$0xff] }
 0x65b   :  { %7290 = vmatpush1.bf16.msra.mxu1 %v9931_v55  ;;  %7248 = vmatprep.subr.bf16.mxu0 %v9936_v51  ;;  %v7393_v55 = vld [vmem:[%s11009_s5 + $0xc8] sm:$0xff]  ;;  %v7424_v51 = vld [vmem:[%s11009_s5 + $0x1c0] sm:$0xff] }
 0x65c   :  { %7291 = vmatprep.subr.bf16.mxu1 %v9939_v63  ;;  %v7425_v63 = vld [vmem:[%s11009_s5 + $0x1c8] sm:$0xff]  ;;  %v8817_v60 = vpack.c.bf16 %v7393_v55, %v7392_v49 }
 0x65d   :  { %v8849_v62 = vpack.c.bf16 %v7425_v63, %v7424_v51 }
 0x65e   :  { %7249 = vmatpush1.bf16.msra.mxu0 %v9934_v56  ;;  %v8815_v56 = vpack.c.bf16 %v7375_v32, %v7374_v46  ;;  %v7339_v46 = vrot.slane %v7330_v42, %v4363_v47  ;;  %v7347_v32 = vrot.slane %v7330_v42, %v4371_v50 }
 0x65f   :  { %7292 = vmatpush1.bf16.msra.mxu1 %v9937_v57  ;;  %7250 = vmatprep.subr.bf16.mxu0 %v9942_v58  ;;  %v8847_v57 = vpack.c.bf16 %v7407_v54, %v7406_v53  ;;  %v7376_v58 = vld [vmem:[%s11009_s5 + $0x40] sm:$0xff] }
 0x660   :  { %7293 = vmatprep.subr.bf16.mxu1 %v9945_v59  ;;  %v7377_v59 = vld [vmem:[%s11009_s5 + $0x48] sm:$0xff] }
 0x662   :  { %7251 = vmatpush1.bf16.msra.mxu0 %v9940_v2  ;;  %v7394_v2 = vld [vmem:[%s11009_s5 + $0xd0] sm:$0xff] }
 0x663   :  { %7294 = vmatpush1.bf16.msra.mxu1 %v9943_v3  ;;  %8802 = vmatprep.subr.bf16.mxu0 %v8801_v4  ;;  %v7395_v3 = vld [vmem:[%s11009_s5 + $0xd8] sm:$0xff]  ;;  %v8819_v4 = vpack.c.bf16 %v7377_v59, %v7376_v58 }
 0x664   :  { %8834 = vmatprep.subr.bf16.mxu1 %v8833_v8  ;;  %v8851_v8 = vpack.c.bf16 %v7409_v0, %v7408_v14  ;;  %v8821_v1 = vpack.c.bf16 %v7395_v3, %v7394_v2 }
 0x665   :  { %7269 = vmatmul.mubr.bf16.vlgmr.msra.gmra.mrb[44].mxu0 %v7074_v29 }
 0x666   :  { %7312 = vmatmul.mubr.bf16.vlgmr.msra.gmra.mrb[44].mxu1 %v7074_v29  ;;  %8804 = vmatpush3.bf16.msra.mxu0 %v8803_v19  ;;  %v7428_v19 = vld [vmem:[%s11009_s5 + $0x1e0] sm:$0xff]  ;;  %v8827_v29 = vpack.c.bf16 %v7381_v28, %v7380_v25 }
 0x667   :  { %8836 = vmatpush3.bf16.msra.mxu1 %v8835_v20  ;;  %8806 = vmatprep.subr.bf16.mxu0 %v8805_v22  ;;  %v7429_v20 = vld [vmem:[%s11009_s5 + $0x1e8] sm:$0xff]  ;;  %v8825_v22 = vpack.c.bf16 %v7397_v18, %v7396_v17 }
 0x668   :  { %8838 = vmatprep.subr.bf16.mxu1 %v8837_v24  ;;  %v8857_v24 = vpack.c.bf16 %v7429_v20, %v7428_v19 }
 0x66a   :  { %8808 = vmatpush3.bf16.msra.mxu0 %v8807_v34  ;;  %v7399_v34 = vld [vmem:[%s11009_s5 + $0xf8] sm:$0xff] }
 0x66b   :  { %8840 = vmatpush3.bf16.msra.mxu1 %v8839_v35  ;;  %8810 = vmatprep.subr.bf16.mxu0 %v8809_v38  ;;  %v7430_v35 = vld [vmem:[%s11009_s5 + $0x1f0] sm:$0xff]  ;;  %v8829_v36 = vpack.c.bf16 %v7399_v34, %v7398_v33 }
 0x66c   :  { %8842 = vmatprep.subr.bf16.mxu1 %v8841_v23  ;;  %v7382_v38 = vld [vmem:[%s11009_s5 + $0x70] sm:$0xff]  ;;  %v7383_v23 = vld [vmem:[%s11009_s5 + $0x78] sm:$0xff]  ;;  %v8861_v26 = vpack.c.bf16 %v7431_v37, %v7430_v35  ;;  %s10105_s5 = smov [#allocation13]  }
 0x66d   :  { %v8831_v39 = vpack.c.bf16 %v7383_v23, %v7382_v38  ;;  %s7600_s0 = sshll.u32 %s10105_s5, 4  ;;  %s7601_s0 = int_to_ptr.vmem [resolvable:$true] %s7600_s0 }
 0x66e   :  { %8812 = vmatpush3.bf16.msra.mxu0 %v8811_v43  ;;  %v7335_v43 = vrot.slane %v7330_v42, %v4359_v44  ;;  %s10059_s1 = scalar_lea.vmem %s7601_s0, 32  ;;  %p10064_p13 = scmp.lt.s32.totalorder %s7601_s0, %s7601_s0 }
 0x66f   :  { %8844 = vmatpush3.bf16.msra.mxu1 %v8843_v27  ;;  %8814 = vmatprep.subr.bf16.mxu0 %v8813_v52  ;;  %v7343_v27 = vrot.slane %v7330_v42, %v4367_v45  ;;  %p10060_p12 = scmp.ne.s32.totalorder %s7601_s0, %s10059_s1  ;;  %p10065_p0 = scmp.lt.s32.totalorder %s10059_s1, %s10059_s1 }
 0x670   :  { %8846 = vmatprep.subr.bf16.mxu1 %v8845_v13 }
 0x671   :  { %p10066_p1 = por %p10065_p0, %p10064_p13 }
 0x672   :  { %8816 = vmatpush3.bf16.msra.mxu0 %v8815_v56 }
 0x673   :  { %8848 = vmatpush3.bf16.msra.mxu1 %v8847_v57  ;;  %8818 = vmatprep.subr.bf16.mxu0 %v8817_v60  ;;  %p10067_p2 = pnand %p10066_p1, %p10060_p12 }
 0x674   :  { %8850 = vmatprep.subr.bf16.mxu1 %v8849_v62 }
 0x676   :  { %8820 = vmatpush3.bf16.msra.mxu0 %v8819_v4 }
 0x677   :  { %8852 = vmatpush3.bf16.msra.mxu1 %v8851_v8  ;;  %8822 = vmatprep.subr.bf16.mxu0 %v8821_v1 }
 0x678   :  { %8854 = vmatprep.subr.bf16.mxu1 %v8853_v10 }
 0x67a   :  { %8824 = vmatpush3.bf16.msra.mxu0 %v8823_v21 }
 0x67b   :  { %8856 = vmatpush3.bf16.msra.mxu1 %v8855_v48  ;;  %8826 = vmatprep.subr.bf16.mxu0 %v8825_v22 }
 0x67c   :  { %8858 = vmatprep.subr.bf16.mxu1 %v8857_v24 }
 0x67e   :  { %8828 = vmatpush3.bf16.msra.mxu0 %v8827_v29 }
 0x67f   :  { %8860 = vmatpush3.bf16.msra.mxu1 %v8859_v31  ;;  %8830 = vmatprep.subr.bf16.mxu0 %v8829_v36  ;;  %v7591_v31 = vld [vmem:[#allocation12] sm:$0x1] }
 0x680   :  { %8862 = vmatprep.subr.bf16.mxu1 %v8861_v26 }
 0x682   :  { %8832 = vmatpush3.bf16.msra.mxu0 %v8831_v39 }
 0x683   :  { %8864 = vmatpush3.bf16.msra.mxu1 %v8863_v16 }
 0x738   :  { %v7270_v52 = vpop.f32.mrb[44].mxu0 }
 0x739   :  { %v7313_v13 = vpop.f32.mrb[44].mxu1  ;;  %v7352_v53 = vadd.f32 %v7335_v43, %v7270_v52  ;;  %v7272_v49 = vpop.f32.mrb[45].mxu0 }
 0x73a   :  { %v7354_v54 = vadd.f32 %v7343_v27, %v7313_v13  ;;  %v7315_v55 = vpop.f32.mrb[45].mxu1  ;;  %v7353_v51 = vadd.f32 %v7339_v46, %v7272_v49  ;;  %v7274_v56 = vpop.f32.mrb[46].mxu0 }
 0x73b   :  { %v7355_v63 = vadd.f32 %v7347_v32, %v7315_v55  ;;  %v7317_v57 = vpop.f32.mrb[46].mxu1  ;;  %v7276_v44 = vpop.f32.mrb[47].mxu0  ;;  %v7360_v47 = vmax.f32 %v7352_v53, 0.0  ;;  %v7356_v61 = vadd.f32 %v7335_v43, %v7274_v56 }
 0x73c   :  { %v7319_v58 = vpop.f32.mrb[47].mxu1  ;;  %v7361_v59 = vmax.f32 %v7353_v51, 0.0  ;;  %v7357_v60 = vadd.f32 %v7339_v46, %v7276_v44  ;;  %v7362_v14 = vmax.f32 %v7354_v54, 0.0  ;;  %v7358_v50 = vadd.f32 %v7343_v27, %v7317_v57 }
 0x73d   :  { %v7363_v45 = vmax.f32 %v7355_v63, 0.0  ;;  %v7359_v62 = vadd.f32 %v7347_v32, %v7319_v58  ;;  %v7364_v3 = vmax.f32 %v7356_v61, 0.0 }
 0x73e   :  { %v7365_v0 = vmax.f32 %v7357_v60, 0.0  ;;  %7496 = vmatprep.mubr.f32.mxu0 %v7361_v59  ;;  %v7366_v5 = vmax.f32 %v7358_v50, 0.0 }
 0x73f   :  { %v7367_v2 = vmax.f32 %v7359_v62, 0.0  ;;  %7571 = vmatprep.mubr.f32.mxu1 %v7363_v45  ;;  %7497 = vmatmul.mubr.f32.vlgmr.msra.gmra.mrb[48].mxu0 %v7360_v47 }
 0x740   :  { %7572 = vmatmul.mubr.f32.vlgmr.msra.gmra.mrb[48].mxu1 %v7362_v14  ;;  %7501 = vmatprep.mubr.f32.mxu0 %v7365_v0 }
 0x741   :  { %7576 = vmatprep.mubr.f32.mxu1 %v7367_v2 }
 0x743   :  { %7502 = vmatmul.mubr.f32.gmra.mrb[50].mxu0 %v7364_v3 }
 0x744   :  { %7577 = vmatmul.mubr.f32.gmra.mrb[50].mxu1 %v7366_v5 }
 0x812   :  { %v8477_v7 = vpop.f32.mrb[48].mxu0 }
 0x813   :  { %v8515_v4 = vpop.f32.mrb[48].mxu1  ;;  %v8478_v8 = vpop.f32.mrb[49].mxu0 }
 0x814   :  { %v8516_v6 = vpop.f32.mrb[49].mxu1  ;;  %v8479_v9 = vadd.f32 %v8478_v8, %v8477_v7 }
 0x815   :  { %v8517_v1 = vadd.f32 %v8516_v6, %v8515_v4 }
 0x816   :  { %v8480_v12 = vpop.f32.mrb[50].mxu0 }
 0x817   :  { %v7574_v10 = vadd.f32 %v8517_v1, %v8479_v9  ;;  %v8518_v15 = vpop.f32.mrb[50].mxu1  ;;  %v8481_v17 = vpop.f32.mrb[51].mxu0 }
 0x818   :  { %v8519_v18 = vpop.f32.mrb[51].mxu1  ;;  %v8482_v19 = vadd.f32 %v8481_v17, %v8480_v12 }
 0x819   :  { %v8520_v20 = vadd.f32 %v8519_v18, %v8518_v15  ;;  %v7582_v48 = vsel %vm4607_vm9, %v7574_v10, 0.0 }
 0x81b   :  { %v7579_v21 = vadd.f32 %v8520_v20, %v8482_v19 }
 0x81d   :  { %v7583_v22 = vsel %vm4607_vm9, %v7579_v21, 0.0 }
 0x81e   :  { %v7584_v24 = vadd.f32 %v7583_v22, %v7582_v48 }
 0x820   :  { %v7585_v25 = vrot.slane %v7584_v24, 4 }
 0x822   :  { %v7586_v28 = vadd.f32 %v7585_v25, %v7584_v24 }
 0x824   :  { %v7587_v11 = vrot.slane %v7586_v28, 2 }
 0x826   :  { %v7588_v29 = vadd.f32 %v7587_v11, %v7586_v28 }
 0x828   :  { %v7589_v30 = vrot.slane %v7588_v29, 1 }
 0x82a   :  { %v7590_v33 = vadd.f32 %v7589_v30, %v7588_v29 }
 0x82c   :  { %v7592_v34 = vadd.f32 %v7591_v31, %v7590_v33 }
 0x82e   :  { %7593 = vst.msk [vmem:[#allocation13 + $0x1] sm:$0x1] %vm4619_vm10, %v7592_v34 }
 0x82f   :  { %10070 = shalt.err (!%p10067_p2)
}
 0x830   :  { %s10071_s26 = scalar_lea.hbm %s11011_s7, 32 }
 0x831   :  { %p10072_p3 = scmp.ne.s32.totalorder %s11011_s7, %s10071_s26  ;;  %p10075_p4 = scmp.lt.u32.totalorder %s10071_s26, %s11011_s7 }
 0x833   :  { %p10077_p5 = pnand %p10075_p4, %p10072_p3 }
 0x835   :  { %10080 = shalt.err (!%p10077_p5)
}
 0x836   :  { %7603 = dma.vmem_to_hbm [thread:$0]  %s7601_s0, 32, %s11011_s7, [#allocation6]  }
 0x837   :  { %10087 = dma.done.wait [#allocation6], 32  }
 0x838   :  { %10088 = vsyncadd [#allocation6], 4294967264 }
 0x839   :  { %7607 = vsyncpa [#allocation5], 1 }
 0x83a   :  { %7608 = vsyncpa [#allocation8], 1 }
 0x83b   :  { %7609 = vsyncpa [#allocation11], 1 }
 0x83c   :  { %7610 = vsyncpa [#allocation6], 1 }

</bundles_post_ra>
